<compile_context>
chip_gen: v5e
topology: v5e:2x2
jax: 0.10.0
libtpu: 0.0.40
codegen_flags: <defaults>
</compile_context>

<pallas_src>
import functools

import jax
import jax.numpy as jnp
from jax.experimental import pallas as pl
from jax.experimental.pallas import tpu as pltpu

BN_EPS = 1e-3
LANE = 128


def _round_up(x, m):
    return (x + m - 1) // m * m


def _ds(start, size, stride):
    return pl.ds(start, size) if stride == 1 else pl.ds(start, size, stride)


def _conv_stats_kernel(x_ref, w_ref, conv_ref, sum_ref, ssq_ref, *,
                       KH, KW, stride, th, W_out, H_out, Cp):
    """Pass 1 (one grid step = one (image, output-row tile)):

    Direct conv as KH*KW shifted (th, W_out, C) @ (C, Cp) matmuls (bf16 operands, f32
    accumulation on the MXU).  Emits the bf16 conv tile (consumed by pass 2, so the conv
    is computed once) plus per-tile partial channel sum / sum-of-squares for BatchNorm.
    """
    h = pl.program_id(1)
    row0 = h * th                # first output row of this tile
    base = row0 * stride         # first input row (within the padded image) it needs

    acc = jnp.zeros((th, W_out, Cp), jnp.float32)
    for kh in range(KH):
        for kw in range(KW):
            slab = x_ref[0, _ds(base + kh, th, stride), _ds(kw, W_out, stride), :]
            acc += jnp.einsum("hwc,co->hwo", slab, w_ref[kh, kw],
                              preferred_element_type=jnp.float32)

    if H_out % th != 0:
        # Rows >= H_out only exist because H_out was rounded up to a multiple of th.
        # Zero them so they contribute nothing to the batch statistics (the wrapper
        # divides by the true element count).
        row_ids = row0 + jax.lax.broadcasted_iota(jnp.int32, (th, 1, 1), 0)
        acc = jnp.where(row_ids < H_out, acc, 0.0)

    conv_ref[0] = acc.astype(conv_ref.dtype)
    sum_ref[...] = jnp.sum(acc, axis=(0, 1), keepdims=True)
    ssq_ref[...] = jnp.sum(acc * acc, axis=(0, 1), keepdims=True)


def _bn_relu_kernel(conv_ref, scale_ref, shift_ref, o_ref):
    """Pass 2: folded BatchNorm (per-channel scale/shift) + ReLU epilogue (VPU only)."""
    y = conv_ref[...].astype(jnp.float32) * scale_ref[...] + shift_ref[...]
    o_ref[...] = jnp.maximum(y, 0.0).astype(o_ref.dtype)


def basic_conv2d(x_nchw, weight_oihw, gamma, beta, *, stride=1, padding=1,
                 tile_rows=512):
    """Fused Conv2d(bias=False) + BatchNorm2d(training-mode stats, eps=1e-3) + ReLU.

    x_nchw:      (N, C_in, H, W)        -- PyTorch NCHW convention
    weight_oihw: (C_out, C_in, KH, KW)  -- PyTorch OIHW convention
    gamma/beta:  (C_out,)               -- BatchNorm affine params
    returns:     (N, C_out, H_out, W_out), float32
    """
    N, C, H, W = x_nchw.shape
    C_out, C_in, KH, KW = weight_oihw.shape
    assert C_in == C

    H_out = (H + 2 * padding - KH) // stride + 1
    W_out = (W + 2 * padding - KW) // stride + 1

    # Row tiling: aim for ~tile_rows implicit-GEMM rows (= th * W_out) per grid step.
    th = max(1, min(H_out, max(1, tile_rows // max(1, W_out))))
    n_h = pl.cdiv(H_out, th)
    H_out_pad = n_h * th

    # NHWC, conv zero padding, plus extra zero rows at the bottom so every row tile
    # (including the rounded-up last one) reads strictly in-bounds.
    Hp = max(H + 2 * padding, (H_out_pad - 1) * stride + KH)
    Wp = W + 2 * padding
    x = jnp.transpose(x_nchw, (0, 2, 3, 1)).astype(jnp.float32)       # NHWC
    x_p = jnp.pad(x, ((0, 0), (padding, Hp - H - padding),
                      (padding, padding), (0, 0))).astype(jnp.bfloat16)

    # Lane-dense output channels (Cp multiple of 128); weights as (KH, KW, C_in, Cp).
    Cp = _round_up(C_out, LANE)
    w = jnp.transpose(weight_oihw, (2, 3, 1, 0)).astype(jnp.float32)
    w_p = jnp.pad(w, ((0, 0), (0, 0), (0, 0), (0, Cp - C_out))).astype(jnp.bfloat16)

    G = N * n_h
    cparams = pltpu.CompilerParams(
        dimension_semantics=("parallel", "parallel"),   # no cross-step accumulation
        vmem_limit_bytes=48 * 1024 * 1024,              # safe on v7x (64 MiB physical)
    )

    conv_bytes = N * H_out_pad * W_out * Cp * 2

    # ---- pass 1: direct conv (bf16 intermediate) + per-tile partial batch stats ----
    kern1 = functools.partial(_conv_stats_kernel, KH=KH, KW=KW, stride=stride,
                              th=th, W_out=W_out, H_out=H_out, Cp=Cp)
    conv, sum_p, ssq_p = pl.pallas_call(
        kern1,
        out_shape=(
            jax.ShapeDtypeStruct((N, H_out_pad, W_out, Cp), jnp.bfloat16),
            jax.ShapeDtypeStruct((G, 1, Cp), jnp.float32),
            jax.ShapeDtypeStruct((G, 1, Cp), jnp.float32),
        ),
        grid=(N, n_h),
        in_specs=[
            # Whole padded image per grid step; constant over h -> DMA'd once per image.
            pl.BlockSpec((1, Hp, Wp, C), lambda n, h: (n, 0, 0, 0)),
            pl.BlockSpec((KH, KW, C, Cp), lambda n, h: (0, 0, 0, 0)),
        ],
        out_specs=(
            pl.BlockSpec((1, th, W_out, Cp), lambda n, h: (n, h, 0, 0)),
            pl.BlockSpec((1, 1, Cp), lambda n, h: (n * n_h + h, 0, 0)),
            pl.BlockSpec((1, 1, Cp), lambda n, h: (n * n_h + h, 0, 0)),
        ),
        compiler_params=cparams,
        cost_estimate=pl.CostEstimate(
            flops=2 * N * H_out_pad * W_out * KH * KW * C * Cp,
            transcendentals=0,
            bytes_accessed=x_p.size * 2 + w_p.size * 2 + conv_bytes + 2 * G * Cp * 4,
        ),
    )(x_p, w_p)

    # ---- fold BN into per-channel scale/shift (tree-reduced f32 partials) ----
    m = jnp.float32(N * H_out * W_out)
    total_sum = jnp.sum(sum_p, axis=(0, 1))                 # (Cp,)
    total_ssq = jnp.sum(ssq_p, axis=(0, 1))
    mean = total_sum / m
    var = jnp.maximum(total_ssq / m - mean * mean, 0.0)     # biased (training-mode) var
    gamma_p = jnp.pad(gamma.astype(jnp.float32), (0, Cp - C_out))
    beta_p = jnp.pad(beta.astype(jnp.float32), (0, Cp - C_out))
    scale_v = gamma_p * jax.lax.rsqrt(var + BN_EPS)
    shift_v = beta_p - mean * scale_v
    scale = scale_v.reshape(1, 1, 1, Cp)
    shift = shift_v.reshape(1, 1, 1, Cp)

    # ---- pass 2: scale/shift + ReLU over the bf16 conv intermediate (mem-bound) ----
    y = pl.pallas_call(
        _bn_relu_kernel,
        out_shape=jax.ShapeDtypeStruct((N, H_out_pad, W_out, Cp), jnp.float32),
        grid=(N, n_h),
        in_specs=[
            pl.BlockSpec((1, th, W_out, Cp), lambda n, h: (n, h, 0, 0)),
            pl.BlockSpec((1, 1, 1, Cp), lambda n, h: (0, 0, 0, 0)),
            pl.BlockSpec((1, 1, 1, Cp), lambda n, h: (0, 0, 0, 0)),
        ],
        out_specs=pl.BlockSpec((1, th, W_out, Cp), lambda n, h: (n, h, 0, 0)),
        compiler_params=cparams,
        cost_estimate=pl.CostEstimate(
            flops=3 * N * H_out_pad * W_out * Cp,
            transcendentals=0,
            bytes_accessed=conv_bytes + N * H_out_pad * W_out * Cp * 4 + 2 * Cp * 4,
        ),
    )(conv, scale, shift)

    out = y[:, :H_out, :, :C_out]
    # Module contract is NCHW float32; a fused NHWC pipeline would skip this transpose.
    return jnp.transpose(out, (0, 3, 1, 2))


def _reference(x_nchw, weight_oihw, gamma, beta, padding=1):
    # Pure-JAX f32 reference (same semantics as the PyTorch module in training mode).
    conv = jax.lax.conv_general_dilated(
        x_nchw.astype(jnp.float32), weight_oihw.astype(jnp.float32),
        window_strides=(1, 1), padding=((padding, padding), (padding, padding)),
        dimension_numbers=("NCHW", "OIHW", "NCHW"))
    mean = jnp.mean(conv, axis=(0, 2, 3), keepdims=True)
    var = jnp.mean((conv - mean) ** 2, axis=(0, 2, 3), keepdims=True)
    xhat = (conv - mean) * jax.lax.rsqrt(var + BN_EPS)
    y = xhat * gamma.reshape(1, -1, 1, 1) + beta.reshape(1, -1, 1, 1)
    return jnp.maximum(y, 0.0)


if __name__ == "__main__":
    key = jax.random.PRNGKey(0)
    k_x, k_w, k_g, k_b = jax.random.split(key, 4)

    # BasicConv2d(in_channels=4, out_channels=8, kernel_size=3, padding=1)
    # applied to a (2, 4, 16, 16) NCHW input.
    N, C_in, H, W = 2, 4, 16, 16
    C_out, KH, KW = 8, 3, 3

    x = jax.random.normal(k_x, (N, C_in, H, W), dtype=jnp.float32)
    weight = 0.1 * jax.random.normal(k_w, (C_out, C_in, KH, KW), dtype=jnp.float32)
    gamma = 1.0 + 0.1 * jax.random.normal(k_g, (C_out,), dtype=jnp.float32)
    beta = 0.05 * jax.random.normal(k_b, (C_out,), dtype=jnp.float32)

    out = basic_conv2d(x, weight, gamma, beta, stride=1, padding=1, tile_rows=512)
    out = jax.block_until_ready(out)

    ref = _reference(x, weight, gamma, beta, padding=1)
    assert out.shape == (N, C_out, H, W), out.shape
    # bf16 conv operands + bf16 conv intermediate (f32 MXU accumulation, f32 BN math).
    assert jnp.allclose(out, ref, rtol=3e-2, atol=3e-2), "mismatch vs reference"

    print("KERNEL_OK")
</pallas_src>

<mosaic_0001>
module attributes {stable_mosaic.version = 11 : i64} {
  func.func @_conv_stats_kernel(%arg0: i32, %arg1: i32, %arg2: memref<1x18x18x4xbf16, #tpu.memory_space<vmem>>, %arg3: memref<3x3x4x128xbf16, #tpu.memory_space<vmem>>, %arg4: memref<1x16x16x128xbf16, #tpu.memory_space<vmem>>, %arg5: memref<1x1x128xf32, #tpu.memory_space<vmem>>, %arg6: memref<1x1x128xf32, #tpu.memory_space<vmem>>) attributes {dimension_semantics = [#tpu.dimension_semantics<parallel>, #tpu.dimension_semantics<parallel>], iteration_bounds = array<i64: 2, 1>, scalar_prefetch = 0 : i64, scratch_operands = 0 : i64, tpu.core_type = #tpu.core_type<tc>, window_params = [{transform_indices = @transform_0, window_bounds = array<i64: 1, 18, 18, 4>}, {pipeline_mode = #tpu.pipeline_mode<synchronous>, transform_indices = @transform_1, window_bounds = array<i64: 3, 3, 4, 128>}, {transform_indices = @transform_2, window_bounds = array<i64: 1, 16, 16, 128>}, {transform_indices = @transform_3, window_bounds = array<i64: 1, 1, 128>}, {transform_indices = @transform_4, window_bounds = array<i64: 1, 1, 128>}]} {
    %c16_i32 = arith.constant 16 : i32
    %0 = arith.muli %arg1, %c16_i32 : i32
    %c1_i32 = arith.constant 1 : i32
    %1 = arith.muli %0, %c1_i32 : i32
    %cst = arith.constant 0.000000e+00 : f32
    %2 = vector.broadcast %cst : f32 to vector<16x16x128xf32>
    %c0_i32 = arith.constant 0 : i32
    %3 = arith.addi %1, %c0_i32 : i32
    %c0 = arith.constant 0 : index
    %4 = arith.index_cast %3 : i32 to index
    %c0_0 = arith.constant 0 : index
    %c0_1 = arith.constant 0 : index
    %5 = vector.load %arg2[%c0, %4, %c0_0, %c0_1] : memref<1x18x18x4xbf16, #tpu.memory_space<vmem>>, vector<1x16x16x4xbf16>
    %6 = vector.shape_cast %5 : vector<1x16x16x4xbf16> to vector<16x16x4xbf16>
    %c0_2 = arith.constant 0 : index
    %c0_3 = arith.constant 0 : index
    %c0_4 = arith.constant 0 : index
    %c0_5 = arith.constant 0 : index
    %7 = vector.load %arg3[%c0_2, %c0_3, %c0_4, %c0_5] : memref<3x3x4x128xbf16, #tpu.memory_space<vmem>>, vector<1x1x4x128xbf16>
    %8 = vector.shape_cast %7 : vector<1x1x4x128xbf16> to vector<4x128xbf16>
    "tpu.trace_start"() <{level = 10 : i32, message = "hwc,co->hwo"}> : () -> ()
    %cst_6 = arith.constant dense<0.000000e+00> : vector<16x16x128xf32>
    %9 = tpu.matmul %6, %8, %cst_6 {dimension_numbers = #tpu.dot_dimension_numbers<[2], [0], [0, 1], [1], [0, 0, 0, 1, 1, 1], [], []>} : vector<16x16x4xbf16>, vector<4x128xbf16>, vector<16x16x128xf32> -> vector<16x16x128xf32>
    "tpu.trace_stop"() : () -> ()
    %10 = arith.addf %2, %9 : vector<16x16x128xf32>
    %c0_i32_7 = arith.constant 0 : i32
    %11 = arith.addi %1, %c0_i32_7 : i32
    %c0_8 = arith.constant 0 : index
    %12 = arith.index_cast %11 : i32 to index
    %c1 = arith.constant 1 : index
    %c0_9 = arith.constant 0 : index
    %13 = vector.load %arg2[%c0_8, %12, %c1, %c0_9] : memref<1x18x18x4xbf16, #tpu.memory_space<vmem>>, vector<1x16x16x4xbf16>
    %14 = vector.shape_cast %13 : vector<1x16x16x4xbf16> to vector<16x16x4xbf16>
    %c0_10 = arith.constant 0 : index
    %c1_11 = arith.constant 1 : index
    %c0_12 = arith.constant 0 : index
    %c0_13 = arith.constant 0 : index
    %15 = vector.load %arg3[%c0_10, %c1_11, %c0_12, %c0_13] : memref<3x3x4x128xbf16, #tpu.memory_space<vmem>>, vector<1x1x4x128xbf16>
    %16 = vector.shape_cast %15 : vector<1x1x4x128xbf16> to vector<4x128xbf16>
    "tpu.trace_start"() <{level = 10 : i32, message = "hwc,co->hwo"}> : () -> ()
    %cst_14 = arith.constant dense<0.000000e+00> : vector<16x16x128xf32>
    %17 = tpu.matmul %14, %16, %cst_14 {dimension_numbers = #tpu.dot_dimension_numbers<[2], [0], [0, 1], [1], [0, 0, 0, 1, 1, 1], [], []>} : vector<16x16x4xbf16>, vector<4x128xbf16>, vector<16x16x128xf32> -> vector<16x16x128xf32>
    "tpu.trace_stop"() : () -> ()
    %18 = arith.addf %10, %17 : vector<16x16x128xf32>
    %c0_i32_15 = arith.constant 0 : i32
    %19 = arith.addi %1, %c0_i32_15 : i32
    %c0_16 = arith.constant 0 : index
    %20 = arith.index_cast %19 : i32 to index
    %c2 = arith.constant 2 : index
    %c0_17 = arith.constant 0 : index
    %21 = vector.load %arg2[%c0_16, %20, %c2, %c0_17] : memref<1x18x18x4xbf16, #tpu.memory_space<vmem>>, vector<1x16x16x4xbf16>
    %22 = vector.shape_cast %21 : vector<1x16x16x4xbf16> to vector<16x16x4xbf16>
    %c0_18 = arith.constant 0 : index
    %c2_19 = arith.constant 2 : index
    %c0_20 = arith.constant 0 : index
    %c0_21 = arith.constant 0 : index
    %23 = vector.load %arg3[%c0_18, %c2_19, %c0_20, %c0_21] : memref<3x3x4x128xbf16, #tpu.memory_space<vmem>>, vector<1x1x4x128xbf16>
    %24 = vector.shape_cast %23 : vector<1x1x4x128xbf16> to vector<4x128xbf16>
    "tpu.trace_start"() <{level = 10 : i32, message = "hwc,co->hwo"}> : () -> ()
    %cst_22 = arith.constant dense<0.000000e+00> : vector<16x16x128xf32>
    %25 = tpu.matmul %22, %24, %cst_22 {dimension_numbers = #tpu.dot_dimension_numbers<[2], [0], [0, 1], [1], [0, 0, 0, 1, 1, 1], [], []>} : vector<16x16x4xbf16>, vector<4x128xbf16>, vector<16x16x128xf32> -> vector<16x16x128xf32>
    "tpu.trace_stop"() : () -> ()
    %26 = arith.addf %18, %25 : vector<16x16x128xf32>
    %c1_i32_23 = arith.constant 1 : i32
    %27 = arith.addi %1, %c1_i32_23 : i32
    %c0_24 = arith.constant 0 : index
    %28 = arith.index_cast %27 : i32 to index
    %c0_25 = arith.constant 0 : index
    %c0_26 = arith.constant 0 : index
    %29 = vector.load %arg2[%c0_24, %28, %c0_25, %c0_26] : memref<1x18x18x4xbf16, #tpu.memory_space<vmem>>, vector<1x16x16x4xbf16>
    %30 = vector.shape_cast %29 : vector<1x16x16x4xbf16> to vector<16x16x4xbf16>
    %c1_27 = arith.constant 1 : index
    %c0_28 = arith.constant 0 : index
    %c0_29 = arith.constant 0 : index
    %c0_30 = arith.constant 0 : index
    %31 = vector.load %arg3[%c1_27, %c0_28, %c0_29, %c0_30] : memref<3x3x4x128xbf16, #tpu.memory_space<vmem>>, vector<1x1x4x128xbf16>
    %32 = vector.shape_cast %31 : vector<1x1x4x128xbf16> to vector<4x128xbf16>
    "tpu.trace_start"() <{level = 10 : i32, message = "hwc,co->hwo"}> : () -> ()
    %cst_31 = arith.constant dense<0.000000e+00> : vector<16x16x128xf32>
    %33 = tpu.matmul %30, %32, %cst_31 {dimension_numbers = #tpu.dot_dimension_numbers<[2], [0], [0, 1], [1], [0, 0, 0, 1, 1, 1], [], []>} : vector<16x16x4xbf16>, vector<4x128xbf16>, vector<16x16x128xf32> -> vector<16x16x128xf32>
    "tpu.trace_stop"() : () -> ()
    %34 = arith.addf %26, %33 : vector<16x16x128xf32>
    %c1_i32_32 = arith.constant 1 : i32
    %35 = arith.addi %1, %c1_i32_32 : i32
    %c0_33 = arith.constant 0 : index
    %36 = arith.index_cast %35 : i32 to index
    %c1_34 = arith.constant 1 : index
    %c0_35 = arith.constant 0 : index
    %37 = vector.load %arg2[%c0_33, %36, %c1_34, %c0_35] : memref<1x18x18x4xbf16, #tpu.memory_space<vmem>>, vector<1x16x16x4xbf16>
    %38 = vector.shape_cast %37 : vector<1x16x16x4xbf16> to vector<16x16x4xbf16>
    %c1_36 = arith.constant 1 : index
    %c1_37 = arith.constant 1 : index
    %c0_38 = arith.constant 0 : index
    %c0_39 = arith.constant 0 : index
    %39 = vector.load %arg3[%c1_36, %c1_37, %c0_38, %c0_39] : memref<3x3x4x128xbf16, #tpu.memory_space<vmem>>, vector<1x1x4x128xbf16>
    %40 = vector.shape_cast %39 : vector<1x1x4x128xbf16> to vector<4x128xbf16>
    "tpu.trace_start"() <{level = 10 : i32, message = "hwc,co->hwo"}> : () -> ()
    %cst_40 = arith.constant dense<0.000000e+00> : vector<16x16x128xf32>
    %41 = tpu.matmul %38, %40, %cst_40 {dimension_numbers = #tpu.dot_dimension_numbers<[2], [0], [0, 1], [1], [0, 0, 0, 1, 1, 1], [], []>} : vector<16x16x4xbf16>, vector<4x128xbf16>, vector<16x16x128xf32> -> vector<16x16x128xf32>
    "tpu.trace_stop"() : () -> ()
    %42 = arith.addf %34, %41 : vector<16x16x128xf32>
    %c1_i32_41 = arith.constant 1 : i32
    %43 = arith.addi %1, %c1_i32_41 : i32
    %c0_42 = arith.constant 0 : index
    %44 = arith.index_cast %43 : i32 to index
    %c2_43 = arith.constant 2 : index
    %c0_44 = arith.constant 0 : index
    %45 = vector.load %arg2[%c0_42, %44, %c2_43, %c0_44] : memref<1x18x18x4xbf16, #tpu.memory_space<vmem>>, vector<1x16x16x4xbf16>
    %46 = vector.shape_cast %45 : vector<1x16x16x4xbf16> to vector<16x16x4xbf16>
    %c1_45 = arith.constant 1 : index
    %c2_46 = arith.constant 2 : index
    %c0_47 = arith.constant 0 : index
    %c0_48 = arith.constant 0 : index
    %47 = vector.load %arg3[%c1_45, %c2_46, %c0_47, %c0_48] : memref<3x3x4x128xbf16, #tpu.memory_space<vmem>>, vector<1x1x4x128xbf16>
    %48 = vector.shape_cast %47 : vector<1x1x4x128xbf16> to vector<4x128xbf16>
    "tpu.trace_start"() <{level = 10 : i32, message = "hwc,co->hwo"}> : () -> ()
    %cst_49 = arith.constant dense<0.000000e+00> : vector<16x16x128xf32>
    %49 = tpu.matmul %46, %48, %cst_49 {dimension_numbers = #tpu.dot_dimension_numbers<[2], [0], [0, 1], [1], [0, 0, 0, 1, 1, 1], [], []>} : vector<16x16x4xbf16>, vector<4x128xbf16>, vector<16x16x128xf32> -> vector<16x16x128xf32>
    "tpu.trace_stop"() : () -> ()
    %50 = arith.addf %42, %49 : vector<16x16x128xf32>
    %c2_i32 = arith.constant 2 : i32
    %51 = arith.addi %1, %c2_i32 : i32
    %c0_50 = arith.constant 0 : index
    %52 = arith.index_cast %51 : i32 to index
    %c0_51 = arith.constant 0 : index
    %c0_52 = arith.constant 0 : index
    %53 = vector.load %arg2[%c0_50, %52, %c0_51, %c0_52] : memref<1x18x18x4xbf16, #tpu.memory_space<vmem>>, vector<1x16x16x4xbf16>
    %54 = vector.shape_cast %53 : vector<1x16x16x4xbf16> to vector<16x16x4xbf16>
    %c2_53 = arith.constant 2 : index
    %c0_54 = arith.constant 0 : index
    %c0_55 = arith.constant 0 : index
    %c0_56 = arith.constant 0 : index
    %55 = vector.load %arg3[%c2_53, %c0_54, %c0_55, %c0_56] : memref<3x3x4x128xbf16, #tpu.memory_space<vmem>>, vector<1x1x4x128xbf16>
    %56 = vector.shape_cast %55 : vector<1x1x4x128xbf16> to vector<4x128xbf16>
    "tpu.trace_start"() <{level = 10 : i32, message = "hwc,co->hwo"}> : () -> ()
    %cst_57 = arith.constant dense<0.000000e+00> : vector<16x16x128xf32>
    %57 = tpu.matmul %54, %56, %cst_57 {dimension_numbers = #tpu.dot_dimension_numbers<[2], [0], [0, 1], [1], [0, 0, 0, 1, 1, 1], [], []>} : vector<16x16x4xbf16>, vector<4x128xbf16>, vector<16x16x128xf32> -> vector<16x16x128xf32>
    "tpu.trace_stop"() : () -> ()
    %58 = arith.addf %50, %57 : vector<16x16x128xf32>
    %c2_i32_58 = arith.constant 2 : i32
    %59 = arith.addi %1, %c2_i32_58 : i32
    %c0_59 = arith.constant 0 : index
    %60 = arith.index_cast %59 : i32 to index
    %c1_60 = arith.constant 1 : index
    %c0_61 = arith.constant 0 : index
    %61 = vector.load %arg2[%c0_59, %60, %c1_60, %c0_61] : memref<1x18x18x4xbf16, #tpu.memory_space<vmem>>, vector<1x16x16x4xbf16>
    %62 = vector.shape_cast %61 : vector<1x16x16x4xbf16> to vector<16x16x4xbf16>
    %c2_62 = arith.constant 2 : index
    %c1_63 = arith.constant 1 : index
    %c0_64 = arith.constant 0 : index
    %c0_65 = arith.constant 0 : index
    %63 = vector.load %arg3[%c2_62, %c1_63, %c0_64, %c0_65] : memref<3x3x4x128xbf16, #tpu.memory_space<vmem>>, vector<1x1x4x128xbf16>
    %64 = vector.shape_cast %63 : vector<1x1x4x128xbf16> to vector<4x128xbf16>
    "tpu.trace_start"() <{level = 10 : i32, message = "hwc,co->hwo"}> : () -> ()
    %cst_66 = arith.constant dense<0.000000e+00> : vector<16x16x128xf32>
    %65 = tpu.matmul %62, %64, %cst_66 {dimension_numbers = #tpu.dot_dimension_numbers<[2], [0], [0, 1], [1], [0, 0, 0, 1, 1, 1], [], []>} : vector<16x16x4xbf16>, vector<4x128xbf16>, vector<16x16x128xf32> -> vector<16x16x128xf32>
    "tpu.trace_stop"() : () -> ()
    %66 = arith.addf %58, %65 : vector<16x16x128xf32>
    %c2_i32_67 = arith.constant 2 : i32
    %67 = arith.addi %1, %c2_i32_67 : i32
    %c0_68 = arith.constant 0 : index
    %68 = arith.index_cast %67 : i32 to index
    %c2_69 = arith.constant 2 : index
    %c0_70 = arith.constant 0 : index
    %69 = vector.load %arg2[%c0_68, %68, %c2_69, %c0_70] : memref<1x18x18x4xbf16, #tpu.memory_space<vmem>>, vector<1x16x16x4xbf16>
    %70 = vector.shape_cast %69 : vector<1x16x16x4xbf16> to vector<16x16x4xbf16>
    %c2_71 = arith.constant 2 : index
    %c2_72 = arith.constant 2 : index
    %c0_73 = arith.constant 0 : index
    %c0_74 = arith.constant 0 : index
    %71 = vector.load %arg3[%c2_71, %c2_72, %c0_73, %c0_74] : memref<3x3x4x128xbf16, #tpu.memory_space<vmem>>, vector<1x1x4x128xbf16>
    %72 = vector.shape_cast %71 : vector<1x1x4x128xbf16> to vector<4x128xbf16>
    "tpu.trace_start"() <{level = 10 : i32, message = "hwc,co->hwo"}> : () -> ()
    %cst_75 = arith.constant dense<0.000000e+00> : vector<16x16x128xf32>
    %73 = tpu.matmul %70, %72, %cst_75 {dimension_numbers = #tpu.dot_dimension_numbers<[2], [0], [0, 1], [1], [0, 0, 0, 1, 1, 1], [], []>} : vector<16x16x4xbf16>, vector<4x128xbf16>, vector<16x16x128xf32> -> vector<16x16x128xf32>
    "tpu.trace_stop"() : () -> ()
    %74 = arith.addf %66, %73 : vector<16x16x128xf32>
    %75 = arith.truncf %74 : vector<16x16x128xf32> to vector<16x16x128xbf16>
    %c0_76 = arith.constant 0 : index
    %c0_77 = arith.constant 0 : index
    %c0_78 = arith.constant 0 : index
    %c0_79 = arith.constant 0 : index
    %76 = vector.load %arg4[%c0_76, %c0_77, %c0_78, %c0_79] : memref<1x16x16x128xbf16, #tpu.memory_space<vmem>>, vector<1x16x16x128xbf16>
    %77 = vector.shape_cast %76 : vector<1x16x16x128xbf16> to vector<16x16x128xbf16>
    %78 = vector.shape_cast %75 : vector<16x16x128xbf16> to vector<1x16x16x128xbf16>
    tpu.vector_store %arg4[%c0_76, %c0_77, %c0_78, %c0_79], %78 {strides = array<i32>} : memref<1x16x16x128xbf16, #tpu.memory_space<vmem>>, vector<1x16x16x128xbf16>,
    %cst_80 = arith.constant dense<0.000000e+00> : vector<128xf32>
    %79 = vector.multi_reduction <add>, %74, %cst_80 [0, 1] : vector<16x16x128xf32> to vector<128xf32>
    %80 = vector.shape_cast %79 : vector<128xf32> to vector<1x1x128xf32>
    %c0_81 = arith.constant 0 : index
    %c0_82 = arith.constant 0 : index
    %c0_83 = arith.constant 0 : index
    %81 = vector.load %arg5[%c0_81, %c0_82, %c0_83] : memref<1x1x128xf32, #tpu.memory_space<vmem>>, vector<1x1x128xf32>
    tpu.vector_store %arg5[%c0_81, %c0_82, %c0_83], %80 {strides = array<i32>} : memref<1x1x128xf32, #tpu.memory_space<vmem>>, vector<1x1x128xf32>,
    %82 = arith.mulf %74, %74 : vector<16x16x128xf32>
    %cst_84 = arith.constant dense<0.000000e+00> : vector<128xf32>
    %83 = vector.multi_reduction <add>, %82, %cst_84 [0, 1] : vector<16x16x128xf32> to vector<128xf32>
    %84 = vector.shape_cast %83 : vector<128xf32> to vector<1x1x128xf32>
    %c0_85 = arith.constant 0 : index
    %c0_86 = arith.constant 0 : index
    %c0_87 = arith.constant 0 : index
    %85 = vector.load %arg6[%c0_85, %c0_86, %c0_87] : memref<1x1x128xf32, #tpu.memory_space<vmem>>, vector<1x1x128xf32>
    tpu.vector_store %arg6[%c0_85, %c0_86, %c0_87], %84 {strides = array<i32>} : memref<1x1x128xf32, #tpu.memory_space<vmem>>, vector<1x1x128xf32>,
    return
  }
  func.func @transform_0(%arg0: i32, %arg1: i32) -> (i32, i32, i32, i32) {
    %c0_i32 = arith.constant 0 : i32
    %c0_i32_0 = arith.constant 0 : i32
    %c0_i32_1 = arith.constant 0 : i32
    %c0_i32_2 = arith.constant 0 : i32
    return %arg0, %c0_i32, %c0_i32_0, %c0_i32_1 : i32, i32, i32, i32
  }
  func.func @transform_1(%arg0: i32, %arg1: i32) -> (i32, i32, i32, i32) {
    %c0_i32 = arith.constant 0 : i32
    %c0_i32_0 = arith.constant 0 : i32
    %c0_i32_1 = arith.constant 0 : i32
    %c0_i32_2 = arith.constant 0 : i32
    %c0_i32_3 = arith.constant 0 : i32
    return %c0_i32, %c0_i32_0, %c0_i32_1, %c0_i32_2 : i32, i32, i32, i32
  }
  func.func @transform_2(%arg0: i32, %arg1: i32) -> (i32, i32, i32, i32) {
    %c0_i32 = arith.constant 0 : i32
    %c0_i32_0 = arith.constant 0 : i32
    %c0_i32_1 = arith.constant 0 : i32
    return %arg0, %arg1, %c0_i32, %c0_i32_0 : i32, i32, i32, i32
  }
  func.func @transform_3(%arg0: i32, %arg1: i32) -> (i32, i32, i32) {
    %c1_i32 = arith.constant 1 : i32
    %0 = arith.muli %arg0, %c1_i32 : i32
    %1 = arith.addi %0, %arg1 : i32
    %c0_i32 = arith.constant 0 : i32
    %c0_i32_0 = arith.constant 0 : i32
    %c0_i32_1 = arith.constant 0 : i32
    return %1, %c0_i32, %c0_i32_0 : i32, i32, i32
  }
  func.func @transform_4(%arg0: i32, %arg1: i32) -> (i32, i32, i32) {
    %c1_i32 = arith.constant 1 : i32
    %0 = arith.muli %arg0, %c1_i32 : i32
    %1 = arith.addi %0, %arg1 : i32
    %c0_i32 = arith.constant 0 : i32
    %c0_i32_0 = arith.constant 0 : i32
    %c0_i32_1 = arith.constant 0 : i32
    return %1, %c0_i32, %c0_i32_0 : i32, i32, i32
  }
}

</mosaic_0001>

<bundles_post_ra>
// kernel: tpu_custom_call.1
= control target key start
LH: loop header
LB: loop body
LE: loop exit
PB: predicated region body
PF: predicated region fallthrough
CT: control target
= control target key end

     0   :  { %10 = vsyncpa [#allocation3], 0  ;;  %s7038_s0 = inlined_call_operand.vmem [shape: bf16[2,18,18,4], index: 0, kind: input, shape index: {}]   ;;  %s7039_s1 = inlined_call_operand.vmem [shape: bf16[3,3,4,128], index: 1, kind: input, shape index: {}]   ;;  %s7040_s2 = inlined_call_operand.hbm [shape: bf16[2,16,16,128], index: 2, kind: output, shape index: {0}]   ;;  %s7041_s3 = inlined_call_operand.hbm [shape: f32[2,1,128], index: 3, kind: output, shape index: {1}]   ;;  %s7042_s4 = inlined_call_operand.hbm [shape: f32[2,1,128], index: 4, kind: output, shape index: {2}]  }
   0x1   :  { %12 = vsyncpa [#allocation3 + $0x1], 0 }
   0x2   :  { %13 = vsyncpa [#allocation5], 0 }
   0x3   :  { %15 = vsyncpa [#allocation5 + $0x1], 0  ;;  %s5706_s15 = smov 0   ;;  %s5708_s16 = smov 0  }
   0x4   :  { %s5710_s17 = smov 0   ;;  %s5712_s18 = smov 0  }
   0x5   :  { %s5714_s19 = smov 0   ;;  %s5716_s20 = smov 0  }
   0x6 LB: > { %s4664_s21 = sadd.s32 4294967295, %s5677_s20   ;;  %s4665_s22 = sadd.s32 4294967294, %s5677_s20   ;;  %s5677_s20 = sphi %s5716_s20, %s21_s20   ;;  %s5673_s19 = sphi %s5714_s19, %s7059_s19   ;;  %s5669_s18 = sphi %s5712_s18, %s7058_s18   ;;  %s5665_s17 = sphi %s5710_s17, %s7057_s17   ;;  %s5661_s16 = sphi %s5708_s16, %s7056_s16   ;;  %s5657_s15 = sphi %s5706_s15, %s7055_s15  }
   0x7   : > { %s33_s23 = sadd.s32 1, %s5673_s19  ;;  %s89_s24 = sadd.s32 1, %s5665_s17 }
   0x8   : > { %p35_p0 = scmp.ge.s32.totalorder %s33_s23, 2  ;;  %p99_p1 = scmp.ne.s32.totalorder %s5665_s17, %s5661_s16 }
   0x9   : > { %p100_p2 = scmp.eq.s32.totalorder %s4664_s21, 1  ;;  %p105_p3 = scmp.ne.s32.totalorder %s5661_s16, %s5657_s15 }
   0xa   : > { %s7061_s23 = smov (%p35_p0, %s33_s23), 0  ;;  %p106_p5 = scmp.eq.s32.totalorder %s4665_s22, 1 }
   0xb   : > { %p5748_p4 = por %p100_p2, %p99_p1  ;;  %s84_s26 = ssub.s32 %s5673_s19, %s7061_s23 }
   0xc   : > { %p4668_p6 = scmp.ge.s32.totalorder %s5677_s20, 1  ;;  %p87_p7 = scmp.eq.s32.totalorder %s84_s26, 0 }
   0xd   : > { %p5757_p8 = por %p106_p5, %p105_p3  ;;  %p191_p9 = scmp.lt.s32.totalorder %s5677_s20, 3 }
   0xe   : > { %s5763_s28 = scalar_select %p87_p7, %s5665_s17, %s89_s24  }
   0xf   : > { %p192_p10 = pnand %p4668_p6, %p191_p9 }
  0x11   : > { %195 = sbr.rel (%p192_p10) target bundleno = 800 (0x320), region = 28 }
  0x16   : > { %v4671_v0 = vld [vmem:[%s7039_s1 + $0x2] sm:$0x3]  ;;  %vm805_vm0 = vcmask 1041408   ;;  %p225_p11 = scmp.lt.s32.totalorder %s5669_s18, 1  ;;  %v4768_v2 = vld [vmem:[%s7039_s1 + $0x4] sm:$0x3] }
  0x17   : > { %v807_v1 = vsel %vm805_vm0, %v4671_v0, 0  ;;  %v1428_v3 = vsel %vm805_vm0, %v4768_v2, 0  ;;  %v4833_v4 = vld [vmem:[%s7039_s1 + $0x6] sm:$0x3]  ;;  %v270_v5 = vld [vmem:[%s7039_s1] sm:$0x3] }
  0x18   : > { %5468 = vmatpush.bf16.msra.mxu1 %v807_v1  ;;  %5469 = vmatpush.bf16.msra.mxu2 %v807_v1  ;;  %s226_s7 = scalar_select %p225_p11, %s5669_s18, 1  ;;  %v4962_v6 = vld [vmem:[%s7039_s1 + $0x8] sm:$0x3]  ;;  %v1718_v7 = vsel %vm805_vm0, %v4833_v4, 0  ;;  %v1027_v8 = vsel %vm805_vm0, %v270_v5, 0  ;;  %vm756_vm3 = vcmask 31744  }
  0x19   : > { %5470 = vmatpush.bf16.msra.mxu3 %v807_v1  ;;  %816 = vmatpush.bf16.msra.mxu0 %v807_v1  ;;  %v2372_v9 = vsel %vm805_vm0, %v4962_v6, 0  ;;  %vm321_vm1 = vsmask.f32 3328  ;;  %vm322_vm2 = vsmask.f32 7440  ;;  %vm1216_vm5 = vcmask 1042432  }
  0x1a   : > { %s5471_s14 = smul.u32 216, %s226_s7  ;;  %vm5802_vm4 = vmor %vm321_vm1, %vm322_vm2  ;;  %vm1217_vm6 = vcmask 1046532   ;;  %s6727_s12 = sand.u32 1, %s5661_s16  }
  0x1b   : > { %vm5928_vm7 = vmor %vm1216_vm5, %vm1217_vm6  ;;  %s4669_s13 = sshll.u32 %s6727_s12, 7  ;;  %s5372_s24 = sshll.u32 %s5669_s18, 7 }
  0x1c   : > { %1437 = vmatpush.bf16.msrb.mxu2 %v1428_v3  ;;  %1036 = vmatpush.bf16.msrb.mxu1 %v1027_v8  ;;  %s5790_s29 = scalar_lea.vmem %s7038_s0, %s5471_s14  ;;  %s6744_s14 = scalar_lea.vmem [#allocation2], %s4669_s13 }
  0x1d   : > { %1727 = vmatpush.bf16.msrb.mxu3 %v1718_v7  ;;  %2381 = vmatpush.bf16.msrb.mxu0 %v2372_v9  ;;  %v283_v10 = vld [vmem:[%s5790_s29 + $0x30] sm:$0xf]  ;;  %v284_v11 = vld [vmem:[%s5790_s29 + $0x34] sm:$0xf]  ;;  %v285_v12 = vld [vmem:[%s5790_s29 + $0x38] sm:$0x1]  ;;  %s4494_s30 = scalar_lea.hbm %s7040_s2, %s5372_s24 }
  0x1e   : > { %v421_v13 = vshrl.u32 %v283_v10, 16  ;;  %v424_v14 = vshll.u32 %v283_v10, 16  ;;  %v430_v15 = vshll.u32 %v284_v11, 16  ;;  %v434_v16 = vshrl.u32 %v284_v11, 16  ;;  %v295_v17 = vld [vmem:[%s5790_s29 + $0x60] sm:$0xf] }
  0x1f   : > { %v440_v18 = vshll.u32 %v285_v12, 16  ;;  %v296_v19 = vld [vmem:[%s5790_s29 + $0x64] sm:$0xf]  ;;  %v297_v20 = vld [vmem:[%s5790_s29 + $0x68] sm:$0x1]  ;;  %v517_v21 = vshrl.u32 %v295_v17, 16 }
  0x20   : > { %v423_v22 = vrot.slane %v421_v13, 4  ;;  %v426_v23 = vrot.slane %v424_v14, 5  ;;  %v432_v24 = vrot.slane %v430_v15, 5  ;;  %v436_v25 = vrot.slane %v434_v16, 4  ;;  %v307_v26 = vld [vmem:[%s5790_s29 + $0x90] sm:$0xf] }
  0x21   : > { %v442_v27 = vrot.slane %v440_v18, 5  ;;  %v519_v28 = vrot.slane %v517_v21, 4  ;;  %v520_v29 = vshll.u32 %v295_v17, 16  ;;  %v526_v30 = vshll.u32 %v296_v19, 16  ;;  %v308_v35 = vld [vmem:[%s5790_s29 + $0x94] sm:$0xf] }
  0x22   : > { %v427_v31 = vor.u32 %v426_v23, %v423_v22  ;;  %v437_v32 = vor.u32 %v436_v25, %v432_v24  ;;  %v530_v33 = vshrl.u32 %v296_v19, 16  ;;  %v536_v34 = vshll.u32 %v297_v20, 16  ;;  %v309_v46 = vld [vmem:[%s5790_s29 + $0x98] sm:$0x1]  ;;  %v271_v54 = vld [vmem:[%s5790_s29] sm:$0xf] }
  0x23   : > { %v522_v37 = vrot.slane %v520_v29, 5  ;;  %v528_v38 = vrot.slane %v526_v30, 5  ;;  %v613_v39 = vshrl.u32 %v307_v26, 16  ;;  %v616_v40 = vshll.u32 %v307_v26, 16  ;;  %v272_v2 = vld [vmem:[%s5790_s29 + $0x4] sm:$0xf] }
  0x24   : > { %v428_v41 = vrot.slane %v427_v31, 4  ;;  %v438_v42 = vrot.slane %v437_v32, 4  ;;  %v532_v43 = vrot.slane %v530_v33, 4  ;;  %v538_v44 = vrot.slane %v536_v34, 5  ;;  %v273_v8 = vld [vmem:[%s5790_s29 + $0x8] sm:$0x1] }
  0x25   : > { %v523_v45 = vor.u32 %v522_v37, %v519_v28  ;;  %v615_v47 = vrot.slane %v613_v39, 4  ;;  %v618_v48 = vrot.slane %v616_v40, 5  ;;  %v622_v49 = vshll.u32 %v308_v35, 16  ;;  %v286_v9 = vld [vmem:[%s5790_s29 + $0x3c] sm:$0xf]  ;;  %s4495_s5 = sshll.u32 %s6744_s14, 4  ;;  %s4496_s5 = int_to_ptr.vmem [resolvable:$true] %s4495_s5 }
  0x26   : > { %v433_v50 = vsel %vm5802_vm4, %v428_v41, %v432_v24  ;;  %v443_v51 = vsel %vm5802_vm4, %v438_v42, %v442_v27  ;;  %v533_v52 = vor.u32 %v532_v43, %v528_v38  ;;  %v626_v53 = vshrl.u32 %v308_v35, 16  ;;  %v287_v18 = vld [vmem:[%s5790_s29 + $0x40] sm:$0xf]  ;;  %v288_v22 = vld [vmem:[%s5790_s29 + $0x44] sm:$0x1]  ;;  %s4497_s6 = sshll.u32 %s4494_s30, 4  ;;  %s4498_s6 = int_to_ptr.hbm [resolvable:$true] %s4497_s6 }
  0x27   : > { %v716_v55 = vunpack.c.l.b16 %v433_v50  ;;  %v717_v56 = vunpack.c.l.b16 %v443_v51  ;;  %v524_v57 = vrot.slane %v523_v45, 4  ;;  %v619_v58 = vor.u32 %v618_v48, %v615_v47  ;;  %v298_v28 = vld [vmem:[%s5790_s29 + $0x6c] sm:$0xf]  ;;  %v299_v41 = vld [vmem:[%s5790_s29 + $0x70] sm:$0xf]  ;;  %s4472_s7 = scalar_lea.sflag [#allocation3], %s6727_s12 }
  0x28   : > { %v534_v59 = vrot.slane %v533_v52, 4  ;;  %v624_v60 = vrot.slane %v622_v49, 5  ;;  %v628_v61 = vrot.slane %v626_v53, 4  ;;  %v632_v62 = vshll.u32 %v309_v46, 16  ;;  %v300_v47 = vld [vmem:[%s5790_s29 + $0x74] sm:$0x1] }
  0x29   : > { %v744_v63 = vpack.c.b16 %v717_v56, %v716_v55  ;;  %v529_v0 = vsel %vm5802_vm4, %v524_v57, %v528_v38  ;;  %v620_v1 = vrot.slane %v619_v58, 4  ;;  %v325_v3 = vshrl.u32 %v271_v54, 16  ;;  %v310_v52 = vld [vmem:[%s5790_s29 + $0x9c] sm:$0xf]  ;;  %s5553_s8 = sshra.s32 %s4498_s6, 4  ;;  %s5559_s13 = scalar_lea.hbm %s7040_s2, 256  ;;  %s5554_s8 = int_to_ptr.hbm [resolvable:$true] %s5553_s8 }
  0x2a   : > { %v539_v4 = vsel %vm5802_vm4, %v534_v59, %v538_v44  ;;  %v724_v5 = vunpack.c.l.b16 %v529_v0  ;;  %v629_v6 = vor.u32 %v628_v61, %v624_v60  ;;  %v634_v7 = vrot.slane %v632_v62, 5  ;;  %v311_v0 = vld [vmem:[%s5790_s29 + $0xa0] sm:$0xf]  ;;  %s5555_s9 = scalar_lea.hbm %s5554_s8, 128  ;;  %p5560_p1 = scmp.lt.s32.totalorder %s5554_s8, %s7040_s2 }
  0x2b   : > { %4676 = vmatmul.msk.bf16.vlgmr.msra.gmra.mxu1 %vm756_vm3, %v744_v63  ;;  %v725_v10 = vunpack.c.l.b16 %v539_v4  ;;  %v625_v11 = vsel %vm5802_vm4, %v620_v1, %v624_v60  ;;  %v327_v12 = vrot.slane %v325_v3, 4  ;;  %v328_v13 = vshll.u32 %v271_v54, 16  ;;  %p5556_p12 = scmp.ne.s32.totalorder %s5554_s8, %s5555_s9  ;;  %p5561_p2 = scmp.lt.s32.totalorder %s5559_s13, %s5555_s9 }
  0x2c   : > { %v630_v14 = vrot.slane %v629_v6, 4  ;;  %v732_v15 = vunpack.c.l.b16 %v625_v11  ;;  %v334_v16 = vshll.u32 %v272_v2, 16  ;;  %v338_v17 = vshrl.u32 %v272_v2, 16  ;;  %v312_v6 = vld [vmem:[%s5790_s29 + $0xa4] sm:$0x1] }
  0x2d   : > { %v748_v19 = vpack.c.b16 %v725_v10, %v724_v5  ;;  %v330_v20 = vrot.slane %v328_v13, 5  ;;  %v344_v21 = vshll.u32 %v273_v8, 16  ;;  %v445_v23 = vshrl.u32 %v286_v9, 16  ;;  %p5557_p13 = pnand %p5556_p12, %p5748_p4  ;;  %p5562_p3 = por %p5561_p2, %p5560_p1 }
  0x2e   : > { %v635_v24 = vsel %vm5802_vm4, %v630_v14, %v634_v7  ;;  %v336_v25 = vrot.slane %v334_v16, 5  ;;  %v340_v26 = vrot.slane %v338_v17, 4  ;;  %v448_v27 = vshll.u32 %v286_v9, 16  ;;  %v274_v7 = vld [vmem:[%s5790_s29 + $0xc] sm:$0xf] }
  0x2f   : > { %4680 = vmatmul.msk.bf16.vlgmr.msra.gmra.mxu2 %vm756_vm3, %v748_v19  ;;  %v733_v29 = vunpack.c.l.b16 %v635_v24  ;;  %v331_v30 = vor.u32 %v330_v20, %v327_v12  ;;  %v346_v31 = vrot.slane %v344_v21, 5  ;;  %v447_v32 = vrot.slane %v445_v23, 4  ;;  %v275_v19 = vld [vmem:[%s5790_s29 + $0x10] sm:$0xf]  ;;  %p5558_p0 = pneg %p5557_p13 }
  0x30   : > { %v341_v33 = vor.u32 %v340_v26, %v336_v25  ;;  %v450_v34 = vrot.slane %v448_v27, 5  ;;  %v454_v35 = vshll.u32 %v287_v18, 16  ;;  %v458_v37 = vshrl.u32 %v287_v18, 16 }
  0x31   : > { %v752_v38 = vpack.c.b16 %v733_v29, %v732_v15  ;;  %v332_v39 = vrot.slane %v331_v30, 4  ;;  %v464_v40 = vshll.u32 %v288_v22, 16  ;;  %v541_v42 = vshrl.u32 %v298_v28, 16  ;;  %p5563_p5 = pnand %p5562_p3, %p5558_p0 }
  0x32   : > { %v342_v43 = vrot.slane %v341_v33, 4  ;;  %v451_v44 = vor.u32 %v450_v34, %v447_v32  ;;  %v456_v45 = vrot.slane %v454_v35, 5  ;;  %v460_v46 = vrot.slane %v458_v37, 4  ;;  %v289_v34 = vld [vmem:[%s5790_s29 + $0x48] sm:$0xf] }
  0x33   : > { %4684 = vmatmul.msk.bf16.vlgmr.msra.gmra.mxu3 %vm756_vm3, %v752_v38  ;;  %v337_v48 = vsel %vm5802_vm4, %v332_v39, %v336_v25  ;;  %v466_v49 = vrot.slane %v464_v40, 5  ;;  %v543_v50 = vrot.slane %v541_v42, 4  ;;  %v544_v51 = vshll.u32 %v298_v28, 16  ;;  %v276_v25 = vld [vmem:[%s5790_s29 + $0x14] sm:$0x1] }
  0x34   : > { %v347_v53 = vsel %vm5802_vm4, %v342_v43, %v346_v31  ;;  %v708_v54 = vunpack.c.l.b16 %v337_v48  ;;  %v452_v55 = vrot.slane %v451_v44, 4  ;;  %v461_v56 = vor.u32 %v460_v46, %v456_v45 }
  0x35   : > { %v709_v57 = vunpack.c.l.b16 %v347_v53  ;;  %v546_v58 = vrot.slane %v544_v51, 5  ;;  %v550_v59 = vshll.u32 %v299_v41, 16  ;;  %v554_v60 = vshrl.u32 %v299_v41, 16 }
  0x36   : > { %v457_v61 = vsel %vm5802_vm4, %v452_v55, %v456_v45  ;;  %v462_v62 = vrot.slane %v461_v56, 4  ;;  %v560_v63 = vshll.u32 %v300_v47, 16  ;;  %v637_v1 = vshrl.u32 %v310_v52, 16  ;;  %v290_v47 = vld [vmem:[%s5790_s29 + $0x4c] sm:$0xf] }
  0x37   : > { %v740_v2 = vpack.c.b16 %v709_v57, %v708_v54  ;;  %v718_v3 = vunpack.c.l.b16 %v457_v61  ;;  %v547_v4 = vor.u32 %v546_v58, %v543_v50  ;;  %v552_v5 = vrot.slane %v550_v59, 5  ;;  %v301_v54 = vld [vmem:[%s5790_s29 + $0x78] sm:$0xf] }
  0x38   : > { %v467_v8 = vsel %vm5802_vm4, %v462_v62, %v466_v49  ;;  %v556_v9 = vrot.slane %v554_v60, 4  ;;  %v562_v10 = vrot.slane %v560_v63, 5  ;;  %v639_v11 = vrot.slane %v637_v1, 4 }
  0x39   : > { %4672 = vmatmul.msk.bf16.vlgmr.msra.gmra.mxu0 %vm756_vm3, %v740_v2  ;;  %v719_v12 = vunpack.c.l.b16 %v467_v8  ;;  %v548_v13 = vrot.slane %v547_v4, 4  ;;  %v640_v14 = vshll.u32 %v310_v52, 16  ;;  %v646_v15 = vshll.u32 %v311_v0, 16  ;;  %v291_v52 = vld [vmem:[%s5790_s29 + $0x50] sm:$0x1] }
  0x3a   : > { %v557_v16 = vor.u32 %v556_v9, %v552_v5  ;;  %v650_v17 = vshrl.u32 %v311_v0, 16  ;;  %v656_v18 = vshll.u32 %v312_v6, 16  ;;  %v349_v20 = vshrl.u32 %v274_v7, 16  ;;  %v303_v8 = vld [vmem:[%s5790_s29 + $0x80] sm:$0x1] }
  0x3b   : > { %v745_v21 = vpack.c.b16 %v719_v12, %v718_v3  ;;  %v553_v22 = vsel %vm5802_vm4, %v548_v13, %v552_v5  ;;  %v642_v23 = vrot.slane %v640_v14, 5  ;;  %v648_v24 = vrot.slane %v646_v15, 5  ;;  %v313_v13 = vld [vmem:[%s5790_s29 + $0xa8] sm:$0xf] }
  0x3c   : > { %v558_v26 = vrot.slane %v557_v16, 4  ;;  %v726_v27 = vunpack.c.l.b16 %v553_v22  ;;  %v652_v28 = vrot.slane %v650_v17, 4  ;;  %v658_v29 = vrot.slane %v656_v18, 5 }
  0x3d   : > { %4677 = vmatmul.msk.bf16.gmra.mxu1 %vm756_vm3, %v745_v21  ;;  %v643_v30 = vor.u32 %v642_v23, %v639_v11  ;;  %v351_v31 = vrot.slane %v349_v20, 4  ;;  %v352_v32 = vshll.u32 %v274_v7, 16  ;;  %v358_v33 = vshll.u32 %v275_v19, 16  ;;  %v302_v7 = vld [vmem:[%s5790_s29 + $0x7c] sm:$0xf] }
  0x3e   : > { %v563_v35 = vsel %vm5802_vm4, %v558_v26, %v562_v10  ;;  %v653_v37 = vor.u32 %v652_v28, %v648_v24  ;;  %v362_v38 = vshrl.u32 %v275_v19, 16  ;;  %v368_v39 = vshll.u32 %v276_v25, 16  ;;  %v314_v25 = vld [vmem:[%s5790_s29 + $0xac] sm:$0xf] }
  0x3f   : > { %v727_v40 = vunpack.c.l.b16 %v563_v35  ;;  %v644_v41 = vrot.slane %v643_v30, 4  ;;  %v354_v42 = vrot.slane %v352_v32, 5  ;;  %v360_v43 = vrot.slane %v358_v33, 5 }
  0x40   : > { %v654_v44 = vrot.slane %v653_v37, 4  ;;  %v364_v45 = vrot.slane %v362_v38, 4  ;;  %v370_v46 = vrot.slane %v368_v39, 5  ;;  %v469_v48 = vshrl.u32 %v289_v34, 16  ;;  %v277_v37 = vld [vmem:[%s5790_s29 + $0x18] sm:$0xf] }
  0x41   : > { %v749_v49 = vpack.c.b16 %v727_v40, %v726_v27  ;;  %v649_v50 = vsel %vm5802_vm4, %v644_v41, %v648_v24  ;;  %v355_v51 = vor.u32 %v354_v42, %v351_v31  ;;  %v472_v53 = vshll.u32 %v289_v34, 16  ;;  %v315_v31 = vld [vmem:[%s5790_s29 + $0xb0] sm:$0x1] }
  0x42   : > { %v659_v55 = vsel %vm5802_vm4, %v654_v44, %v658_v29  ;;  %v734_v56 = vunpack.c.l.b16 %v649_v50  ;;  %v365_v57 = vor.u32 %v364_v45, %v360_v43  ;;  %v471_v58 = vrot.slane %v469_v48, 4 }
  0x43   : > { %4681 = vmatmul.msk.bf16.gmra.mxu2 %vm756_vm3, %v749_v49  ;;  %v735_v59 = vunpack.c.l.b16 %v659_v55  ;;  %v356_v60 = vrot.slane %v355_v51, 4  ;;  %v474_v61 = vrot.slane %v472_v53, 5  ;;  %v478_v62 = vshll.u32 %v290_v47, 16  ;;  %v278_v49 = vld [vmem:[%s5790_s29 + $0x1c] sm:$0xf] }
  0x44   : > { %v366_v63 = vrot.slane %v365_v57, 4  ;;  %v482_v0 = vshrl.u32 %v290_v47, 16  ;;  %v488_v1 = vshll.u32 %v291_v52, 16  ;;  %v565_v2 = vshrl.u32 %v301_v54, 16  ;;  %v279_v55 = vld [vmem:[%s5790_s29 + $0x20] sm:$0x1] }
  0x45   : > { %v753_v3 = vpack.c.b16 %v735_v59, %v734_v56  ;;  %v361_v4 = vsel %vm5802_vm4, %v356_v60, %v360_v43  ;;  %v475_v5 = vor.u32 %v474_v61, %v471_v58  ;;  %v480_v6 = vrot.slane %v478_v62, 5  ;;  %v292_v56 = vld [vmem:[%s5790_s29 + $0x54] sm:$0xf] }
  0x46   : > { %v371_v9 = vsel %vm5802_vm4, %v366_v63, %v370_v46  ;;  %v710_v10 = vunpack.c.l.b16 %v361_v4  ;;  %v484_v11 = vrot.slane %v482_v0, 4  ;;  %v490_v12 = vrot.slane %v488_v1, 5 }
  0x47   : > { %4685 = vmatmul.msk.bf16.gmra.mxu3 %vm756_vm3, %v753_v3  ;;  %v711_v14 = vunpack.c.l.b16 %v371_v9  ;;  %v476_v15 = vrot.slane %v475_v5, 4  ;;  %v567_v16 = vrot.slane %v565_v2, 4  ;;  %v568_v17 = vshll.u32 %v301_v54, 16  ;;  %v293_v9 = vld [vmem:[%s5790_s29 + $0x58] sm:$0xf] }
  0x48   : > { %v485_v18 = vor.u32 %v484_v11, %v480_v6  ;;  %v574_v19 = vshll.u32 %v302_v7, 16  ;;  %v578_v20 = vshrl.u32 %v302_v7, 16  ;;  %v584_v21 = vshll.u32 %v303_v8, 16 }
  0x49   : > { %v741_v22 = vpack.c.b16 %v711_v14, %v710_v10  ;;  %v481_v23 = vsel %vm5802_vm4, %v476_v15, %v480_v6  ;;  %v570_v24 = vrot.slane %v568_v17, 5  ;;  %v661_v26 = vshrl.u32 %v313_v13, 16  ;;  %v294_v10 = vld [vmem:[%s5790_s29 + $0x5c] sm:$0x1]  ;;  %v304_v15 = vld [vmem:[%s5790_s29 + $0x84] sm:$0xf] }
  0x4a   : > { %v486_v27 = vrot.slane %v485_v18, 4  ;;  %v720_v28 = vunpack.c.l.b16 %v481_v23  ;;  %v576_v29 = vrot.slane %v574_v19, 5  ;;  %v580_v30 = vrot.slane %v578_v20, 4 }
  0x4b   : > { %4673 = vmatmul.msk.bf16.gmra.mxu0 %vm756_vm3, %v741_v22  ;;  %v571_v32 = vor.u32 %v570_v24, %v567_v16  ;;  %v586_v33 = vrot.slane %v584_v21, 5  ;;  %v663_v34 = vrot.slane %v661_v26, 4  ;;  %v664_v35 = vshll.u32 %v313_v13, 16 }
  0x4c   : > { %v491_v38 = vsel %vm5802_vm4, %v486_v27, %v490_v12  ;;  %v581_v39 = vor.u32 %v580_v30, %v576_v29  ;;  %v670_v40 = vshll.u32 %v314_v25, 16  ;;  %v674_v41 = vshrl.u32 %v314_v25, 16  ;;  %v305_v27 = vld [vmem:[%s5790_s29 + $0x88] sm:$0xf] }
  0x4d   : > { %v721_v42 = vunpack.c.l.b16 %v491_v38  ;;  %v572_v43 = vrot.slane %v571_v32, 4  ;;  %v666_v44 = vrot.slane %v664_v35, 5  ;;  %v680_v45 = vshll.u32 %v315_v31, 16  ;;  %v306_v35 = vld [vmem:[%s5790_s29 + $0x8c] sm:$0x1] }
  0x4e   : > { %v582_v46 = vrot.slane %v581_v39, 4  ;;  %v672_v47 = vrot.slane %v670_v40, 5  ;;  %v676_v48 = vrot.slane %v674_v41, 4  ;;  %v373_v50 = vshrl.u32 %v277_v37, 16  ;;  %v316_v39 = vld [vmem:[%s5790_s29 + $0xb4] sm:$0xf] }
  0x4f   : > { %v746_v51 = vpack.c.b16 %v721_v42, %v720_v28  ;;  %v577_v52 = vsel %vm5802_vm4, %v572_v43, %v576_v29  ;;  %v667_v53 = vor.u32 %v666_v44, %v663_v34  ;;  %v682_v54 = vrot.slane %v680_v45, 5 }
  0x50   : > { %v587_v57 = vsel %vm5802_vm4, %v582_v46, %v586_v33  ;;  %v728_v58 = vunpack.c.l.b16 %v577_v52  ;;  %v677_v59 = vor.u32 %v676_v48, %v672_v47  ;;  %v375_v60 = vrot.slane %v373_v50, 4 }
  0x51   : > { %4678 = vmatmul.msk.bf16.gmra.mxu1 %vm756_vm3, %v746_v51  ;;  %v729_v61 = vunpack.c.l.b16 %v587_v57  ;;  %v668_v62 = vrot.slane %v667_v53, 4  ;;  %v376_v63 = vshll.u32 %v277_v37, 16  ;;  %v382_v0 = vshll.u32 %v278_v49, 16  ;;  %v317_v51 = vld [vmem:[%s5790_s29 + $0xb8] sm:$0xf] }
  0x52   : > { %v678_v1 = vrot.slane %v677_v59, 4  ;;  %v386_v2 = vshrl.u32 %v278_v49, 16  ;;  %v392_v3 = vshll.u32 %v279_v55, 16  ;;  %v493_v4 = vshrl.u32 %v292_v56, 16  ;;  %v318_v57 = vld [vmem:[%s5790_s29 + $0xbc] sm:$0x1] }
  0x53   : > { %v750_v5 = vpack.c.b16 %v729_v61, %v728_v58  ;;  %v673_v6 = vsel %vm5802_vm4, %v668_v62, %v672_v47  ;;  %v378_v7 = vrot.slane %v376_v63, 5  ;;  %v384_v8 = vrot.slane %v382_v0, 5  ;;  %v280_v58 = vld [vmem:[%s5790_s29 + $0x24] sm:$0xf] }
  0x54   : > { %v683_v11 = vsel %vm5802_vm4, %v678_v1, %v682_v54  ;;  %v736_v12 = vunpack.c.l.b16 %v673_v6  ;;  %v388_v13 = vrot.slane %v386_v2, 4  ;;  %v394_v14 = vrot.slane %v392_v3, 5 }
  0x55   : > { %4682 = vmatmul.msk.bf16.gmra.mxu2 %vm756_vm3, %v750_v5  ;;  %v737_v16 = vunpack.c.l.b16 %v683_v11  ;;  %v379_v17 = vor.u32 %v378_v7, %v375_v60  ;;  %v495_v18 = vrot.slane %v493_v4, 4  ;;  %v496_v19 = vshll.u32 %v292_v56, 16  ;;  %v281_v11 = vld [vmem:[%s5790_s29 + $0x28] sm:$0xf] }
  0x56   : > { %v389_v20 = vor.u32 %v388_v13, %v384_v8  ;;  %v502_v21 = vshll.u32 %v293_v9, 16  ;;  %v506_v22 = vshrl.u32 %v293_v9, 16  ;;  %v512_v23 = vshll.u32 %v294_v10, 16 }
  0x57   : > { %v754_v24 = vpack.c.b16 %v737_v16, %v736_v12  ;;  %v380_v25 = vrot.slane %v379_v17, 4  ;;  %v498_v26 = vrot.slane %v496_v19, 5  ;;  %v589_v28 = vshrl.u32 %v304_v15, 16  ;;  %v282_v16 = vld [vmem:[%s5790_s29 + $0x2c] sm:$0x1] }
  0x58   : > { %v390_v29 = vrot.slane %v389_v20, 4  ;;  %v504_v30 = vrot.slane %v502_v21, 5  ;;  %v508_v31 = vrot.slane %v506_v22, 4  ;;  %v514_v32 = vrot.slane %v512_v23, 5 }
  0x59   : > { %4686 = vmatmul.msk.bf16.gmra.mxu3 %vm756_vm3, %v754_v24  ;;  %v385_v33 = vsel %vm5802_vm4, %v380_v25, %v384_v8  ;;  %v499_v34 = vor.u32 %v498_v26, %v495_v18  ;;  %v591_v37 = vrot.slane %v589_v28, 4  ;;  %v592_v38 = vshll.u32 %v304_v15, 16  ;;  %v1118_v25 = vld [vmem:[%s5790_s29] sm:$0xe] }
  0x5a   : > { %v395_v40 = vsel %vm5802_vm4, %v390_v29, %v394_v14  ;;  %v712_v41 = vunpack.c.l.b16 %v385_v33  ;;  %v509_v42 = vor.u32 %v508_v31, %v504_v30  ;;  %v598_v43 = vshll.u32 %v305_v27, 16  ;;  %v1119_v29 = vld [vmem:[%s5790_s29 + $0x4] sm:$0xf] }
  0x5b   : > { %v713_v44 = vunpack.c.l.b16 %v395_v40  ;;  %v500_v45 = vrot.slane %v499_v34, 4  ;;  %v594_v46 = vrot.slane %v592_v38, 5  ;;  %v602_v47 = vshrl.u32 %v305_v27, 16  ;;  %v1120_v34 = vld [vmem:[%s5790_s29 + $0x8] sm:$0x1] }
  0x5c   : > { %v510_v48 = vrot.slane %v509_v42, 4  ;;  %v600_v49 = vrot.slane %v598_v43, 5  ;;  %v608_v50 = vshll.u32 %v306_v35, 16  ;;  %v685_v52 = vshrl.u32 %v316_v39, 16  ;;  %v4914_v40 = vld [vmem:[%s5790_s29 + $0xc] sm:$0xf] }
  0x5d   : > { %v742_v53 = vpack.c.b16 %v713_v44, %v712_v41  ;;  %v505_v54 = vsel %vm5802_vm4, %v500_v45, %v504_v30  ;;  %v595_v55 = vor.u32 %v594_v46, %v591_v37  ;;  %v604_v56 = vrot.slane %v602_v47, 4 }
  0x5e   : > { %v515_v59 = vsel %vm5802_vm4, %v510_v48, %v514_v32  ;;  %v722_v60 = vunpack.c.l.b16 %v505_v54  ;;  %v610_v61 = vrot.slane %v608_v50, 5  ;;  %v687_v62 = vrot.slane %v685_v52, 4  ;;  %v4915_v52 = vld [vmem:[%s5790_s29 + $0x10] sm:$0xf] }
  0x5f   : > { %4674 = vmatmul.msk.bf16.gmra.mxu0 %vm756_vm3, %v742_v53  ;;  %v723_v63 = vunpack.c.l.b16 %v515_v59  ;;  %v596_v0 = vrot.slane %v595_v55, 4  ;;  %v605_v1 = vor.u32 %v604_v56, %v600_v49  ;;  %v688_v2 = vshll.u32 %v316_v39, 16  ;;  %v5092_v39 = vld [vmem:[%s7039_s1 + $0xc] sm:$0x3]  ;;  %v5221_v59 = vld [vmem:[%s7039_s1 + $0xe] sm:$0x3] }
  0x60   : > { %v694_v3 = vshll.u32 %v317_v51, 16  ;;  %v698_v4 = vshrl.u32 %v317_v51, 16  ;;  %v704_v5 = vshll.u32 %v318_v57, 16  ;;  %v397_v6 = vshrl.u32 %v280_v58, 16 }
  0x61   : > { %v747_v7 = vpack.c.b16 %v723_v63, %v722_v60  ;;  %v601_v8 = vsel %vm5802_vm4, %v596_v0, %v600_v49  ;;  %v606_v9 = vrot.slane %v605_v1, 4  ;;  %v690_v10 = vrot.slane %v688_v2, 5  ;;  %v5027_v0 = vld [vmem:[%s7039_s1 + $0xa] sm:$0x3] }
  0x62   : > { %v730_v12 = vunpack.c.l.b16 %v601_v8  ;;  %v696_v13 = vrot.slane %v694_v3, 5  ;;  %v700_v14 = vrot.slane %v698_v4, 4  ;;  %v706_v15 = vrot.slane %v704_v5, 5  ;;  %v5286_v5 = vld [vmem:[%s7039_s1 + $0x10] sm:$0x3] }
  0x63   : > { %4679 = vmatmul.msk.bf16.gmra.mxu1 %vm756_vm3, %v747_v7  ;;  %v611_v17 = vsel %vm5802_vm4, %v606_v9, %v610_v61  ;;  %v691_v18 = vor.u32 %v690_v10, %v687_v62  ;;  %v399_v19 = vrot.slane %v397_v6, 4  ;;  %v400_v20 = vshll.u32 %v280_v58, 16  ;;  %v4916_v58 = vld [vmem:[%s5790_s29 + $0x14] sm:$0x1]  ;;  %v5324_v10 = vld [vmem:[%s5790_s29] sm:$0xff] }
  0x64   : > { %v731_v21 = vunpack.c.l.b16 %v611_v17  ;;  %v701_v22 = vor.u32 %v700_v14, %v696_v13  ;;  %v406_v23 = vshll.u32 %v281_v11, 16  ;;  %v410_v24 = vshrl.u32 %v281_v11, 16 }
  0x65   : > { %v692_v26 = vrot.slane %v691_v18, 4  ;;  %v402_v27 = vrot.slane %v400_v20, 5  ;;  %v416_v28 = vshll.u32 %v282_v16, 16  ;;  %v4769_v44 = vrot.slane %v1118_v25, 9 }
  0x66   : > { %v751_v30 = vpack.c.b16 %v731_v21, %v730_v12  ;;  %v702_v31 = vrot.slane %v701_v22, 4  ;;  %v408_v32 = vrot.slane %v406_v23, 5  ;;  %v412_v33 = vrot.slane %v410_v24, 4  ;;  %v1122_v21 = vld [vmem:[%s5790_s29 + $0x10] sm:$0xf] }
  0x67   : > { %v697_v35 = vsel %vm5802_vm4, %v692_v26, %v696_v13  ;;  %v403_v37 = vor.u32 %v402_v27, %v399_v19  ;;  %v418_v38 = vrot.slane %v416_v28, 5  ;;  %v1221_v48 = vrot.slane %v1119_v29, 5  ;;  %v4917_v22 = vld [vmem:[%s5790_s29 + $0x18] sm:$0xf]  ;;  %v4918_v23 = vld [vmem:[%s5790_s29 + $0x1c] sm:$0xf] }
  0x68   : > { %4683 = vmatmul.msk.bf16.gmra.mxu2 %vm756_vm3, %v751_v30  ;;  %v707_v41 = vsel %vm5802_vm4, %v702_v31, %v706_v15  ;;  %v738_v42 = vunpack.c.l.b16 %v697_v35  ;;  %v413_v43 = vor.u32 %v412_v33, %v408_v32  ;;  %v1224_v49 = vrot.slane %v1120_v34, 5  ;;  %v1121_v26 = vld [vmem:[%s5790_s29 + $0xc] sm:$0xe] }
  0x69   : > { %v739_v45 = vunpack.c.l.b16 %v707_v41  ;;  %v404_v46 = vrot.slane %v403_v37, 4  ;;  %v3092_v51 = vsel %vm805_vm0, %v5092_v39, 0  ;;  %v1892_v53 = vshrl.u32 %v4914_v40, 16  ;;  %v5340_v37 = vld [vmem:[%s5790_s29 + $0xc] sm:$0xff] }
  0x6a   : > { %v414_v50 = vrot.slane %v413_v43, 4  ;;  %v1895_v54 = vshll.u32 %v4914_v40, 16  ;;  %v1223_v57 = vrot.slane %v1221_v48, 4  ;;  %3101 = vmatpush.bf16.msra.mxu2 %v3092_v51  ;;  %v1222_v62 = vsel %vm5928_vm7, %v4769_v44, %v1221_v48 }
  0x6b   : > { %v755_v55 = vpack.c.b16 %v739_v45, %v738_v42  ;;  %v409_v56 = vsel %vm5802_vm4, %v404_v46, %v408_v32  ;;  %v1894_v63 = vrot.slane %v1892_v53, 4  ;;  %v1901_v4 = vshll.u32 %v4915_v52, 16  ;;  %v1123_v32 = vld [vmem:[%s5790_s29 + $0x14] sm:$0x1]  ;;  %v4919_v46 = vld [vmem:[%s5790_s29 + $0x20] sm:$0x1] }
  0x6c   : > { %v419_v60 = vsel %vm5802_vm4, %v414_v50, %v418_v38  ;;  %v714_v61 = vunpack.c.l.b16 %v409_v56  ;;  %v1225_v2 = vsel %vm5928_vm7, %v1223_v57, %v1224_v49  ;;  %v1897_v3 = vrot.slane %v1895_v54, 5  ;;  %v5325_v54 = vld [vmem:[%s5790_s29 + $0xc] sm:$0xff]  ;;  %v1125_v57 = vld [vmem:[%s5790_s29 + $0x1c] sm:$0xf] }
  0x6d   : > { %4687 = vmatmul.msk.bf16.gmra.mxu3 %vm756_vm3, %v755_v55  ;;  %v715_v1 = vunpack.c.l.b16 %v419_v60  ;;  %v1905_v6 = vshrl.u32 %v4915_v52, 16  ;;  %v1911_v7 = vshll.u32 %v4916_v58, 16  ;;  %v3746_v8 = vsel %vm805_vm0, %v5221_v59, 0 }
  0x6e   : > { %v1898_v11 = vor.u32 %v1897_v3, %v1894_v63  ;;  %v1903_v12 = vrot.slane %v1901_v4, 5  ;;  %3755 = vmatpush.bf16.msra.mxu3 %v3746_v8  ;;  %v2802_v13 = vsel %vm805_vm0, %v5027_v0, 0  ;;  %v1331_v14 = vunpack.c.l.b16 %v1222_v62  ;;  %v4921_v62 = vld [vmem:[%s5790_s29 + $0x28] sm:$0xf]  ;;  %v1124_v0 = vld [vmem:[%s5790_s29 + $0x18] sm:$0xe] }
  0x6f   : > { %v743_v9 = vpack.c.b16 %v715_v1, %v714_v61  ;;  %v1332_v15 = vunpack.c.l.b16 %v1225_v2  ;;  %v1907_v16 = vrot.slane %v1905_v6, 4  ;;  %2811 = vmatpush.bf16.msra.mxu1 %v2802_v13  ;;  %v4176_v17 = vsel %vm805_vm0, %v5286_v5, 0  ;;  %v4920_v61 = vld [vmem:[%s5790_s29 + $0x24] sm:$0xf]  ;;  %v1126_v6 = vld [vmem:[%s5790_s29 + $0x20] sm:$0x1] }
  0x70   : > { %v1899_v18 = vrot.slane %v1898_v11, 4  ;;  %v1913_v20 = vrot.slane %v1911_v7, 5  ;;  %4185 = vmatpush.bf16.msra.mxu0 %v4176_v17  ;;  %v1228_v27 = vrot.slane %v1122_v21, 5  ;;  %v1916_v28 = vshrl.u32 %v4917_v22, 16 }
  0x71   : > { %4675 = vmatmul.msk.bf16.gmra.mxu0 %vm756_vm3, %v743_v9  ;;  %v1908_v19 = vor.u32 %v1907_v16, %v1903_v12  ;;  %v1363_v24 = vpack.c.b16 %v1332_v15, %v1331_v14  ;;  %v1919_v29 = vshll.u32 %v4917_v22, 16  ;;  %v1925_v33 = vshll.u32 %v4918_v23, 16 }
  0x72   : > { %v1904_v30 = vsel %vm5802_vm4, %v1899_v18, %v1903_v12  ;;  %v1929_v34 = vshrl.u32 %v4918_v23, 16  ;;  %v4770_v35 = vrot.slane %v1121_v26, 9  ;;  %v1230_v40 = vrot.slane %v1228_v27, 4  ;;  %v5326_v26 = vld [vmem:[%s5790_s29 + $0x18] sm:$0xff] }
  0x73   : > { %4752 = vmatmul.msk.bf16.vlgmr.msrb.gmra.mxu1 %vm756_vm3, %v5324_v10  ;;  %v1909_v25 = vrot.slane %v1908_v19, 4  ;;  %v2275_v38 = vunpack.c.l.b16 %v1904_v30  ;;  %v1231_v41 = vrot.slane %v1123_v32, 5  ;;  %v1918_v42 = vrot.slane %v1916_v28, 4  ;;  %v5341_v10 = vld [vmem:[%s5790_s29 + $0x18] sm:$0xff]  ;;  %v4922_v19 = vld [vmem:[%s5790_s29 + $0x2c] sm:$0x1] }
  0x74   : > { %v1921_v43 = vrot.slane %v1919_v29, 5  ;;  %v1927_v44 = vrot.slane %v1925_v33, 5  ;;  %v1931_v45 = vrot.slane %v1929_v34, 4  ;;  %v1229_v49 = vsel %vm5928_vm7, %v4770_v35, %v1228_v27  ;;  %v1128_v29 = vld [vmem:[%s5790_s29 + $0x28] sm:$0xf] }
  0x75   : > { %v1914_v31 = vsel %vm5802_vm4, %v1909_v25, %v1913_v20  ;;  %v1232_v50 = vsel %vm5928_vm7, %v1230_v40, %v1231_v41  ;;  %v1935_v53 = vshll.u32 %v4919_v46, 16  ;;  %v1333_v55 = vunpack.c.l.b16 %v1229_v49  ;;  %v4923_v30 = vld [vmem:[%s5790_s29 + $0x30] sm:$0xf]  ;;  %v4924_v34 = vld [vmem:[%s5790_s29 + $0x34] sm:$0xf] }
  0x76   : > { %v2276_v39 = vunpack.c.l.b16 %v1914_v31  ;;  %v1922_v51 = vor.u32 %v1921_v43, %v1918_v42  ;;  %v1932_v52 = vor.u32 %v1931_v45, %v1927_v44  ;;  %v1334_v56 = vunpack.c.l.b16 %v1232_v50  ;;  %v1129_v41 = vld [vmem:[%s5790_s29 + $0x2c] sm:$0x1] }
  0x77   : > { %v1937_v60 = vrot.slane %v1935_v53, 5  ;;  %v1235_v1 = vrot.slane %v1125_v57, 5  ;;  %v1940_v2 = vshrl.u32 %v4920_v61, 16  ;;  %v1943_v3 = vshll.u32 %v4920_v61, 16  ;;  %v4925_v57 = vld [vmem:[%s5790_s29 + $0x38] sm:$0x1] }
  0x78   : > { %4785 = vmatmul.msk.bf16.vlgmr.msrb.gmra.mxu2 %vm756_vm3, %v1363_v24  ;;  %v2307_v48 = vpack.c.b16 %v2276_v39, %v2275_v38  ;;  %v1923_v58 = vrot.slane %v1922_v51, 4  ;;  %v1933_v59 = vrot.slane %v1932_v52, 4  ;;  %v1364_v63 = vpack.c.b16 %v1334_v56, %v1333_v55  ;;  %v5342_v52 = vld [vmem:[%s5790_s29 + $0x24] sm:$0xff] }
  0x79   : > { %v1949_v7 = vshll.u32 %v4921_v62, 16  ;;  %v1953_v8 = vshrl.u32 %v4921_v62, 16  ;;  %v4771_v9 = vrot.slane %v1124_v0, 9  ;;  %v1237_v13 = vrot.slane %v1235_v1, 4  ;;  %v5327_v0 = vld [vmem:[%s5790_s29 + $0x24] sm:$0xff] }
  0x7a   : > { %v1928_v4 = vsel %vm5802_vm4, %v1923_v58, %v1927_v44  ;;  %v1938_v5 = vsel %vm5802_vm4, %v1933_v59, %v1937_v60  ;;  %v1238_v14 = vrot.slane %v1126_v6, 5  ;;  %v1942_v15 = vrot.slane %v1940_v2, 4  ;;  %v4926_v6 = vld [vmem:[%s5790_s29 + $0x3c] sm:$0xf] }
  0x7b   : > { %v2277_v11 = vunpack.c.l.b16 %v1928_v4  ;;  %v2278_v12 = vunpack.c.l.b16 %v1938_v5  ;;  %v1945_v16 = vrot.slane %v1943_v3, 5  ;;  %v1951_v17 = vrot.slane %v1949_v7, 5  ;;  %v4927_v7 = vld [vmem:[%s5790_s29 + $0x40] sm:$0xf] }
  0x7c   : > { %v1955_v18 = vrot.slane %v1953_v8, 4  ;;  %v1236_v21 = vsel %vm5928_vm7, %v4771_v9, %v1235_v1  ;;  %v1239_v22 = vsel %vm5928_vm7, %v1237_v13, %v1238_v14  ;;  %v1959_v25 = vshll.u32 %v4922_v19, 16  ;;  %v1131_v8 = vld [vmem:[%s5790_s29 + $0x34] sm:$0xf] }
  0x7d   : > { %4898 = vmatmul.msk.bf16.vlgmr.msrb.gmra.mxu3 %vm756_vm3, %v5340_v37  ;;  %v2308_v20 = vpack.c.b16 %v2278_v12, %v2277_v11  ;;  %v1946_v23 = vor.u32 %v1945_v16, %v1942_v15  ;;  %v1335_v27 = vunpack.c.l.b16 %v1236_v21  ;;  %v1336_v28 = vunpack.c.l.b16 %v1239_v22  ;;  %v1127_v37 = vld [vmem:[%s5790_s29 + $0x24] sm:$0xe]  ;;  %v1130_v15 = vld [vmem:[%s5790_s29 + $0x30] sm:$0xe]  ;;  %v1132_v16 = vld [vmem:[%s5790_s29 + $0x38] sm:$0x1] }
  0x7e   : > { %v1956_v24 = vor.u32 %v1955_v18, %v1951_v17  ;;  %v1961_v33 = vrot.slane %v1959_v25, 5  ;;  %v1242_v38 = vrot.slane %v1128_v29, 5  ;;  %v1964_v39 = vshrl.u32 %v4923_v30, 16 }
  0x7f   : > { %v1947_v31 = vrot.slane %v1946_v23, 4  ;;  %v1365_v35 = vpack.c.b16 %v1336_v28, %v1335_v27  ;;  %v1967_v40 = vshll.u32 %v4923_v30, 16  ;;  %v1973_v42 = vshll.u32 %v4924_v34, 16  ;;  %v4928_v27 = vld [vmem:[%s5790_s29 + $0x44] sm:$0x1] }
  0x80   : > { %v1957_v32 = vrot.slane %v1956_v24, 4  ;;  %v1977_v43 = vshrl.u32 %v4924_v34, 16  ;;  %v4772_v46 = vrot.slane %v1127_v37, 9  ;;  %v1245_v49 = vrot.slane %v1129_v41, 5 }
  0x81   : > { %4963 = vmatmul.msk.bf16.vlgmr.msrb.gmra.mxu0 %vm756_vm3, %v2307_v48  ;;  %v1952_v44 = vsel %vm5802_vm4, %v1947_v31, %v1951_v17  ;;  %v1244_v48 = vrot.slane %v1242_v38, 4  ;;  %v1966_v50 = vrot.slane %v1964_v39, 4  ;;  %v1969_v51 = vrot.slane %v1967_v40, 5 }
  0x82   : > { %v1962_v45 = vsel %vm5802_vm4, %v1957_v32, %v1961_v33  ;;  %v2279_v53 = vunpack.c.l.b16 %v1952_v44  ;;  %v1975_v55 = vrot.slane %v1973_v42, 5  ;;  %v1979_v56 = vrot.slane %v1977_v43, 4  ;;  %v4929_v42 = vld [vmem:[%s5790_s29 + $0x48] sm:$0xf] }
  0x83   : > { %4753 = vmatmul.msk.bf16.gmra.mxu1 %vm756_vm3, %v5325_v54  ;;  %v2280_v54 = vunpack.c.l.b16 %v1962_v45  ;;  %v1243_v58 = vsel %vm5928_vm7, %v4772_v46, %v1242_v38  ;;  %v1246_v59 = vsel %vm5928_vm7, %v1244_v48, %v1245_v49  ;;  %v1970_v60 = vor.u32 %v1969_v51, %v1966_v50  ;;  %v5328_v38 = vld [vmem:[%s5790_s29 + $0x30] sm:$0xff]  ;;  %v4930_v46 = vld [vmem:[%s5790_s29 + $0x4c] sm:$0xf]  ;;  %v1134_v49 = vld [vmem:[%s5790_s29 + $0x40] sm:$0xf] }
  0x84   : > { %v1980_v62 = vor.u32 %v1979_v56, %v1975_v55  ;;  %v1337_v1 = vunpack.c.l.b16 %v1243_v58  ;;  %v1338_v2 = vunpack.c.l.b16 %v1246_v59  ;;  %v1988_v11 = vshrl.u32 %v4926_v6, 16 }
  0x85   : > { %v2309_v61 = vpack.c.b16 %v2280_v54, %v2279_v53  ;;  %v1971_v3 = vrot.slane %v1970_v60, 4  ;;  %v1991_v12 = vshll.u32 %v4926_v6, 16  ;;  %v1997_v13 = vshll.u32 %v4927_v7, 16  ;;  %v1133_v60 = vld [vmem:[%s5790_s29 + $0x3c] sm:$0xe] }
  0x86   : > { %v1981_v4 = vrot.slane %v1980_v62, 4  ;;  %v1366_v9 = vpack.c.b16 %v1338_v2, %v1337_v1  ;;  %v1249_v17 = vrot.slane %v1131_v8, 5  ;;  %v2001_v18 = vshrl.u32 %v4927_v7, 16 }
  0x87   : > { %v4773_v23 = vrot.slane %v1130_v15, 9  ;;  %v1252_v24 = vrot.slane %v1132_v16, 5  ;;  %v1990_v25 = vrot.slane %v1988_v11, 4  ;;  %v1993_v28 = vrot.slane %v1991_v12, 5 }
  0x88   : > { %4786 = vmatmul.msk.bf16.gmra.mxu2 %vm756_vm3, %v1364_v63  ;;  %v1983_v63 = vshll.u32 %v4925_v57, 16  ;;  %v1999_v29 = vrot.slane %v1997_v13, 5  ;;  %v2003_v30 = vrot.slane %v2001_v18, 4  ;;  %v2007_v32 = vshll.u32 %v4928_v27, 16  ;;  %v5329_v18 = vld [vmem:[%s5790_s29 + $0x3c] sm:$0xff] }
  0x89   : > { %v1250_v33 = vsel %vm5928_vm7, %v4773_v23, %v1249_v17  ;;  %v2012_v50 = vshrl.u32 %v4929_v42, 16  ;;  %v2015_v51 = vshll.u32 %v4929_v42, 16  ;;  %v2021_v53 = vshll.u32 %v4930_v46, 16  ;;  %v4933_v27 = vld [vmem:[%s5790_s29 + $0x58] sm:$0xf] }
  0x8a   : > { %v1985_v5 = vrot.slane %v1983_v63, 5  ;;  %v2004_v37 = vor.u32 %v2003_v30, %v1999_v29  ;;  %v1339_v39 = vunpack.c.l.b16 %v1250_v33  ;;  %v2009_v45 = vrot.slane %v2007_v32, 5  ;;  %v1138_v42 = vld [vmem:[%s5790_s29 + $0x50] sm:$0x1] }
  0x8b   : > { %v1256_v56 = vrot.slane %v1134_v49, 5  ;;  %v2025_v57 = vshrl.u32 %v4930_v46, 16  ;;  %v2014_v62 = vrot.slane %v2012_v50, 4  ;;  %v2017_v63 = vrot.slane %v2015_v51, 5  ;;  %v5345_v51 = vld [vmem:[%s5790_s29 + $0x48] sm:$0xff] }
  0x8c   : > { %v1986_v14 = vsel %vm5802_vm4, %v1981_v4, %v1985_v5  ;;  %v2005_v44 = vrot.slane %v2004_v37, 4  ;;  %v2023_v2 = vrot.slane %v2021_v53, 5  ;;  %v4774_v4 = vrot.slane %v1133_v60, 9 }
  0x8d   : > { %4899 = vmatmul.msk.bf16.gmra.mxu3 %vm756_vm3, %v5341_v10  ;;  %v1976_v10 = vsel %vm5802_vm4, %v1971_v3, %v1975_v55  ;;  %v2282_v21 = vunpack.c.l.b16 %v1986_v14  ;;  %v5344_v3 = vld [vmem:[%s5790_s29 + $0x3c] sm:$0xff]  ;;  %v1258_v5 = vrot.slane %v1256_v56, 4  ;;  %v2027_v7 = vrot.slane %v2025_v57, 4 }
  0x8e   : > { %v2281_v19 = vunpack.c.l.b16 %v1976_v10  ;;  %v2010_v55 = vsel %vm5802_vm4, %v2005_v44, %v2009_v45  ;;  %v2018_v10 = vor.u32 %v2017_v63, %v2014_v62  ;;  %v1257_v13 = vsel %vm5928_vm7, %v4774_v4, %v1256_v56  ;;  %v4934_v57 = vld [vmem:[%s5790_s29 + $0x5c] sm:$0x1]  ;;  %v5330_v4 = vld [vmem:[%s5790_s29 + $0x48] sm:$0xff] }
  0x8f   : > { %v2284_v1 = vunpack.c.l.b16 %v2010_v55  ;;  %v2028_v15 = vor.u32 %v2027_v7, %v2023_v2  ;;  %v4935_v7 = vld [vmem:[%s5790_s29 + $0x60] sm:$0xf] }
  0x90   : > { %v2310_v31 = vpack.c.b16 %v2282_v21, %v2281_v19  ;;  %v2019_v19 = vrot.slane %v2018_v10, 4  ;;  %v1341_v21 = vunpack.c.l.b16 %v1257_v13  ;;  %v4936_v13 = vld [vmem:[%s5790_s29 + $0x64] sm:$0xf] }
  0x91   : > { %4964 = vmatmul.msk.bf16.gmra.mxu0 %vm756_vm3, %v2308_v20  ;;  %v5343_v20 = vld [vmem:[%s5790_s29 + $0x30] sm:$0xff] }
  0x93   : > { %4754 = vmatmul.msk.bf16.gmra.mxu1 %vm756_vm3, %v5326_v26  ;;  %v1251_v26 = vrot.slane %v1249_v17, 4 }
  0x95   : > { %v1253_v34 = vsel %vm5928_vm7, %v1251_v26, %v1252_v24  ;;  %v2029_v24 = vrot.slane %v2028_v15, 4  ;;  %v4932_v26 = vld [vmem:[%s5790_s29 + $0x54] sm:$0xf] }
  0x96   : > { %v1340_v40 = vunpack.c.l.b16 %v1253_v34  ;;  %v2036_v32 = vshrl.u32 %v4932_v26, 16  ;;  %v2039_v33 = vshll.u32 %v4932_v26, 16  ;;  %v2045_v34 = vshll.u32 %v4933_v27, 16 }
  0x98   : > { %4787 = vmatmul.msk.bf16.gmra.mxu2 %vm756_vm3, %v1365_v35  ;;  %v1994_v35 = vor.u32 %v1993_v28, %v1990_v25  ;;  %v1137_v28 = vld [vmem:[%s5790_s29 + $0x4c] sm:$0xf]  ;;  %v2038_v46 = vrot.slane %v2036_v32, 4  ;;  %v2041_v49 = vrot.slane %v2039_v33, 5  ;;  %v2047_v50 = vrot.slane %v2045_v34, 5 }
  0x99   : > { %v1263_v37 = vrot.slane %v1137_v28, 5 }
  0x9a   : > { %v1995_v43 = vrot.slane %v1994_v35, 4 }
  0x9b   : > { %v1265_v53 = vrot.slane %v1263_v37, 4 }
  0x9c   : > { %v2000_v54 = vsel %vm5802_vm4, %v1995_v43, %v1999_v29  ;;  %v2024_v29 = vsel %vm5802_vm4, %v2019_v19, %v2023_v2  ;;  %v2063_v19 = vshll.u32 %v4935_v7, 16 }
  0x9d   : > { %4900 = vmatmul.msk.bf16.gmra.mxu3 %vm756_vm3, %v5342_v52  ;;  %v1367_v52 = vpack.c.b16 %v1340_v40, %v1339_v39  ;;  %v1136_v40 = vld [vmem:[%s5790_s29 + $0x48] sm:$0xe]  ;;  %v2285_v43 = vunpack.c.l.b16 %v2024_v29  ;;  %v1139_v29 = vld [vmem:[%s5790_s29 + $0x54] sm:$0xe] }
  0x9e   : > { %v2065_v33 = vrot.slane %v2063_v19, 5 }
  0xa1   : > { %4965 = vmatmul.msk.bf16.gmra.mxu0 %vm756_vm3, %v2309_v61  ;;  %v1135_v61 = vld [vmem:[%s5790_s29 + $0x44] sm:$0x1] }
  0xa2   : > { %v1259_v6 = vrot.slane %v1135_v61, 5  ;;  %v2042_v61 = vor.u32 %v2041_v49, %v2038_v46  ;;  %v4937_v49 = vld [vmem:[%s5790_s29 + $0x68] sm:$0x1] }
  0xa3   : > { %4755 = vmatmul.msk.bf16.gmra.mxu1 %vm756_vm3, %v5327_v0  ;;  %v2283_v0 = vunpack.c.l.b16 %v2000_v54  ;;  %v1266_v54 = vrot.slane %v1138_v42, 5  ;;  %v4776_v42 = vrot.slane %v1139_v29, 9  ;;  %v1144_v29 = vld [vmem:[%s5790_s29 + $0x68] sm:$0x1] }
  0xa4   : > { %v1260_v14 = vsel %vm5928_vm7, %v1258_v5, %v1259_v6 }
  0xa5   : > { %v2311_v11 = vpack.c.b16 %v2284_v1, %v2283_v0  ;;  %v1342_v23 = vunpack.c.l.b16 %v1260_v14  ;;  %v1267_v63 = vsel %vm5928_vm7, %v1265_v53, %v1266_v54  ;;  %v2055_v1 = vshll.u32 %v4934_v57, 16 }
  0xa6   : > { %v1344_v6 = vunpack.c.l.b16 %v1267_v63 }
  0xa7   : > { %v1368_v30 = vpack.c.b16 %v1342_v23, %v1341_v21  ;;  %v2069_v23 = vshll.u32 %v4936_v13, 16 }
  0xa8   : > { %4788 = vmatmul.msk.bf16.gmra.mxu2 %vm756_vm3, %v1366_v9  ;;  %v6030_v22 = vpop.f32.mrf.mxu1  ;;  %v4931_v9 = vld [vmem:[%s5790_s29 + $0x50] sm:$0x1] }
  0xa9   : > { %v2031_v16 = vshll.u32 %v4931_v9, 16  ;;  %v2043_v9 = vrot.slane %v2042_v61, 4  ;;  %v5331_v61 = vld [vmem:[%s5790_s29 + $0x54] sm:$0xff] }
  0xab   : > { %v2033_v25 = vrot.slane %v2031_v16, 5  ;;  %v1140_v16 = vld [vmem:[%s5790_s29 + $0x58] sm:$0xf] }
  0xac   : > { %v1270_v26 = vrot.slane %v1140_v16, 5 }
  0xad   : > { %4901 = vmatmul.msk.bf16.gmra.mxu3 %vm756_vm3, %v5343_v20  ;;  %v2034_v35 = vsel %vm5802_vm4, %v2029_v24, %v2033_v25  ;;  %v2048_v24 = vsel %vm5802_vm4, %v2043_v9, %v2047_v50  ;;  %v4939_v9 = vld [vmem:[%s5790_s29 + $0x70] sm:$0xf] }
  0xae   : > { %v2286_v45 = vunpack.c.l.b16 %v2034_v35  ;;  %v2287_v34 = vunpack.c.l.b16 %v2048_v24  ;;  %v1271_v54 = vsel %vm5928_vm7, %v4776_v42, %v1270_v26 }
  0xb0   : > { %v6039_v41 = vpop.f32.mrf.mxu1  ;;  %v2312_v60 = vpack.c.b16 %v2286_v45, %v2285_v43  ;;  %v1272_v43 = vrot.slane %v1270_v26, 4 }
  0xb1   : > { %4966 = vmatmul.msk.bf16.gmra.mxu0 %vm756_vm3, %v2310_v31 }
  0xb2   : > { %v6044_v48 = vpop.f32.mrf.mxu2 }
  0xb3   : > { %4756 = vmatmul.msk.bf16.gmra.mxu1 %vm756_vm3, %v5328_v38  ;;  %v2049_v38 = vshrl.u32 %v4933_v27, 16  ;;  %v2073_v27 = vshrl.u32 %v4936_v13, 16 }
  0xb5   : > { %v2051_v55 = vrot.slane %v2049_v38, 4  ;;  %v2071_v38 = vrot.slane %v2069_v23, 5  ;;  %v2075_v46 = vrot.slane %v2073_v27, 4  ;;  %v1142_v27 = vld [vmem:[%s5790_s29 + $0x60] sm:$0xe] }
  0xb6   : > { %v6052_v58 = vpop.f32.mrf.mxu0  ;;  %v6054_v59 = vpop.f32.mrf.mxu3  ;;  %v4777_v42 = vrot.slane %v1142_v27, 9 }
  0xb7   : > { %v2052_v0 = vor.u32 %v2051_v55, %v2047_v50  ;;  %v2076_v57 = vor.u32 %v2075_v46, %v2071_v38 }
  0xb8   : > { %4789 = vmatmul.msk.bf16.gmra.mxu2 %vm756_vm3, %v1367_v52  ;;  %v4775_v52 = vrot.slane %v1136_v40, 9  ;;  %v5346_v40 = vld [vmem:[%s5790_s29 + $0x54] sm:$0xff] }
  0xb9   : > { %v2053_v10 = vrot.slane %v2052_v0, 4  ;;  %v1345_v0 = vunpack.c.l.b16 %v1271_v54 }
  0xba   : > { %v6060_v8 = vpop.f32.mrf.mxu1  ;;  %v6063_v12 = vpop.f32.mrf.mxu2  ;;  %v1264_v62 = vsel %vm5928_vm7, %v4775_v52, %v1263_v37 }
  0xbb   : > { %v1343_v5 = vunpack.c.l.b16 %v1264_v62 }
  0xbd   : > { %4902 = vmatmul.msk.bf16.gmra.mxu3 %vm756_vm3, %v5344_v3  ;;  %v1369_v21 = vpack.c.b16 %v1344_v6, %v1343_v5  ;;  %v2077_v5 = vrot.slane %v2076_v57, 4 }
  0xbe   : > { %v6070_v17 = vpop.f32.mrf.mxu0  ;;  %v6073_v20 = vpop.f32.mrf.mxu3 }
  0xc1   : > { %4967 = vmatmul.msk.bf16.gmra.mxu0 %vm756_vm3, %v2311_v11  ;;  %v2057_v11 = vrot.slane %v2055_v1, 5 }
  0xc2   : > { %v6082_v31 = vpop.f32.mrf.mxu1 }
  0xc3   : > { %4757 = vmatmul.msk.bf16.gmra.mxu1 %vm756_vm3, %v5329_v18  ;;  %v2060_v18 = vshrl.u32 %v4935_v7, 16  ;;  %v2058_v25 = vsel %vm5802_vm4, %v2053_v10, %v2057_v11  ;;  %v4938_v7 = vld [vmem:[%s5790_s29 + $0x6c] sm:$0xf]  ;;  %v1143_v10 = vld [vmem:[%s5790_s29 + $0x64] sm:$0xf] }
  0xc4   : > { %v2288_v35 = vunpack.c.l.b16 %v2058_v25  ;;  %v2087_v19 = vshll.u32 %v4938_v7, 16  ;;  %v1277_v24 = vrot.slane %v1143_v10, 5  ;;  %v2097_v25 = vshrl.u32 %v4939_v9, 16 }
  0xc5   : > { %v2062_v32 = vrot.slane %v2060_v18, 4  ;;  %v2084_v18 = vshrl.u32 %v4938_v7, 16 }
  0xc6   : > { %v6086_v39 = vpop.f32.mrf.mxu2  ;;  %v2313_v52 = vpack.c.b16 %v2288_v35, %v2287_v34  ;;  %v2089_v35 = vrot.slane %v2087_v19, 5  ;;  %v2099_v46 = vrot.slane %v2097_v25, 4  ;;  %v4942_v19 = vld [vmem:[%s5790_s29 + $0x7c] sm:$0xf] }
  0xc7   : > { %v2066_v50 = vor.u32 %v2065_v33, %v2062_v32  ;;  %v2086_v34 = vrot.slane %v2084_v18, 4 }
  0xc8   : > { %v6090_v44 = vpop.f32.mrf.mxu0  ;;  %4790 = vmatmul.msk.bf16.gmra.mxu2 %vm756_vm3, %v1368_v30  ;;  %v1141_v30 = vld [vmem:[%s5790_s29 + $0x5c] sm:$0x1] }
  0xc9   : > { %v1273_v45 = vrot.slane %v1141_v30, 5  ;;  %v2067_v62 = vrot.slane %v2066_v50, 4  ;;  %v2090_v54 = vor.u32 %v2089_v35, %v2086_v34  ;;  %v2121_v35 = vshrl.u32 %v4942_v19, 16 }
  0xca   : > { %v6094_v56 = vpop.f32.mrf.mxu3 }
  0xcb   : > { %v1274_v55 = vsel %vm5928_vm7, %v1272_v43, %v1273_v45  ;;  %v2072_v11 = vsel %vm5802_vm4, %v2067_v62, %v2071_v38  ;;  %v1279_v43 = vrot.slane %v1277_v24, 4  ;;  %v1280_v45 = vrot.slane %v1144_v29, 5 }
  0xcc   : > { %v1346_v1 = vunpack.c.l.b16 %v1274_v55  ;;  %v2289_v30 = vunpack.c.l.b16 %v2072_v11  ;;  %v1278_v55 = vsel %vm5928_vm7, %v4777_v42, %v1277_v24  ;;  %v2091_v11 = vrot.slane %v2090_v54, 4  ;;  %v1147_v42 = vld [vmem:[%s5790_s29 + $0x74] sm:$0x1] }
  0xcd   : > { %4903 = vmatmul.msk.bf16.gmra.mxu3 %vm756_vm3, %v5345_v51  ;;  %v1281_v57 = vsel %vm5928_vm7, %v1279_v43, %v1280_v45  ;;  %v2117_v29 = vshll.u32 %v4942_v19, 16 }
  0xce   : > { %v6102_v2 = vpop.f32.mrf.mxu2  ;;  %v6104_v3 = vpop.f32.mrf.mxu1  ;;  %v1370_v16 = vpack.c.b16 %v1346_v1, %v1345_v0  ;;  %v5332_v0 = vld [vmem:[%s5790_s29 + $0x60] sm:$0xff]  ;;  %v1348_v7 = vunpack.c.l.b16 %v1281_v57  ;;  %v5348_v57 = vld [vmem:[%s5790_s29 + $0x6c] sm:$0xff] }
  0xd0   : > { %v6110_v14 = vpop.f32.mrf.mxu0 }
  0xd1   : > { %4968 = vmatmul.msk.bf16.gmra.mxu0 %vm756_vm3, %v2312_v60  ;;  %v2079_v60 = vshll.u32 %v4937_v49, 16  ;;  %v4940_v49 = vld [vmem:[%s5790_s29 + $0x74] sm:$0x1] }
  0xd2   : > { %v6112_v15 = vpop.f32.mrf.mxu3 }
  0xd3   : > { %4758 = vmatmul.msk.bf16.gmra.mxu1 %vm756_vm3, %v5330_v4  ;;  %v2081_v6 = vrot.slane %v2079_v60, 5 }
  0xd5   : > { %v2082_v23 = vsel %vm5802_vm4, %v2077_v5, %v2081_v6  ;;  %v1347_v6 = vunpack.c.l.b16 %v1278_v55  ;;  %v2119_v55 = vrot.slane %v2117_v29, 5 }
  0xd6   : > { %v6120_v28 = vpop.f32.mrf.mxu1  ;;  %v2290_v32 = vunpack.c.l.b16 %v2082_v23 }
  0xd7   : > { %v1371_v27 = vpack.c.b16 %v1348_v7, %v1347_v6  ;;  %v4943_v6 = vld [vmem:[%s5790_s29 + $0x80] sm:$0x1] }
  0xd8   : > { %4791 = vmatmul.msk.bf16.gmra.mxu2 %vm756_vm3, %v1369_v21  ;;  %v6125_v37 = vpop.f32.mrf.mxu2  ;;  %v2093_v21 = vshll.u32 %v4939_v9, 16  ;;  %v4941_v9 = vld [vmem:[%s5790_s29 + $0x78] sm:$0xf] }
  0xd9   : > { %v2108_v24 = vshrl.u32 %v4941_v9, 16  ;;  %v2111_v25 = vshll.u32 %v4941_v9, 16 }
  0xda   : > { %v2095_v38 = vrot.slane %v2093_v21, 5  ;;  %v1146_v21 = vld [vmem:[%s5790_s29 + $0x70] sm:$0xf] }
  0xdb   : > { %v1284_v34 = vrot.slane %v1146_v21, 5  ;;  %v2110_v43 = vrot.slane %v2108_v24, 4  ;;  %v2113_v45 = vrot.slane %v2111_v25, 5  ;;  %v5333_v25 = vld [vmem:[%s5790_s29 + $0x6c] sm:$0xff] }
  0xdc   : > { %v6129_v51 = vpop.f32.mrf.mxu0  ;;  %v6131_v53 = vpop.f32.mrf.mxu3  ;;  %v2100_v60 = vor.u32 %v2099_v46, %v2095_v38 }
  0xdd   : > { %4904 = vmatmul.msk.bf16.gmra.mxu3 %vm756_vm3, %v5346_v40  ;;  %v5347_v40 = vld [vmem:[%s5790_s29 + $0x60] sm:$0xff]  ;;  %v2114_v9 = vor.u32 %v2113_v45, %v2110_v43  ;;  %v1149_v45 = vld [vmem:[%s5790_s29 + $0x7c] sm:$0xf] }
  0xe0   : > { %v6139_v63 = vpop.f32.mrf.mxu1  ;;  %v6142_v4 = vpop.f32.mrf.mxu2 }
  0xe1   : > { %4969 = vmatmul.msk.bf16.gmra.mxu0 %vm756_vm3, %v2313_v52  ;;  %v2314_v52 = vpack.c.b16 %v2290_v32, %v2289_v30  ;;  %v2096_v30 = vsel %vm5802_vm4, %v2091_v11, %v2095_v38  ;;  %v1145_v32 = vld [vmem:[%s5790_s29 + $0x6c] sm:$0xe] }
  0xe2   : > { %v4778_v54 = vrot.slane %v1145_v32, 9 }
  0xe3   : > { %4759 = vmatmul.msk.bf16.gmra.mxu1 %vm756_vm3, %v5331_v61  ;;  %v2103_v61 = vshll.u32 %v4940_v49, 16  ;;  %v2291_v49 = vunpack.c.l.b16 %v2096_v30 }
  0xe4   : > { %v6150_v13 = vpop.f32.mrf.mxu0  ;;  %v6154_v26 = vpop.f32.mrf.mxu3 }
  0xe5   : > { %v2105_v18 = vrot.slane %v2103_v61, 5  ;;  %v1286_v61 = vrot.slane %v1284_v34, 4 }
  0xe8   : > { %4792 = vmatmul.msk.bf16.gmra.mxu2 %vm756_vm3, %v1370_v16  ;;  %v6159_v33 = vpop.f32.mrf.mxu1  ;;  %v2101_v16 = vrot.slane %v2100_v60, 4 }
  0xeb   : > { %v6163_v50 = vpop.f32.mrf.mxu2 }
  0xed   : > { %4905 = vmatmul.msk.bf16.gmra.mxu3 %vm756_vm3, %v5347_v40 }
  0xee   : > { %v6170_v62 = vpop.f32.mrf.mxu0 }
  0xf0   : > { %v6173_v1 = vpop.f32.mrf.mxu3  ;;  %v1038_v5 = vpop.f32.mrf.mxu1 }
  0xf1   : > { %4970 = vmatmul.msk.bf16.gmra.mxu0 %vm756_vm3, %v2314_v52  ;;  %v1039_v10 = vadd.f32 %v1038_v5, %v6052_v58  ;;  %v2106_v58 = vsel %vm5802_vm4, %v2101_v16, %v2105_v18  ;;  %v2123_v5 = vrot.slane %v2121_v35, 4  ;;  %v1285_v18 = vsel %vm5928_vm7, %v4778_v54, %v1284_v34 }
  0xf2   : > { %v2292_v52 = vunpack.c.l.b16 %v2106_v58  ;;  %v1349_v58 = vunpack.c.l.b16 %v1285_v18  ;;  %v1150_v18 = vld [vmem:[%s5790_s29 + $0x80] sm:$0x1] }
  0xf3   : > { %v6180_v23 = vpop.f32.mrf.mxu2  ;;  %4760 = vmatmul.msk.bf16.gmra.mxu1 %vm756_vm3, %v5332_v0  ;;  %v1287_v0 = vrot.slane %v1147_v42, 5  ;;  %v2124_v21 = vor.u32 %v2123_v5, %v2119_v55 }
  0xf4   : > { %v2315_v11 = vpack.c.b16 %v2292_v52, %v2291_v49  ;;  %v4945_v49 = vld [vmem:[%s5790_s29 + $0x88] sm:$0xf] }
  0xf5   : > { %v1288_v19 = vsel %vm5928_vm7, %v1286_v61, %v1287_v0  ;;  %v2125_v42 = vrot.slane %v2124_v21, 4 }
  0xf6   : > { %v6188_v40 = vpop.f32.mrf.mxu0  ;;  %v1350_v32 = vunpack.c.l.b16 %v1288_v19 }
  0xf8   : > { %v6191_v46 = vpop.f32.mrf.mxu3  ;;  %4793 = vmatmul.msk.bf16.gmra.mxu2 %vm756_vm3, %v1371_v27  ;;  %v1040_v38 = vpop.f32.mrf.mxu1  ;;  %v2115_v27 = vrot.slane %v2114_v9, 4  ;;  %v1372_v5 = vpack.c.b16 %v1350_v32, %v1349_v58  ;;  %v1148_v9 = vld [vmem:[%s5790_s29 + $0x78] sm:$0xe] }
  0xf9   : > { %v1041_v60 = vadd.f32 %v1040_v38, %v6070_v17  ;;  %v2127_v17 = vshll.u32 %v4943_v6, 16  ;;  %v1291_v6 = vrot.slane %v1149_v45, 5  ;;  %v5349_v58 = vld [vmem:[%s5790_s29 + $0x78] sm:$0xff] }
  0xfa   : > { %v2120_v38 = vsel %vm5802_vm4, %v2115_v27, %v2119_v55 }
  0xfb   : > { %v1439_v7 = vpop.f32.mrf.mxu2  ;;  %v2129_v43 = vrot.slane %v2127_v17, 5  ;;  %v2293_v19 = vunpack.c.l.b16 %v2120_v38  ;;  %v1293_v27 = vrot.slane %v1291_v6, 4 }
  0xfc   : > { %v1519_v16 = vadd.f32 %v1439_v7, %v1039_v10  ;;  %v4944_v10 = vld [vmem:[%s5790_s29 + $0x84] sm:$0xf] }
  0xfd   : > { %4906 = vmatmul.msk.bf16.gmra.mxu3 %vm756_vm3, %v5348_v57  ;;  %v2132_v54 = vshrl.u32 %v4944_v10, 16  ;;  %v2135_v57 = vshll.u32 %v4944_v10, 16  ;;  %v2130_v7 = vsel %vm5802_vm4, %v2125_v42, %v2129_v43  ;;  %v1294_v10 = vrot.slane %v1150_v18, 5  ;;  %v4946_v42 = vld [vmem:[%s5790_s29 + $0x8c] sm:$0x1] }
  0xfe   : > { %v2383_v24 = vpop.f32.mrf.mxu0 }
  0xff   : > { %v2134_v21 = vrot.slane %v2132_v54, 4  ;;  %v2137_v55 = vrot.slane %v2135_v57, 5  ;;  %v1295_v57 = vsel %vm5928_vm7, %v1293_v27, %v1294_v10 }
 0x100   : > { %v1729_v29 = vpop.f32.mrf.mxu3  ;;  %v1043_v30 = vpop.f32.mrf.mxu1 }
 0x101   : > { %4971 = vmatmul.msk.bf16.gmra.mxu0 %vm756_vm3, %v2315_v11  ;;  %v1809_v35 = vadd.f32 %v1729_v29, %v1519_v16  ;;  %v1044_v34 = vadd.f32 %v1043_v30, %v6090_v44  ;;  %v2141_v44 = vshll.u32 %v4945_v49, 16  ;;  %v2145_v11 = vshrl.u32 %v4945_v49, 16 }
 0x102   : > { %v2138_v45 = vor.u32 %v2137_v55, %v2134_v21  ;;  %v4947_v55 = vld [vmem:[%s5790_s29 + $0x90] sm:$0xf] }
 0x103   : > { %v1441_v52 = vpop.f32.mrf.mxu2  ;;  %4761 = vmatmul.msk.bf16.gmra.mxu1 %vm756_vm3, %v5333_v25  ;;  %v6211_v61 = vadd.f32 %v2383_v24, %v1809_v35  ;;  %v2294_v24 = vunpack.c.l.b16 %v2130_v7  ;;  %v4779_v25 = vrot.slane %v1148_v9, 9  ;;  %v2143_v29 = vrot.slane %v2141_v44, 5  ;;  %v5334_v44 = vld [vmem:[%s5790_s29 + $0x78] sm:$0xff] }
 0x104   : > { %v1520_v0 = vadd.f32 %v1441_v52, %v1041_v60  ;;  %v2147_v35 = vrot.slane %v2145_v11, 4  ;;  %v2139_v7 = vrot.slane %v2138_v45, 4  ;;  %v2156_v10 = vshrl.u32 %v4947_v55, 16 }
 0x105   : > { %v2316_v49 = vpack.c.b16 %v2294_v24, %v2293_v19  ;;  %v1292_v54 = vsel %vm5928_vm7, %v4779_v25, %v1291_v6  ;;  %v4948_v25 = vld [vmem:[%s5790_s29 + $0x94] sm:$0xf] }
 0x106   : > { %v2385_v16 = vpop.f32.mrf.mxu0  ;;  %v1351_v11 = vunpack.c.l.b16 %v1292_v54  ;;  %v2169_v54 = vshrl.u32 %v4948_v25, 16 }
 0x108   : > { %v1731_v17 = vpop.f32.mrf.mxu3  ;;  %4794 = vmatmul.msk.bf16.gmra.mxu2 %vm756_vm3, %v1372_v5  ;;  %v1045_v60 = vpop.f32.mrf.mxu1 }
 0x109   : > { %v1810_v30 = vadd.f32 %v1731_v17, %v1520_v0  ;;  %v1046_v32 = vadd.f32 %v1045_v60, %v6110_v14  ;;  %v2148_v14 = vor.u32 %v2147_v35, %v2143_v29  ;;  %v2151_v0 = vshll.u32 %v4946_v42, 16  ;;  %v1152_v17 = vld [vmem:[%s5790_s29 + $0x88] sm:$0xf]  ;;  %v1151_v42 = vld [vmem:[%s5790_s29 + $0x84] sm:$0xe] }
 0x10a   : > { %v2144_v60 = vsel %vm5802_vm4, %v2139_v7, %v2143_v29  ;;  %v2159_v35 = vshll.u32 %v4947_v55, 16  ;;  %v4949_v55 = vld [vmem:[%s5790_s29 + $0x98] sm:$0x1] }
 0x10b   : > { %v1444_v43 = vpop.f32.mrf.mxu2  ;;  %v6221_v38 = vadd.f32 %v2385_v16, %v1810_v30  ;;  %v1352_v16 = vunpack.c.l.b16 %v1295_v57  ;;  %v2149_v19 = vrot.slane %v2148_v14, 4  ;;  %v2153_v21 = vrot.slane %v2151_v0, 5 }
 0x10c   : > { %v1521_v52 = vadd.f32 %v1444_v43, %v1044_v34  ;;  %v1298_v43 = vrot.slane %v1152_v17, 5  ;;  %v2295_v57 = vunpack.c.l.b16 %v2144_v60  ;;  %v4780_v0 = vrot.slane %v1151_v42, 9  ;;  %v4950_v42 = vld [vmem:[%s5790_s29 + $0x9c] sm:$0xf] }
 0x10d   : > { %4907 = vmatmul.msk.bf16.gmra.mxu3 %vm756_vm3, %v5349_v58  ;;  %v1373_v58 = vpack.c.b16 %v1352_v16, %v1351_v11 }
 0x10e   : > { %v2388_v5 = vpop.f32.mrf.mxu0  ;;  %v1300_v11 = vrot.slane %v1298_v43, 4 }
 0x110   : > { %v1734_v9 = vpop.f32.mrf.mxu3  ;;  %v1048_v34 = vpop.f32.mrf.mxu1 }
 0x111   : > { %4972 = vmatmul.msk.bf16.gmra.mxu0 %vm756_vm3, %v2316_v49  ;;  %v1811_v18 = vadd.f32 %v1734_v9, %v1521_v52  ;;  %v1049_v6 = vadd.f32 %v1048_v34, %v6129_v51  ;;  %v2154_v51 = vsel %vm5802_vm4, %v2149_v19, %v2153_v21  ;;  %v1153_v49 = vld [vmem:[%s5790_s29 + $0x8c] sm:$0x1]  ;;  %v2165_v52 = vshll.u32 %v4948_v25, 16  ;;  %v5350_v9 = vld [vmem:[%s5790_s29 + $0x84] sm:$0xff] }
 0x112   : > { %v2296_v14 = vunpack.c.l.b16 %v2154_v51  ;;  %v1301_v16 = vrot.slane %v1153_v49, 5  ;;  %v2171_v19 = vrot.slane %v2169_v54, 4  ;;  %v1299_v25 = vsel %vm5928_vm7, %v4780_v0, %v1298_v43  ;;  %v5335_v51 = vld [vmem:[%s5790_s29 + $0x84] sm:$0xff]  ;;  %v4951_v54 = vld [vmem:[%s5790_s29 + $0xa0] sm:$0xf] }
 0x113   : > { %v1446_v24 = vpop.f32.mrf.mxu2  ;;  %4762 = vmatmul.msk.bf16.gmra.mxu1 %vm756_vm3, %v5334_v44  ;;  %v6237_v27 = vadd.f32 %v2388_v5, %v1811_v18  ;;  %v2158_v5 = vrot.slane %v2156_v10, 4  ;;  %v2161_v44 = vrot.slane %v2159_v35, 5  ;;  %v2167_v18 = vrot.slane %v2165_v52, 5 }
 0x114   : > { %v1522_v30 = vadd.f32 %v1446_v24, %v1046_v32  ;;  %v2317_v60 = vpack.c.b16 %v2296_v14, %v2295_v57  ;;  %v2175_v35 = vshll.u32 %v4949_v55, 16  ;;  %v1155_v14 = vld [vmem:[%s5790_s29 + $0x94] sm:$0xf] }
 0x115   : > { %v2172_v10 = vor.u32 %v2171_v19, %v2167_v18  ;;  %v1305_v55 = vrot.slane %v1155_v14, 5 }
 0x116   : > { %v2390_v45 = vpop.f32.mrf.mxu0  ;;  %v2177_v0 = vrot.slane %v2175_v35, 5 }
 0x118   : > { %v1736_v29 = vpop.f32.mrf.mxu3  ;;  %4795 = vmatmul.msk.bf16.gmra.mxu2 %vm756_vm3, %v1373_v58  ;;  %v1050_v32 = vpop.f32.mrf.mxu1 }
 0x119   : > { %v1812_v7 = vadd.f32 %v1736_v29, %v1522_v30  ;;  %v1051_v34 = vadd.f32 %v1050_v32, %v6150_v13  ;;  %v1302_v13 = vsel %vm5928_vm7, %v1300_v11, %v1301_v16  ;;  %v2162_v30 = vor.u32 %v2161_v44, %v2158_v5 }
 0x11a   : > { %v1354_v52 = vunpack.c.l.b16 %v1302_v13  ;;  %v2173_v32 = vrot.slane %v2172_v10, 4  ;;  %v2180_v5 = vshrl.u32 %v4950_v42, 16  ;;  %v2183_v44 = vshll.u32 %v4950_v42, 16 }
 0x11b   : > { %v1449_v21 = vpop.f32.mrf.mxu2  ;;  %v6247_v24 = vadd.f32 %v2390_v45, %v1812_v7  ;;  %v1353_v45 = vunpack.c.l.b16 %v1299_v25  ;;  %v2163_v29 = vrot.slane %v2162_v30, 4  ;;  %v2193_v11 = vshrl.u32 %v4951_v54, 16 }
 0x11c   : > { %v1523_v17 = vadd.f32 %v1449_v21, %v1049_v6  ;;  %v2178_v13 = vsel %vm5802_vm4, %v2173_v32, %v2177_v0  ;;  %v2182_v30 = vrot.slane %v2180_v5, 4  ;;  %v2185_v10 = vrot.slane %v2183_v44, 5 }
 0x11d   : > { %4908 = vmatmul.msk.bf16.gmra.mxu3 %vm756_vm3, %v5350_v9  ;;  %v2189_v9 = vshll.u32 %v4951_v54, 16  ;;  %v1374_v21 = vpack.c.b16 %v1354_v52, %v1353_v45  ;;  %v2168_v25 = vsel %vm5802_vm4, %v2163_v29, %v2167_v18  ;;  %v4952_v45 = vld [vmem:[%s5790_s29 + $0xa4] sm:$0x1]  ;;  %v5351_v54 = vld [vmem:[%s5790_s29 + $0x90] sm:$0xff]  ;;  %v2298_v18 = vunpack.c.l.b16 %v2178_v13 }
 0x11e   : > { %v2393_v58 = vpop.f32.mrf.mxu0  ;;  %v2186_v14 = vor.u32 %v2185_v10, %v2182_v30  ;;  %v2199_v5 = vshll.u32 %v4952_v45, 16 }
 0x11f   : > { %v2191_v35 = vrot.slane %v2189_v9, 5 }
 0x120   : > { %v1739_v6 = vpop.f32.mrf.mxu3  ;;  %v1053_v49 = vpop.f32.mrf.mxu1  ;;  %v2201_v13 = vrot.slane %v2199_v5, 5 }
 0x121   : > { %4973 = vmatmul.msk.bf16.gmra.mxu0 %vm756_vm3, %v2317_v60  ;;  %v1813_v57 = vadd.f32 %v1739_v6, %v1523_v17  ;;  %v1054_v43 = vadd.f32 %v1053_v49, %v6170_v62  ;;  %v1154_v17 = vld [vmem:[%s5790_s29 + $0x90] sm:$0xe]  ;;  %v1156_v62 = vld [vmem:[%s5790_s29 + $0x98] sm:$0x1]  ;;  %v1307_v6 = vrot.slane %v1305_v55, 4 }
 0x122   : > { %v4781_v42 = vrot.slane %v1154_v17, 9  ;;  %v1308_v49 = vrot.slane %v1156_v62, 5  ;;  %v5336_v17 = vld [vmem:[%s5790_s29 + $0x90] sm:$0xff] }
 0x123   : > { %v1451_v7 = vpop.f32.mrf.mxu2  ;;  %4763 = vmatmul.msk.bf16.gmra.mxu1 %vm756_vm3, %v5335_v51  ;;  %v6261_v16 = vadd.f32 %v2393_v58, %v1813_v57  ;;  %v2195_v51 = vrot.slane %v2193_v11, 4  ;;  %v2297_v57 = vunpack.c.l.b16 %v2168_v25 }
 0x124   : > { %v1524_v19 = vadd.f32 %v1451_v7, %v1051_v34  ;;  %v1306_v7 = vsel %vm5928_vm7, %v4781_v42, %v1305_v55  ;;  %v1309_v9 = vsel %vm5928_vm7, %v1307_v6, %v1308_v49 }
 0x125   : > { %v2196_v0 = vor.u32 %v2195_v51, %v2191_v35  ;;  %v1355_v62 = vunpack.c.l.b16 %v1306_v7  ;;  %v1356_v25 = vunpack.c.l.b16 %v1309_v9  ;;  %v4953_v51 = vld [vmem:[%s5790_s29 + $0xa8] sm:$0xf] }
 0x126   : > { %v2395_v60 = vpop.f32.mrf.mxu0 }
 0x127   : > { %v1375_v42 = vpack.c.b16 %v1356_v25, %v1355_v62  ;;  %v5352_v25 = vld [vmem:[%s5790_s29 + $0x9c] sm:$0xff] }
 0x128   : > { %v1741_v58 = vpop.f32.mrf.mxu3  ;;  %4796 = vmatmul.msk.bf16.gmra.mxu2 %vm756_vm3, %v1374_v21  ;;  %v1055_v34 = vpop.f32.mrf.mxu1  ;;  %v2187_v21 = vrot.slane %v2186_v14, 4  ;;  %v1157_v14 = vld [vmem:[%s5790_s29 + $0x9c] sm:$0xe] }
 0x129   : > { %v1814_v52 = vadd.f32 %v1741_v58, %v1524_v19  ;;  %v1056_v29 = vadd.f32 %v1055_v34, %v6188_v40  ;;  %v2318_v19 = vpack.c.b16 %v2298_v18, %v2297_v57  ;;  %v1158_v58 = vld [vmem:[%s5790_s29 + $0xa0] sm:$0xf]  ;;  %v2207_v57 = vshll.u32 %v4953_v51, 16 }
 0x12a   : > { %v2192_v6 = vsel %vm5802_vm4, %v2187_v21, %v2191_v35  ;;  %v4782_v21 = vrot.slane %v1157_v14, 9 }
 0x12b   : > { %v1454_v32 = vpop.f32.mrf.mxu2  ;;  %v6277_v11 = vadd.f32 %v2395_v60, %v1814_v52  ;;  %v4954_v60 = vld [vmem:[%s5790_s29 + $0xac] sm:$0xf]  ;;  %v2299_v7 = vunpack.c.l.b16 %v2192_v6 }
 0x12c   : > { %v1525_v44 = vadd.f32 %v1454_v32, %v1054_v43  ;;  %v2197_v43 = vrot.slane %v2196_v0, 4  ;;  %v2213_v18 = vshll.u32 %v4954_v60, 16  ;;  %v1312_v32 = vrot.slane %v1158_v58, 5 }
 0x12d   : > { %4909 = vmatmul.msk.bf16.gmra.mxu3 %vm756_vm3, %v5351_v54  ;;  %v2204_v54 = vshrl.u32 %v4953_v51, 16  ;;  %v2217_v0 = vshrl.u32 %v4954_v60, 16  ;;  %v4955_v51 = vld [vmem:[%s5790_s29 + $0xb0] sm:$0x1] }
 0x12e   : > { %v2398_v40 = vpop.f32.mrf.mxu0  ;;  %v2202_v49 = vsel %vm5802_vm4, %v2197_v43, %v2201_v13  ;;  %v1314_v43 = vrot.slane %v1312_v32, 4 }
 0x12f   : > { %v2300_v9 = vunpack.c.l.b16 %v2202_v49 }
 0x130   : > { %v1744_v30 = vpop.f32.mrf.mxu3  ;;  %v1058_v55 = vpop.f32.mrf.mxu1 }
 0x131   : > { %4974 = vmatmul.msk.bf16.gmra.mxu0 %vm756_vm3, %v2318_v19  ;;  %v1815_v10 = vadd.f32 %v1744_v30, %v1525_v44  ;;  %v1159_v44 = vld [vmem:[%s5790_s29 + $0xa4] sm:$0x1]  ;;  %v2219_v30 = vrot.slane %v2217_v0, 4  ;;  %v2319_v58 = vpack.c.b16 %v2300_v9, %v2299_v7 }
 0x132   : > { %v1315_v13 = vrot.slane %v1159_v44, 5 }
 0x133   : > { %v1456_v34 = vpop.f32.mrf.mxu2  ;;  %4764 = vmatmul.msk.bf16.gmra.mxu1 %vm756_vm3, %v5336_v17  ;;  %v6290_v45 = vadd.f32 %v2398_v40, %v1815_v10  ;;  %v2206_v40 = vrot.slane %v2204_v54, 4  ;;  %v2209_v17 = vrot.slane %v2207_v57, 5  ;;  %v1059_v10 = vadd.f32 %v1058_v55, %v6030_v22  ;;  %v5337_v55 = vld [vmem:[%s5790_s29 + $0x9c] sm:$0xff] }
 0x134   : > { %v1526_v52 = vadd.f32 %v1456_v34, %v1056_v29  ;;  %v2215_v29 = vrot.slane %v2213_v18, 5  ;;  %v2223_v57 = vshll.u32 %v4955_v51, 16 }
 0x135   : > { %v2210_v6 = vor.u32 %v2209_v17, %v2206_v40  ;;  %v1161_v40 = vld [vmem:[%s5790_s29 + $0xac] sm:$0xf] }
 0x136   : > { %v2400_v5 = vpop.f32.mrf.mxu0  ;;  %v2220_v54 = vor.u32 %v2219_v30, %v2215_v29 }
 0x137   : > { %v2211_v7 = vrot.slane %v2210_v6, 4 }
 0x138   : > { %v1746_v19 = vpop.f32.mrf.mxu3  ;;  %4797 = vmatmul.msk.bf16.gmra.mxu2 %vm756_vm3, %v1375_v42  ;;  %v1060_v35 = vpop.f32.mrf.mxu1  ;;  %v1313_v42 = vsel %vm5928_vm7, %v4782_v21, %v1312_v32  ;;  %v2221_v9 = vrot.slane %v2220_v54, 4  ;;  %v4956_v32 = vld [vmem:[%s5790_s29 + $0xb4] sm:$0xf] }
 0x139   : > { %v1816_v62 = vadd.f32 %v1746_v19, %v1526_v52  ;;  %v1316_v52 = vsel %vm5928_vm7, %v1314_v43, %v1315_v13  ;;  %v1357_v0 = vunpack.c.l.b16 %v1313_v42  ;;  %v2225_v19 = vrot.slane %v2223_v57, 5 }
 0x13a   : > { %v1061_v21 = vadd.f32 %v1060_v35, %v6039_v41  ;;  %v2228_v30 = vshrl.u32 %v4956_v32, 16  ;;  %v2216_v51 = vsel %vm5802_vm4, %v2211_v7, %v2215_v29  ;;  %v1160_v35 = vld [vmem:[%s5790_s29 + $0xa8] sm:$0xe] }
 0x13b   : > { %v1459_v60 = vpop.f32.mrf.mxu2  ;;  %v6298_v49 = vadd.f32 %v2400_v5, %v1816_v62  ;;  %v1358_v5 = vunpack.c.l.b16 %v1316_v52  ;;  %v4957_v62 = vld [vmem:[%s5790_s29 + $0xb8] sm:$0xf]  ;;  %v2301_v54 = vunpack.c.l.b16 %v2216_v51 }
 0x13c   : > { %v1527_v34 = vadd.f32 %v1459_v60, %v1059_v10  ;;  %v2231_v10 = vshll.u32 %v4956_v32, 16  ;;  %v2226_v60 = vsel %vm5802_vm4, %v2221_v9, %v2225_v19  ;;  %v2237_v6 = vshll.u32 %v4957_v62, 16  ;;  %v4958_v19 = vld [vmem:[%s5790_s29 + $0xbc] sm:$0x1] }
 0x13d   : > { %4910 = vmatmul.msk.bf16.gmra.mxu3 %vm756_vm3, %v5352_v25  ;;  %v1376_v13 = vpack.c.b16 %v1358_v5, %v1357_v0  ;;  %v2241_v42 = vshrl.u32 %v4957_v62, 16  ;;  %v2302_v57 = vunpack.c.l.b16 %v2226_v60  ;;  %v5353_v0 = vld [vmem:[%s5790_s29 + $0xa8] sm:$0xff]  ;;  %v4783_v5 = vrot.slane %v1160_v35, 9  ;;  %v4959_v35 = vld [vmem:[%s5790_s29 + $0xc0] sm:$0xf] }
 0x13e   : > { %v2403_v22 = vpop.f32.mrf.mxu0  ;;  %v2239_v32 = vrot.slane %v2237_v6, 5  ;;  %v5338_v60 = vld [vmem:[%s5790_s29 + $0xa8] sm:$0xff] }
 0x140   : > { %v1749_v18 = vpop.f32.mrf.mxu3  ;;  %v1063_v14 = vpop.f32.mrf.mxu1 }
 0x141   : > { %4975 = vmatmul.msk.bf16.gmra.mxu0 %vm756_vm3, %v2319_v58  ;;  %v1817_v44 = vadd.f32 %v1749_v18, %v1527_v34  ;;  %v1319_v58 = vrot.slane %v1161_v40, 5  ;;  %v1162_v34 = vld [vmem:[%s5790_s29 + $0xb0] sm:$0x1]  ;;  %v2233_v18 = vrot.slane %v2231_v10, 5  ;;  %v1064_v9 = vadd.f32 %v1063_v14, %v6060_v8 }
 0x142   : > { %v1322_v7 = vrot.slane %v1162_v34, 5  ;;  %v2247_v14 = vshll.u32 %v4958_v19, 16 }
 0x143   : > { %v1461_v17 = vpop.f32.mrf.mxu2  ;;  %4765 = vmatmul.msk.bf16.gmra.mxu1 %vm756_vm3, %v5337_v55  ;;  %v6312_v25 = vadd.f32 %v2403_v22, %v1817_v44  ;;  %v2230_v55 = vrot.slane %v2228_v30, 4  ;;  %v1321_v44 = vrot.slane %v1319_v58, 4 }
 0x144   : > { %v1528_v43 = vadd.f32 %v1461_v17, %v1061_v21  ;;  %v2243_v21 = vrot.slane %v2241_v42, 4  ;;  %v2320_v17 = vpack.c.b16 %v2302_v57, %v2301_v54  ;;  %v2249_v57 = vrot.slane %v2247_v14, 5 }
 0x145   : > { %v1323_v30 = vsel %vm5928_vm7, %v1321_v44, %v1322_v7  ;;  %v2234_v8 = vor.u32 %v2233_v18, %v2230_v55 }
 0x146   : > { %v2405_v41 = vpop.f32.mrf.mxu0  ;;  %v2244_v51 = vor.u32 %v2243_v21, %v2239_v32 }
 0x148   : > { %v1751_v52 = vpop.f32.mrf.mxu3  ;;  %4798 = vmatmul.msk.bf16.gmra.mxu2 %vm756_vm3, %v1376_v13  ;;  %v1065_v22 = vpop.f32.mrf.mxu1  ;;  %v2245_v18 = vrot.slane %v2244_v51, 4 }
 0x149   : > { %v1818_v29 = vadd.f32 %v1751_v52, %v1528_v43  ;;  %v1320_v43 = vsel %vm5928_vm7, %v4783_v5, %v1319_v58  ;;  %v4960_v52 = vld [vmem:[%s5790_s29 + $0xc4] sm:$0xf]  ;;  %v2235_v58 = vrot.slane %v2234_v8, 4  ;;  %v1066_v55 = vadd.f32 %v1065_v22, %v6082_v31 }
 0x14a   : > { %v1359_v42 = vunpack.c.l.b16 %v1320_v43  ;;  %v2255_v5 = vshll.u32 %v4959_v35, 16  ;;  %v2261_v7 = vshll.u32 %v4960_v52, 16  ;;  %v1165_v43 = vld [vmem:[%s5790_s29 + $0xbc] sm:$0x1]  ;;  %v2250_v22 = vsel %vm5802_vm4, %v2245_v18, %v2249_v57 }
 0x14b   : > { %v1464_v40 = vpop.f32.mrf.mxu2  ;;  %v6324_v13 = vadd.f32 %v2405_v41, %v1818_v29  ;;  %v1360_v41 = vunpack.c.l.b16 %v1323_v30  ;;  %v1164_v29 = vld [vmem:[%s5790_s29 + $0xb8] sm:$0xf]  ;;  %v2240_v31 = vsel %vm5802_vm4, %v2235_v58, %v2239_v32 }
 0x14c   : > { %v1529_v62 = vadd.f32 %v1464_v40, %v1064_v9  ;;  %v2265_v9 = vshrl.u32 %v4960_v52, 16  ;;  %v2257_v14 = vrot.slane %v2255_v5, 5  ;;  %v6346_v51 = vrot.slane %v2261_v7, 5  ;;  %v4961_v52 = vld [vmem:[%s5790_s29 + $0xc8] sm:$0x1]  ;;  %v5354_v32 = vld [vmem:[%s5790_s29 + $0xb4] sm:$0xff] }
 0x14d   : > { %4911 = vmatmul.msk.bf16.gmra.mxu3 %vm756_vm3, %v5353_v0  ;;  %v2252_v0 = vshrl.u32 %v4959_v35, 16  ;;  %v1377_v40 = vpack.c.b16 %v1360_v41, %v1359_v42  ;;  %v1329_v41 = vrot.slane %v1165_v43, 5  ;;  %v2303_v58 = vunpack.c.l.b16 %v2240_v31  ;;  %v5174_v31 = vld [vmem:[%s5790_s29 + $0x1c] sm:$0xf] }
 0x14e   : > { %v2408_v10 = vpop.f32.mrf.mxu0  ;;  %v2271_v5 = vshll.u32 %v4961_v52, 16 }
 0x14f   : > { %v2254_v8 = vrot.slane %v2252_v0, 4 }
 0x150   : > { %v1754_v34 = vpop.f32.mrf.mxu3  ;;  %v1068_v6 = vpop.f32.mrf.mxu1 }
 0x151   : > { %4976 = vmatmul.msk.bf16.gmra.mxu0 %vm756_vm3, %v2320_v17  ;;  %v1819_v54 = vadd.f32 %v1754_v34, %v1529_v62  ;;  %v1326_v17 = vrot.slane %v1164_v29, 5  ;;  %v1163_v62 = vld [vmem:[%s5790_s29 + $0xb4] sm:$0xe]  ;;  %v2304_v29 = vunpack.c.l.b16 %v2250_v22  ;;  %v1069_v57 = vadd.f32 %v1068_v6, %v6104_v3 }
 0x152   : > { %v4784_v34 = vrot.slane %v1163_v62, 9  ;;  %v5173_v62 = vld [vmem:[%s5790_s29 + $0x18] sm:$0xf] }
 0x153   : > { %v1466_v44 = vpop.f32.mrf.mxu2  ;;  %4766 = vmatmul.msk.bf16.gmra.mxu1 %vm756_vm3, %v5338_v60  ;;  %v6338_v19 = vadd.f32 %v2408_v10, %v1819_v54  ;;  %v2267_v10 = vrot.slane %v2265_v9, 4  ;;  %v1328_v42 = vrot.slane %v1326_v17, 4  ;;  %v5339_v22 = vld [vmem:[%s5790_s29 + $0xb4] sm:$0xff]  ;;  %v3269_v52 = vshll.u32 %v5173_v62, 16 }
 0x154   : > { %v1530_v21 = vadd.f32 %v1466_v44, %v1066_v55  ;;  %v2258_v55 = vor.u32 %v2257_v14, %v2254_v8  ;;  %v1327_v7 = vsel %vm5928_vm7, %v4784_v34, %v1326_v17  ;;  %v2273_v17 = vrot.slane %v2271_v5, 5 }
 0x155   : > { %v2268_v0 = vor.u32 %v2267_v10, %v6346_v51  ;;  %v1330_v9 = vsel %vm5928_vm7, %v1328_v42, %v1329_v41  ;;  %v1361_v8 = vunpack.c.l.b16 %v1327_v7  ;;  %v3266_v41 = vshrl.u32 %v5173_v62, 16 }
 0x156   : > { %v2410_v30 = vpop.f32.mrf.mxu0  ;;  %v2259_v6 = vrot.slane %v2258_v55, 4  ;;  %v1362_v14 = vunpack.c.l.b16 %v1330_v9 }
 0x157   : > { %v2269_v10 = vrot.slane %v2268_v0, 4 }
 0x158   : > { %v1756_v60 = vpop.f32.mrf.mxu3  ;;  %4799 = vmatmul.msk.bf16.gmra.mxu2 %vm756_vm3, %v1377_v40  ;;  %v1070_v35 = vpop.f32.mrf.mxu1  ;;  %v4980_v40 = vld [vmem:[%s5790_s29 + $0x10] sm:$0xf]  ;;  %v2264_v0 = vsel %vm5802_vm4, %v2259_v6, %v6346_v51 }
 0x159   : > { %v1820_v54 = vadd.f32 %v1756_v60, %v1530_v21  ;;  %v2321_v21 = vpack.c.b16 %v2304_v29, %v2303_v58  ;;  %v2595_v42 = vrot.slane %v4980_v40, 5  ;;  %v3275_v58 = vshll.u32 %v5174_v31, 16 }
 0x15a   : > { %v3279_v29 = vshrl.u32 %v5174_v31, 16  ;;  %v2274_v5 = vsel %vm5802_vm4, %v2269_v10, %v2273_v17  ;;  %v2305_v51 = vunpack.c.l.b16 %v2264_v0 }
 0x15b   : > { %v1469_v18 = vpop.f32.mrf.mxu2  ;;  %v6360_v43 = vadd.f32 %v2410_v30, %v1820_v54  ;;  %v4979_v30 = vld [vmem:[%s5790_s29 + $0xc] sm:$0xe]  ;;  %v4981_v54 = vld [vmem:[%s5790_s29 + $0x14] sm:$0x1]  ;;  %v6376_v62 = vrot.slane %v3275_v58, 5 }
 0x15c   : > { %v1531_v44 = vadd.f32 %v1469_v18, %v1069_v57  ;;  %v1071_v57 = vadd.f32 %v1070_v35, %v6120_v28  ;;  %v1378_v18 = vpack.c.b16 %v1362_v14, %v1361_v8  ;;  %v5028_v9 = vrot.slane %v4979_v30, 9  ;;  %v5175_v8 = vld [vmem:[%s5790_s29 + $0x20] sm:$0x1] }
 0x15d   : > { %4912 = vmatmul.msk.bf16.gmra.mxu3 %vm756_vm3, %v5354_v32  ;;  %v2598_v40 = vrot.slane %v4981_v54, 5  ;;  %v3268_v28 = vrot.slane %v3266_v41, 4  ;;  %v3271_v35 = vrot.slane %v3269_v52, 5  ;;  %v3281_v31 = vrot.slane %v3279_v29, 4  ;;  %v5355_v41 = vld [vmem:[%s5790_s29 + $0xc0] sm:$0xff] }
 0x15e   : > { %v2413_v3 = vpop.f32.mrf.mxu0  ;;  %v2596_v10 = vsel %vm5928_vm7, %v5028_v9, %v2595_v42  ;;  %v3285_v30 = vshll.u32 %v5175_v8, 16 }
 0x15f   : > { %v3272_v52 = vor.u32 %v3271_v35, %v3268_v28  ;;  %v2705_v29 = vunpack.c.l.b16 %v2596_v10 }
 0x160   : > { %v1759_v60 = vpop.f32.mrf.mxu3  ;;  %v1073_v34 = vpop.f32.mrf.mxu1 }
 0x161   : > { %4977 = vmatmul.msk.bf16.gmra.mxu0 %vm756_vm3, %v2321_v21  ;;  %v1821_v32 = vadd.f32 %v1759_v60, %v1531_v44  ;;  %v2597_v21 = vrot.slane %v2595_v42, 4  ;;  %v1074_v54 = vadd.f32 %v1073_v34, %v6139_v63  ;;  %v5238_v63 = vld [vmem:[%s5790_s29 + $0x18] sm:$0xe] }
 0x163   : > { %v1471_v55 = vpop.f32.mrf.mxu2  ;;  %4767 = vmatmul.msk.bf16.gmra.mxu1 %vm756_vm3, %v5339_v22  ;;  %v6374_v7 = vadd.f32 %v2413_v3, %v1821_v32  ;;  %v2306_v3 = vunpack.c.l.b16 %v2274_v5  ;;  %v2599_v17 = vsel %vm5928_vm7, %v2597_v21, %v2598_v40  ;;  %v3282_v32 = vor.u32 %v3281_v31, %v6376_v62  ;;  %v5177_v5 = vld [vmem:[%s5790_s29 + $0x28] sm:$0xf]  ;;  %v4983_v40 = vld [vmem:[%s5790_s29 + $0x1c] sm:$0xf] }
 0x164   : > { %v1532_v44 = vadd.f32 %v1471_v55, %v1071_v57  ;;  %v2706_v57 = vunpack.c.l.b16 %v2599_v17  ;;  %v5239_v55 = vld [vmem:[%s5790_s29 + $0x1c] sm:$0xf]  ;;  %v3287_v21 = vrot.slane %v3285_v30, 5  ;;  %v4982_v30 = vld [vmem:[%s5790_s29 + $0x18] sm:$0xe] }
 0x165   : > { %7049 = vst [vmem:[#allocation9_spill] sm:$0xff] %v6374_v7  ;;  %v2322_v42 = vpack.c.b16 %v2306_v3, %v2305_v51  ;;  %v3283_v9 = vrot.slane %v3282_v32, 4  ;;  %v3969_v34 = vrot.slane %v5239_v55, 5  ;;  %v3299_v51 = vshll.u32 %v5177_v5, 16 }
 0x166   : > { %v2415_v22 = vpop.f32.mrf.mxu0  ;;  %v2737_v8 = vpack.c.b16 %v2706_v57, %v2705_v29  ;;  %v3303_v3 = vshrl.u32 %v5177_v5, 16  ;;  %v5287_v32 = vrot.slane %v5238_v63, 9 }
 0x167   : > { %v3971_v57 = vrot.slane %v3969_v34, 4 }
 0x168   : > { %v1761_v14 = vpop.f32.mrf.mxu3  ;;  %4800 = vmatmul.msk.bf16.gmra.mxu2 %vm756_vm3, %v1378_v18  ;;  %v1075_v6 = vpop.f32.mrf.mxu1  ;;  %v5176_v18 = vld [vmem:[%s5790_s29 + $0x24] sm:$0xf] }
 0x169   : > { %v1822_v60 = vadd.f32 %v1761_v14, %v1532_v44  ;;  %v3273_v44 = vrot.slane %v3272_v52, 4  ;;  %v3290_v31 = vshrl.u32 %v5176_v18, 16  ;;  %v5240_v14 = vld [vmem:[%s5790_s29 + $0x20] sm:$0x1]  ;;  %v3293_v10 = vshll.u32 %v5176_v18, 16 }
 0x16a   : > { %v1076_v29 = vadd.f32 %v1075_v6, %v6159_v33  ;;  %v3972_v55 = vrot.slane %v5240_v14, 5  ;;  %v5178_v33 = vld [vmem:[%s5790_s29 + $0x2c] sm:$0x1] }
 0x16b   : > { %v1474_v58 = vpop.f32.mrf.mxu2  ;;  %v6392_v28 = vadd.f32 %v2415_v22, %v1822_v60  ;;  %v3278_v22 = vsel %vm5802_vm4, %v3273_v44, %v6376_v62  ;;  %v3288_v60 = vsel %vm5802_vm4, %v3283_v9, %v3287_v21  ;;  %v3292_v18 = vrot.slane %v3290_v31, 4 }
 0x16c   : > { %v1533_v0 = vadd.f32 %v1474_v58, %v1074_v54  ;;  %v4984_v58 = vld [vmem:[%s5790_s29 + $0x20] sm:$0x1]  ;;  %v5029_v9 = vrot.slane %v4982_v30, 9  ;;  %v3650_v7 = vunpack.c.l.b16 %v3288_v60  ;;  %v3970_v31 = vsel %vm5928_vm7, %v5287_v32, %v3969_v34 }
 0x16d   : > { %4913 = vmatmul.msk.bf16.gmra.mxu3 %vm756_vm3, %v5355_v41  ;;  %7050 = vst [vmem:[#allocation10_spill] sm:$0xff] %v6392_v28  ;;  %v2602_v41 = vrot.slane %v4983_v40, 5  ;;  %v3305_v40 = vrot.slane %v3303_v3, 4  ;;  %v2605_v63 = vrot.slane %v4984_v58, 5  ;;  %v3649_v28 = vunpack.c.l.b16 %v3278_v22 }
 0x16e   : > { %v2418_v35 = vpop.f32.mrf.mxu0  ;;  %v3309_v22 = vshll.u32 %v5178_v33, 16  ;;  %v4079_v32 = vunpack.c.l.b16 %v3970_v31  ;;  %v5243_v31 = vld [vmem:[%s5790_s29 + $0x2c] sm:$0x1] }
 0x16f   : > { %v2604_v21 = vrot.slane %v2602_v41, 4  ;;  %v3681_v34 = vpack.c.b16 %v3650_v7, %v3649_v28  ;;  %v5241_v7 = vld [vmem:[%s5790_s29 + $0x24] sm:$0xe]  ;;  %v4986_v28 = vld [vmem:[%s5790_s29 + $0x28] sm:$0xf] }
 0x170   : > { %v1764_v17 = vpop.f32.mrf.mxu3  ;;  %v1078_v54 = vpop.f32.mrf.mxu1 }
 0x171   : > { %4978 = vmatmul.msk.bf16.gmra.mxu0 %vm756_vm3, %v2322_v42  ;;  %v1823_v52 = vadd.f32 %v1764_v17, %v1533_v0  ;;  %v3295_v42 = vrot.slane %v3293_v10, 5  ;;  %v3301_v0 = vrot.slane %v3299_v51, 5  ;;  %v5356_v17 = vld [vmem:[%s5790_s29 + $0x18] sm:$0xff]  ;;  %v2603_v51 = vsel %vm5928_vm7, %v5029_v9, %v2602_v41  ;;  %v5242_v41 = vld [vmem:[%s5790_s29 + $0x28] sm:$0xf] }
 0x172   : > { %v2606_v3 = vsel %vm5928_vm7, %v2604_v21, %v2605_v63  ;;  %v1079_v58 = vadd.f32 %v1078_v54, %v6044_v48  ;;  %v3976_v54 = vrot.slane %v5242_v41, 5  ;;  %v5180_v21 = vld [vmem:[%s5790_s29 + $0x34] sm:$0xf] }
 0x173   : > { %v1476_v5 = vpop.f32.mrf.mxu2  ;;  %5044 = vmatmul.msk.bf16.vlgmr.msra.gmra.mxu1 %vm756_vm3, %v2737_v8  ;;  %v6406_v62 = vadd.f32 %v2418_v35, %v1823_v52  ;;  %v3973_v8 = vsel %vm5928_vm7, %v3971_v57, %v3972_v55  ;;  %v3296_v14 = vor.u32 %v3295_v42, %v3292_v18  ;;  %v3306_v52 = vor.u32 %v3305_v40, %v3301_v0  ;;  %v5179_v40 = vld [vmem:[%s5790_s29 + $0x30] sm:$0xf] }
 0x174   : > { %v1534_v44 = vadd.f32 %v1476_v5, %v1076_v29  ;;  %v4080_v30 = vunpack.c.l.b16 %v3973_v8  ;;  %v2707_v57 = vunpack.c.l.b16 %v2603_v51  ;;  %v2708_v55 = vunpack.c.l.b16 %v2606_v3 }
 0x175   : > { %v3297_v18 = vrot.slane %v3296_v14, 4  ;;  %v3307_v42 = vrot.slane %v3306_v52, 4  ;;  %v3314_v8 = vshrl.u32 %v5179_v40, 16  ;;  %v3317_v14 = vshll.u32 %v5179_v40, 16  ;;  %v5357_v40 = vld [vmem:[%s5790_s29 + $0x24] sm:$0xff] }
 0x176   : > { %v2420_v6 = vpop.f32.mrf.mxu0  ;;  %v2738_v63 = vpack.c.b16 %v2708_v55, %v2707_v57  ;;  %v5288_v52 = vrot.slane %v5241_v7, 9  ;;  %v3979_v57 = vrot.slane %v5243_v31, 5  ;;  %v5181_v31 = vld [vmem:[%s5790_s29 + $0x38] sm:$0x1] }
 0x177   : > { %v3302_v33 = vsel %vm5802_vm4, %v3297_v18, %v3301_v0  ;;  %v3316_v41 = vrot.slane %v3314_v8, 4 }
 0x178   : > { %v1766_v10 = vpop.f32.mrf.mxu3  ;;  %5157 = vmatmul.msk.bf16.vlgmr.msra.gmra.mxu2 %vm756_vm3, %v5356_v17  ;;  %v1080_v35 = vpop.f32.mrf.mxu1  ;;  %v3311_v17 = vrot.slane %v3309_v22, 5 }
 0x179   : > { %v1824_v60 = vadd.f32 %v1766_v10, %v1534_v44  ;;  %v4111_v44 = vpack.c.b16 %v4080_v30, %v4079_v32  ;;  %v3323_v32 = vshll.u32 %v5180_v21, 16  ;;  %v3327_v30 = vshrl.u32 %v5180_v21, 16 }
 0x17a   : > { %v3312_v3 = vsel %vm5802_vm4, %v3307_v42, %v3311_v17  ;;  %v1081_v0 = vadd.f32 %v1080_v35, %v6063_v12  ;;  %v3319_v42 = vrot.slane %v3317_v14, 5  ;;  %v3977_v12 = vsel %vm5928_vm7, %v5288_v52, %v3976_v54 }
 0x17b   : > { %v1479_v29 = vpop.f32.mrf.mxu2  ;;  %v6425_v9 = vadd.f32 %v2420_v6, %v1824_v60  ;;  %v2609_v6 = vrot.slane %v4986_v28, 5  ;;  %v4985_v60 = vld [vmem:[%s5790_s29 + $0x24] sm:$0xe]  ;;  %v3652_v18 = vunpack.c.l.b16 %v3312_v3  ;;  %v6443_v35 = vrot.slane %v3323_v32, 5 }
 0x17c   : > { %v1535_v5 = vadd.f32 %v1479_v29, %v1079_v58  ;;  %v3651_v58 = vunpack.c.l.b16 %v3302_v33  ;;  %v3978_v29 = vrot.slane %v3976_v54, 4  ;;  %v3329_v21 = vrot.slane %v3327_v30, 4 }
 0x17d   : > { %5222 = vmatmul.msk.bf16.vlgmr.msra.gmra.mxu3 %vm756_vm3, %v3681_v34  ;;  %v4987_v34 = vld [vmem:[%s5790_s29 + $0x2c] sm:$0x1]  ;;  %v2611_v7 = vrot.slane %v2609_v6, 4  ;;  %v4081_v14 = vunpack.c.l.b16 %v3977_v12  ;;  %v3320_v52 = vor.u32 %v3319_v42, %v3316_v41  ;;  %v3333_v32 = vshll.u32 %v5181_v31, 16 }
 0x17e   : > { %v2423_v48 = vpop.f32.mrf.mxu0  ;;  %v2612_v28 = vrot.slane %v4987_v34, 5  ;;  %v3682_v8 = vpack.c.b16 %v3652_v18, %v3651_v58  ;;  %v3330_v34 = vor.u32 %v3329_v21, %v6443_v35 }
 0x17f   : > { %v3321_v18 = vrot.slane %v3320_v52, 4 }
 0x180   : > { %v1769_v10 = vpop.f32.mrf.mxu3  ;;  %v1083_v51 = vpop.f32.mrf.mxu1  ;;  %v2613_v3 = vsel %vm5928_vm7, %v2611_v7, %v2612_v28  ;;  %v3331_v42 = vrot.slane %v3330_v34, 4  ;;  %v4989_v7 = vld [vmem:[%s5790_s29 + $0x34] sm:$0xf] }
 0x181   : > { %5303 = vmatmul.msk.bf16.vlgmr.msra.gmra.mxu0 %vm756_vm3, %v4111_v44  ;;  %v1825_v22 = vadd.f32 %v1769_v10, %v1535_v5  ;;  %v5030_v44 = vrot.slane %v4985_v60, 9  ;;  %v1084_v30 = vadd.f32 %v1083_v51, %v6086_v39  ;;  %v5246_v39 = vld [vmem:[%s5790_s29 + $0x38] sm:$0x1] }
 0x182   : > { %v3986_v34 = vrot.slane %v5246_v39, 5 }
 0x183   : > { %v1481_v55 = vpop.f32.mrf.mxu2  ;;  %5045 = vmatmul.msk.bf16.gmra.mxu1 %vm756_vm3, %v2738_v63  ;;  %v6438_v17 = vadd.f32 %v2423_v48, %v1825_v22  ;;  %v3980_v63 = vsel %vm5928_vm7, %v3978_v29, %v3979_v57  ;;  %v2610_v54 = vsel %vm5928_vm7, %v5030_v44, %v2609_v6  ;;  %v2710_v29 = vunpack.c.l.b16 %v2613_v3  ;;  %v5245_v57 = vld [vmem:[%s5790_s29 + $0x34] sm:$0xf]  ;;  %v5244_v44 = vld [vmem:[%s5790_s29 + $0x30] sm:$0xe] }
 0x184   : > { %v1536_v5 = vadd.f32 %v1481_v55, %v1081_v0  ;;  %v4082_v60 = vunpack.c.l.b16 %v3980_v63  ;;  %v2709_v58 = vunpack.c.l.b16 %v2610_v54  ;;  %v5182_v55 = vld [vmem:[%s5790_s29 + $0x3c] sm:$0xf]  ;;  %v3983_v51 = vrot.slane %v5245_v57, 5 }
 0x185   : > { %v3338_v21 = vshrl.u32 %v5182_v55, 16  ;;  %v3341_v63 = vshll.u32 %v5182_v55, 16 }
 0x186   : > { %v2425_v33 = vpop.f32.mrf.mxu0  ;;  %v4112_v41 = vpack.c.b16 %v4082_v60, %v4081_v14  ;;  %v2739_v31 = vpack.c.b16 %v2710_v29, %v2709_v58  ;;  %v2616_v14 = vrot.slane %v4989_v7, 5  ;;  %v5289_v60 = vrot.slane %v5244_v44, 9 }
 0x187   : > { %v3985_v58 = vrot.slane %v3983_v51, 4  ;;  %v3340_v29 = vrot.slane %v3338_v21, 4  ;;  %v3343_v57 = vrot.slane %v3341_v63, 5 }
 0x188   : > { %v1771_v48 = vpop.f32.mrf.mxu3  ;;  %5158 = vmatmul.msk.bf16.gmra.mxu2 %vm756_vm3, %v5357_v40  ;;  %v1085_v10 = vpop.f32.mrf.mxu1  ;;  %v5183_v40 = vld [vmem:[%s5790_s29 + $0x40] sm:$0xf]  ;;  %v3984_v21 = vsel %vm5928_vm7, %v5289_v60, %v3983_v51 }
 0x189   : > { %v1826_v22 = vadd.f32 %v1771_v48, %v1536_v5  ;;  %v3335_v5 = vrot.slane %v3333_v32, 5  ;;  %v3347_v48 = vshll.u32 %v5183_v40, 16  ;;  %v3351_v54 = vshrl.u32 %v5183_v40, 16  ;;  %v4988_v32 = vld [vmem:[%s5790_s29 + $0x30] sm:$0xe] }
 0x18a   : > { %v3987_v63 = vsel %vm5928_vm7, %v3985_v58, %v3986_v34  ;;  %v5248_v51 = vld [vmem:[%s5790_s29 + $0x40] sm:$0xf]  ;;  %v4083_v34 = vunpack.c.l.b16 %v3984_v21 }
 0x18b   : > { %v1484_v0 = vpop.f32.mrf.mxu2  ;;  %v6461_v28 = vadd.f32 %v2425_v33, %v1826_v22  ;;  %v3336_v22 = vsel %vm5802_vm4, %v3331_v42, %v3335_v5  ;;  %v5031_v42 = vrot.slane %v4988_v32, 9  ;;  %v2618_v5 = vrot.slane %v2616_v14, 4 }
 0x18c   : > { %v1537_v6 = vadd.f32 %v1484_v0, %v1084_v30  ;;  %v4990_v30 = vld [vmem:[%s5790_s29 + $0x38] sm:$0x1]  ;;  %v1086_v0 = vadd.f32 %v1085_v10, %v6102_v2  ;;  %v3654_v2 = vunpack.c.l.b16 %v3336_v22  ;;  %v5184_v10 = vld [vmem:[%s5790_s29 + $0x44] sm:$0x1]  ;;  %v4084_v32 = vunpack.c.l.b16 %v3987_v63 }
 0x18d   : > { %5223 = vmatmul.msk.bf16.gmra.mxu3 %vm756_vm3, %v3682_v8  ;;  %v3326_v8 = vsel %vm5802_vm4, %v3321_v18, %v6443_v35  ;;  %v6474_v35 = vrot.slane %v3347_v48, 5  ;;  %v2619_v44 = vrot.slane %v4990_v30, 5 }
 0x18e   : > { %v2428_v12 = vpop.f32.mrf.mxu0  ;;  %v3653_v7 = vunpack.c.l.b16 %v3326_v8 }
 0x190   : > { %v1774_v3 = vpop.f32.mrf.mxu3  ;;  %v1088_v52 = vpop.f32.mrf.mxu1  ;;  %v3683_v60 = vpack.c.b16 %v3654_v2, %v3653_v7  ;;  %v5185_v7 = vld [vmem:[%s5790_s29 + $0x48] sm:$0xf] }
 0x191   : > { %5304 = vmatmul.msk.bf16.gmra.mxu0 %vm756_vm3, %v4112_v41  ;;  %v1827_v33 = vadd.f32 %v1774_v3, %v1537_v6  ;;  %v3353_v6 = vrot.slane %v3351_v54, 4  ;;  %v5358_v41 = vld [vmem:[%s5790_s29 + $0x30] sm:$0xff]  ;;  %v2617_v54 = vsel %vm5928_vm7, %v5031_v42, %v2616_v14  ;;  %v2620_v3 = vsel %vm5928_vm7, %v2618_v5, %v2619_v44  ;;  %v5247_v42 = vld [vmem:[%s5790_s29 + $0x3c] sm:$0xe]  ;;  %v5249_v5 = vld [vmem:[%s5790_s29 + $0x44] sm:$0x1] }
 0x192   : > { %v1089_v30 = vadd.f32 %v1088_v52, %v6125_v37  ;;  %v2711_v14 = vunpack.c.l.b16 %v2617_v54  ;;  %v4992_v44 = vld [vmem:[%s5790_s29 + $0x40] sm:$0xf]  ;;  %v5290_v63 = vrot.slane %v5247_v42, 9 }
 0x193   : > { %v1486_v55 = vpop.f32.mrf.mxu2  ;;  %5046 = vmatmul.msk.bf16.gmra.mxu1 %vm756_vm3, %v2739_v31  ;;  %v6476_v18 = vadd.f32 %v2428_v12, %v1827_v33  ;;  %v3344_v31 = vor.u32 %v3343_v57, %v3340_v29  ;;  %v3354_v8 = vor.u32 %v3353_v6, %v6474_v35  ;;  %v3357_v33 = vshll.u32 %v5184_v10, 16  ;;  %v5186_v10 = vld [vmem:[%s5790_s29 + $0x4c] sm:$0xf]  ;;  %v5359_v42 = vld [vmem:[%s5790_s29 + $0x3c] sm:$0xff] }
 0x194   : > { %v1538_v40 = vadd.f32 %v1486_v55, %v1086_v0  ;;  %v2712_v29 = vunpack.c.l.b16 %v2620_v3  ;;  %v3990_v57 = vrot.slane %v5248_v51, 5  ;;  %v3365_v51 = vshll.u32 %v5185_v7, 16 }
 0x195   : > { %v3345_v0 = vrot.slane %v3344_v31, 4  ;;  %v3355_v6 = vrot.slane %v3354_v8, 4 }
 0x196   : > { %v2430_v39 = vpop.f32.mrf.mxu0  ;;  %v2740_v21 = vpack.c.b16 %v2712_v29, %v2711_v14  ;;  %v3992_v31 = vrot.slane %v3990_v57, 4  ;;  %v3991_v29 = vsel %vm5928_vm7, %v5290_v63, %v3990_v57 }
 0x197   : > { %v3350_v52 = vsel %vm5802_vm4, %v3345_v0, %v6474_v35  ;;  %v3371_v35 = vshll.u32 %v5186_v10, 16 }
 0x198   : > { %v1776_v48 = vpop.f32.mrf.mxu3  ;;  %5159 = vmatmul.msk.bf16.gmra.mxu2 %vm756_vm3, %v5358_v41  ;;  %v1090_v12 = vpop.f32.mrf.mxu1  ;;  %v3359_v41 = vrot.slane %v3357_v33, 5  ;;  %v2623_v33 = vrot.slane %v4992_v44, 5  ;;  %v3655_v0 = vunpack.c.l.b16 %v3350_v52 }
 0x199   : > { %v1828_v22 = vadd.f32 %v1776_v48, %v1538_v40  ;;  %v4113_v40 = vpack.c.b16 %v4084_v32, %v4083_v34  ;;  %v3993_v48 = vrot.slane %v5249_v5, 5  ;;  %v4993_v34 = vld [vmem:[%s5790_s29 + $0x44] sm:$0x1]  ;;  %v3375_v32 = vshrl.u32 %v5186_v10, 16 }
 0x19a   : > { %v3360_v8 = vsel %vm5802_vm4, %v3355_v6, %v3359_v41  ;;  %v2626_v44 = vrot.slane %v4993_v34, 5 }
 0x19b   : > { %v1489_v58 = vpop.f32.mrf.mxu2  ;;  %v6497_v2 = vadd.f32 %v2430_v39, %v1828_v22  ;;  %v3362_v39 = vshrl.u32 %v5185_v7, 16  ;;  %v3656_v14 = vunpack.c.l.b16 %v3360_v8  ;;  %v3994_v6 = vsel %vm5928_vm7, %v3992_v31, %v3993_v48 }
 0x19c   : > { %v1539_v55 = vadd.f32 %v1489_v58, %v1089_v30  ;;  %v1091_v30 = vadd.f32 %v1090_v12, %v6142_v4  ;;  %v3367_v12 = vrot.slane %v3365_v51, 5  ;;  %v6517_v7 = vrot.slane %v3371_v35, 5 }
 0x19d   : > { %5224 = vmatmul.msk.bf16.gmra.mxu3 %vm756_vm3, %v3683_v60  ;;  %v4991_v60 = vld [vmem:[%s5790_s29 + $0x3c] sm:$0xe]  ;;  %v3364_v4 = vrot.slane %v3362_v39, 4  ;;  %v3377_v52 = vrot.slane %v3375_v32, 4  ;;  %v4086_v63 = vunpack.c.l.b16 %v3994_v6 }
 0x19e   : > { %v2433_v37 = vpop.f32.mrf.mxu0  ;;  %v5032_v5 = vrot.slane %v4991_v60, 9 }
 0x19f   : > { %v3368_v51 = vor.u32 %v3367_v12, %v3364_v4 }
 0x1a0   : > { %v1779_v54 = vpop.f32.mrf.mxu3  ;;  %v1093_v3 = vpop.f32.mrf.mxu1  ;;  %v2624_v48 = vsel %vm5928_vm7, %v5032_v5, %v2623_v33  ;;  %v4995_v5 = vld [vmem:[%s5790_s29 + $0x4c] sm:$0xf] }
 0x1a1   : > { %5305 = vmatmul.msk.bf16.gmra.mxu0 %vm756_vm3, %v4113_v40  ;;  %v1829_v22 = vadd.f32 %v1779_v54, %v1539_v55  ;;  %v2625_v40 = vrot.slane %v2623_v33, 4  ;;  %v3684_v54 = vpack.c.b16 %v3656_v14, %v3655_v0  ;;  %v1094_v34 = vadd.f32 %v1093_v3, %v6163_v50  ;;  %v5251_v0 = vld [vmem:[%s5790_s29 + $0x4c] sm:$0xf]  ;;  %v5250_v50 = vld [vmem:[%s5790_s29 + $0x48] sm:$0xe] }
 0x1a2   : > { %v2713_v32 = vunpack.c.l.b16 %v2624_v48  ;;  %v3369_v6 = vrot.slane %v3368_v51, 4  ;;  %v3997_v3 = vrot.slane %v5251_v0, 5  ;;  %v5291_v51 = vrot.slane %v5250_v50, 9 }
 0x1a3   : > { %v1491_v58 = vpop.f32.mrf.mxu2  ;;  %5047 = vmatmul.msk.bf16.gmra.mxu1 %vm756_vm3, %v2740_v21  ;;  %v6514_v41 = vadd.f32 %v2433_v37, %v1829_v22  ;;  %v5187_v21 = vld [vmem:[%s5790_s29 + $0x50] sm:$0x1]  ;;  %v4085_v37 = vunpack.c.l.b16 %v3991_v29  ;;  %v2627_v8 = vsel %vm5928_vm7, %v2625_v40, %v2626_v44  ;;  %v3378_v22 = vor.u32 %v3377_v52, %v6517_v7  ;;  %v5189_v29 = vld [vmem:[%s5790_s29 + $0x58] sm:$0xf] }
 0x1a4   : > { %v1540_v55 = vadd.f32 %v1491_v58, %v1091_v30  ;;  %v3381_v60 = vshll.u32 %v5187_v21, 16  ;;  %v2714_v30 = vunpack.c.l.b16 %v2627_v8  ;;  %v5188_v58 = vld [vmem:[%s5790_s29 + $0x54] sm:$0xf]  ;;  %v5252_v52 = vld [vmem:[%s5790_s29 + $0x50] sm:$0x1] }
 0x1a5   : > { %v4114_v14 = vpack.c.b16 %v4086_v63, %v4085_v37  ;;  %v3386_v4 = vshrl.u32 %v5188_v58, 16  ;;  %v3389_v21 = vshll.u32 %v5188_v58, 16  ;;  %v3399_v37 = vshrl.u32 %v5189_v29, 16 }
 0x1a6   : > { %v2435_v10 = vpop.f32.mrf.mxu0  ;;  %v2741_v12 = vpack.c.b16 %v2714_v30, %v2713_v32  ;;  %v4000_v32 = vrot.slane %v5252_v52, 5 }
 0x1a7   : > { %v3388_v30 = vrot.slane %v3386_v4, 4  ;;  %v3391_v58 = vrot.slane %v3389_v21, 5  ;;  %v3998_v4 = vsel %vm5928_vm7, %v5291_v51, %v3997_v3 }
 0x1a8   : > { %v1781_v57 = vpop.f32.mrf.mxu3  ;;  %5160 = vmatmul.msk.bf16.gmra.mxu2 %vm756_vm3, %v5359_v42  ;;  %v1095_v31 = vpop.f32.mrf.mxu1  ;;  %v3383_v42 = vrot.slane %v3381_v60, 5  ;;  %v4996_v60 = vld [vmem:[%s5790_s29 + $0x50] sm:$0x1]  ;;  %v4087_v51 = vunpack.c.l.b16 %v3998_v4 }
 0x1a9   : > { %v1830_v39 = vadd.f32 %v1781_v57, %v1540_v55  ;;  %v3379_v55 = vrot.slane %v3378_v22, 4  ;;  %v3395_v57 = vshll.u32 %v5189_v29, 16  ;;  %v4994_v22 = vld [vmem:[%s5790_s29 + $0x48] sm:$0xe]  ;;  %v3392_v52 = vor.u32 %v3391_v58, %v3388_v30 }
 0x1ab   : > { %v1494_v35 = vpop.f32.mrf.mxu2  ;;  %v6532_v40 = vadd.f32 %v2435_v10, %v1830_v39  ;;  %v3374_v10 = vsel %vm5802_vm4, %v3369_v6, %v6517_v7  ;;  %v3384_v39 = vsel %vm5802_vm4, %v3379_v55, %v3383_v42  ;;  %v3401_v7 = vrot.slane %v3399_v37, 4  ;;  %v5360_v6 = vld [vmem:[%s5790_s29 + $0x48] sm:$0xff] }
 0x1ac   : > { %v1541_v33 = vadd.f32 %v1494_v35, %v1094_v34  ;;  %v1096_v34 = vadd.f32 %v1095_v31, %v6180_v23  ;;  %v3999_v35 = vrot.slane %v3997_v3, 4  ;;  %v5033_v55 = vrot.slane %v4994_v22, 9  ;;  %v5190_v31 = vld [vmem:[%s5790_s29 + $0x5c] sm:$0x1] }
 0x1ad   : > { %5225 = vmatmul.msk.bf16.gmra.mxu3 %vm756_vm3, %v3684_v54  ;;  %v2630_v54 = vrot.slane %v4995_v5, 5  ;;  %v2633_v5 = vrot.slane %v4996_v60, 5  ;;  %v3657_v50 = vunpack.c.l.b16 %v3374_v10  ;;  %v3658_v23 = vunpack.c.l.b16 %v3384_v39 }
 0x1ae   : > { %v2438_v44 = vpop.f32.mrf.mxu0  ;;  %v3405_v10 = vshll.u32 %v5190_v31, 16 }
 0x1af   : > { %v2632_v42 = vrot.slane %v2630_v54, 4  ;;  %v3685_v39 = vpack.c.b16 %v3658_v23, %v3657_v50  ;;  %v4998_v23 = vld [vmem:[%s5790_s29 + $0x58] sm:$0xf] }
 0x1b0   : > { %v1784_v63 = vpop.f32.mrf.mxu3  ;;  %v1098_v48 = vpop.f32.mrf.mxu1 }
 0x1b1   : > { %5306 = vmatmul.msk.bf16.gmra.mxu0 %vm756_vm3, %v4114_v14  ;;  %v1831_v8 = vadd.f32 %v1784_v63, %v1541_v33  ;;  %v6546_v14 = vrot.slane %v3395_v57, 5  ;;  %v2631_v57 = vsel %vm5928_vm7, %v5033_v55, %v2630_v54  ;;  %v2634_v37 = vsel %vm5928_vm7, %v2632_v42, %v2633_v5  ;;  %v5253_v42 = vld [vmem:[%s5790_s29 + $0x54] sm:$0xe]  ;;  %v5255_v5 = vld [vmem:[%s5790_s29 + $0x5c] sm:$0x1] }
 0x1b2   : > { %v1099_v60 = vadd.f32 %v1098_v48, %v6054_v59  ;;  %v2715_v30 = vunpack.c.l.b16 %v2631_v57  ;;  %v2716_v54 = vunpack.c.l.b16 %v2634_v37 }
 0x1b3   : > { %v1496_v0 = vpop.f32.mrf.mxu2  ;;  %5048 = vmatmul.msk.bf16.gmra.mxu1 %vm756_vm3, %v2741_v12  ;;  %v6548_v33 = vadd.f32 %v2438_v44, %v1831_v8  ;;  %v4001_v12 = vsel %vm5928_vm7, %v3999_v35, %v4000_v32  ;;  %v3402_v8 = vor.u32 %v3401_v7, %v6546_v14  ;;  %v5191_v35 = vld [vmem:[%s5790_s29 + $0x60] sm:$0xf]  ;;  %v3407_v7 = vrot.slane %v3405_v10, 5 }
 0x1b4   : > { %v1542_v29 = vadd.f32 %v1496_v0, %v1096_v34  ;;  %v4088_v22 = vunpack.c.l.b16 %v4001_v12  ;;  %v5254_v34 = vld [vmem:[%s5790_s29 + $0x58] sm:$0xf]  ;;  %v5192_v0 = vld [vmem:[%s5790_s29 + $0x64] sm:$0xf]  ;;  %v3410_v31 = vshrl.u32 %v5191_v35, 16  ;;  %v3413_v4 = vshll.u32 %v5191_v35, 16 }
 0x1b5   : > { %v3403_v55 = vrot.slane %v3402_v8, 4  ;;  %v4004_v50 = vrot.slane %v5254_v34, 5  ;;  %v3419_v12 = vshll.u32 %v5192_v0, 16  ;;  %v2742_v57 = vpack.c.b16 %v2716_v54, %v2715_v30  ;;  %v4999_v34 = vld [vmem:[%s5790_s29 + $0x5c] sm:$0x1] }
 0x1b6   : > { %v2440_v63 = vpop.f32.mrf.mxu0  ;;  %v5292_v10 = vrot.slane %v5253_v42, 9  ;;  %v3412_v35 = vrot.slane %v3410_v31, 4  ;;  %v3415_v30 = vrot.slane %v3413_v4, 5 }
 0x1b7   : > { %v3421_v54 = vrot.slane %v3419_v12, 5 }
 0x1b8   : > { %v1786_v44 = vpop.f32.mrf.mxu3  ;;  %5161 = vmatmul.msk.bf16.gmra.mxu2 %vm756_vm3, %v5360_v6  ;;  %v1100_v21 = vpop.f32.mrf.mxu1  ;;  %v3393_v6 = vrot.slane %v3392_v52, 4  ;;  %v4005_v31 = vsel %vm5928_vm7, %v5292_v10, %v4004_v50  ;;  %v3416_v4 = vor.u32 %v3415_v30, %v3412_v35 }
 0x1b9   : > { %v1832_v3 = vadd.f32 %v1786_v44, %v1542_v29  ;;  %v4115_v29 = vpack.c.b16 %v4088_v22, %v4087_v51  ;;  %v3423_v44 = vshrl.u32 %v5192_v0, 16  ;;  %v2637_v51 = vrot.slane %v4998_v23, 5 }
 0x1ba   : > { %v3398_v8 = vsel %vm5802_vm4, %v3393_v6, %v6546_v14  ;;  %v4006_v22 = vrot.slane %v4004_v50, 4  ;;  %v5193_v6 = vld [vmem:[%s5790_s29 + $0x68] sm:$0x1] }
 0x1bb   : > { %v1499_v32 = vpop.f32.mrf.mxu2  ;;  %v6570_v59 = vadd.f32 %v2440_v63, %v1832_v3  ;;  %v3408_v3 = vsel %vm5802_vm4, %v3403_v55, %v3407_v7  ;;  %v3425_v14 = vrot.slane %v3423_v44, 4  ;;  %v2639_v23 = vrot.slane %v2637_v51, 4 }
 0x1bc   : > { %v1543_v58 = vadd.f32 %v1499_v32, %v1099_v60  ;;  %v4997_v60 = vld [vmem:[%s5790_s29 + $0x54] sm:$0xe]  ;;  %v1101_v32 = vadd.f32 %v1100_v21, %v6073_v20  ;;  %v2640_v55 = vrot.slane %v4999_v34, 5  ;;  %v3659_v7 = vunpack.c.l.b16 %v3398_v8 }
 0x1bd   : > { %5226 = vmatmul.msk.bf16.gmra.mxu3 %vm756_vm3, %v3685_v39  ;;  %v4007_v39 = vrot.slane %v5255_v5, 5  ;;  %v5034_v5 = vrot.slane %v4997_v60, 9  ;;  %v3426_v12 = vor.u32 %v3425_v14, %v3421_v54  ;;  %v3429_v44 = vshll.u32 %v5193_v6, 16 }
 0x1be   : > { %v2443_v48 = vpop.f32.mrf.mxu0  ;;  %v2641_v50 = vsel %vm5928_vm7, %v2639_v23, %v2640_v55  ;;  %v3417_v60 = vrot.slane %v3416_v4, 4  ;;  %v5258_v4 = vld [vmem:[%s5790_s29 + $0x68] sm:$0x1] }
 0x1bf   : > { %v4008_v21 = vsel %vm5928_vm7, %v4006_v22, %v4007_v39  ;;  %v2638_v8 = vsel %vm5928_vm7, %v5034_v5, %v2637_v51  ;;  %v4089_v39 = vunpack.c.l.b16 %v4005_v31  ;;  %v3427_v34 = vrot.slane %v3426_v12, 4  ;;  %v5257_v51 = vld [vmem:[%s5790_s29 + $0x64] sm:$0xf] }
 0x1c0   : > { %v1789_v52 = vpop.f32.mrf.mxu3  ;;  %v1103_v37 = vpop.f32.mrf.mxu1  ;;  %v3431_v35 = vrot.slane %v3429_v44, 5  ;;  %v2717_v30 = vunpack.c.l.b16 %v2638_v8  ;;  %v2718_v14 = vunpack.c.l.b16 %v2641_v50  ;;  %v5001_v5 = vld [vmem:[%s5790_s29 + $0x64] sm:$0xf] }
 0x1c1   : > { %5307 = vmatmul.msk.bf16.gmra.mxu0 %vm756_vm3, %v4115_v29  ;;  %v1833_v63 = vadd.f32 %v1789_v52, %v1543_v58  ;;  %v5361_v58 = vld [vmem:[%s5790_s29 + $0x54] sm:$0xff]  ;;  %v3660_v52 = vunpack.c.l.b16 %v3408_v3  ;;  %v4090_v3 = vunpack.c.l.b16 %v4008_v21  ;;  %v1104_v22 = vadd.f32 %v1103_v37, %v6094_v56 }
 0x1c2   : > { %v3422_v56 = vsel %vm5802_vm4, %v3417_v60, %v3421_v54  ;;  %v3432_v37 = vsel %vm5802_vm4, %v3427_v34, %v3431_v35  ;;  %v2743_v21 = vpack.c.b16 %v2718_v14, %v2717_v30  ;;  %v2644_v50 = vrot.slane %v5001_v5, 5 }
 0x1c3   : > { %v1501_v0 = vpop.f32.mrf.mxu2  ;;  %5049 = vmatmul.msk.bf16.gmra.mxu1 %vm756_vm3, %v2742_v57  ;;  %v6583_v42 = vadd.f32 %v2443_v48, %v1833_v63  ;;  %v3686_v63 = vpack.c.b16 %v3660_v52, %v3659_v7  ;;  %v5256_v7 = vld [vmem:[%s5790_s29 + $0x60] sm:$0xe]  ;;  %v4011_v52 = vrot.slane %v5257_v51, 5  ;;  %v3661_v54 = vunpack.c.l.b16 %v3422_v56 }
 0x1c4   : > { %v1544_v29 = vadd.f32 %v1501_v0, %v1101_v32  ;;  %v5194_v0 = vld [vmem:[%s5790_s29 + $0x6c] sm:$0xf]  ;;  %v4014_v35 = vrot.slane %v5258_v4, 5  ;;  %v2646_v56 = vrot.slane %v2644_v50, 4 }
 0x1c5   : > { %v3434_v31 = vshrl.u32 %v5194_v0, 16  ;;  %v3437_v12 = vshll.u32 %v5194_v0, 16  ;;  %v4013_v34 = vrot.slane %v4011_v52, 4 }
 0x1c6   : > { %v2445_v20 = vpop.f32.mrf.mxu0 }
 0x1c7   : > { %v3439_v14 = vrot.slane %v3437_v12, 5 }
 0x1c8   : > { %v1791_v57 = vpop.f32.mrf.mxu3  ;;  %5162 = vmatmul.msk.bf16.gmra.mxu2 %vm756_vm3, %v5361_v58  ;;  %v1105_v48 = vpop.f32.mrf.mxu1  ;;  %v5195_v58 = vld [vmem:[%s5790_s29 + $0x70] sm:$0xf] }
 0x1c9   : > { %v1834_v10 = vadd.f32 %v1791_v57, %v1544_v29  ;;  %v4116_v29 = vpack.c.b16 %v4090_v3, %v4089_v39  ;;  %v3443_v44 = vshll.u32 %v5195_v58, 16  ;;  %v3447_v57 = vshrl.u32 %v5195_v58, 16  ;;  %v5000_v3 = vld [vmem:[%s5790_s29 + $0x60] sm:$0xe] }
 0x1ca   : > { %v5293_v39 = vrot.slane %v5256_v7, 9  ;;  %v1106_v60 = vadd.f32 %v1105_v48, %v6112_v15  ;;  %v5035_v5 = vrot.slane %v5000_v3, 9  ;;  %v4015_v48 = vsel %vm5928_vm7, %v4013_v34, %v4014_v35  ;;  %v5260_v3 = vld [vmem:[%s5790_s29 + $0x70] sm:$0xf]  ;;  %v5197_v34 = vld [vmem:[%s5790_s29 + $0x78] sm:$0xf] }
 0x1cb   : > { %v1504_v32 = vpop.f32.mrf.mxu2  ;;  %v6601_v23 = vadd.f32 %v2445_v20, %v1834_v10  ;;  %v6614_v51 = vrot.slane %v3443_v44, 5  ;;  %v3449_v0 = vrot.slane %v3447_v57, 4 }
 0x1cc   : > { %v1545_v6 = vadd.f32 %v1504_v32, %v1104_v22  ;;  %v5002_v22 = vld [vmem:[%s5790_s29 + $0x68] sm:$0x1]  ;;  %v3436_v32 = vrot.slane %v3434_v31, 4  ;;  %v4012_v15 = vsel %vm5928_vm7, %v5293_v39, %v4011_v52  ;;  %v5196_v31 = vld [vmem:[%s5790_s29 + $0x74] sm:$0x1]  ;;  %v2645_v12 = vsel %vm5928_vm7, %v5035_v5, %v2644_v50 }
 0x1cd   : > { %5227 = vmatmul.msk.bf16.gmra.mxu3 %vm756_vm3, %v3686_v63  ;;  %v3662_v63 = vunpack.c.l.b16 %v3432_v37  ;;  %v2647_v37 = vrot.slane %v5002_v22, 5  ;;  %v3450_v52 = vor.u32 %v3449_v0, %v6614_v51  ;;  %v4092_v39 = vunpack.c.l.b16 %v4015_v48 }
 0x1ce   : > { %v2448_v55 = vpop.f32.mrf.mxu0  ;;  %v3440_v57 = vor.u32 %v3439_v14, %v3436_v32  ;;  %v5259_v32 = vld [vmem:[%s5790_s29 + $0x6c] sm:$0xe]  ;;  %v4018_v5 = vrot.slane %v5260_v3, 5  ;;  %v3461_v48 = vshll.u32 %v5197_v34, 16 }
 0x1cf   : > { %v2648_v44 = vsel %vm5928_vm7, %v2646_v56, %v2647_v37  ;;  %v5004_v56 = vld [vmem:[%s5790_s29 + $0x70] sm:$0xf] }
 0x1d0   : > { %v1794_v8 = vpop.f32.mrf.mxu3  ;;  %v1108_v20 = vpop.f32.mrf.mxu1  ;;  %v2720_v50 = vunpack.c.l.b16 %v2648_v44  ;;  %v5294_v44 = vrot.slane %v5259_v32, 9 }
 0x1d1   : > { %5308 = vmatmul.msk.bf16.gmra.mxu0 %vm756_vm3, %v4116_v29  ;;  %v1835_v10 = vadd.f32 %v1794_v8, %v1545_v6  ;;  %v5362_v29 = vld [vmem:[%s5790_s29 + $0x60] sm:$0xff] }
 0x1d3   : > { %v1506_v30 = vpop.f32.mrf.mxu2  ;;  %5050 = vmatmul.msk.bf16.gmra.mxu1 %vm756_vm3, %v2743_v21  ;;  %v6616_v6 = vadd.f32 %v2448_v55, %v1835_v10  ;;  %v3687_v21 = vpack.c.b16 %v3662_v63, %v3661_v54  ;;  %v4091_v10 = vunpack.c.l.b16 %v4012_v15  ;;  %v3453_v54 = vshll.u32 %v5196_v31, 16 }
 0x1d4   : > { %v1546_v58 = vadd.f32 %v1506_v30, %v1106_v60  ;;  %v1109_v63 = vadd.f32 %v1108_v20, %v6131_v53  ;;  %v2719_v60 = vunpack.c.l.b16 %v2645_v12  ;;  %v3441_v30 = vrot.slane %v3440_v57, 4  ;;  %v5198_v20 = vld [vmem:[%s5790_s29 + $0x7c] sm:$0xf] }
 0x1d5   : > { %v4117_v14 = vpack.c.b16 %v4092_v39, %v4091_v10  ;;  %v3455_v0 = vrot.slane %v3453_v54, 5  ;;  %v3458_v15 = vshrl.u32 %v5197_v34, 16  ;;  %v4020_v10 = vrot.slane %v4018_v5, 4  ;;  %v5003_v39 = vld [vmem:[%s5790_s29 + $0x6c] sm:$0xe] }
 0x1d6   : > { %v2450_v7 = vpop.f32.mrf.mxu0  ;;  %v2744_v31 = vpack.c.b16 %v2720_v50, %v2719_v60  ;;  %v5005_v54 = vld [vmem:[%s5790_s29 + $0x74] sm:$0x1]  ;;  %v3463_v60 = vrot.slane %v3461_v48, 5  ;;  %v3471_v50 = vshrl.u32 %v5198_v20, 16  ;;  %v5036_v32 = vrot.slane %v5003_v39, 9 }
 0x1d8   : > { %v1796_v4 = vpop.f32.mrf.mxu3  ;;  %5163 = vmatmul.msk.bf16.gmra.mxu2 %vm756_vm3, %v5362_v29  ;;  %v1110_v55 = vpop.f32.mrf.mxu1  ;;  %v3451_v29 = vrot.slane %v3450_v52, 4  ;;  %v2651_v52 = vrot.slane %v5004_v56, 5  ;;  %v4019_v56 = vsel %vm5928_vm7, %v5294_v44, %v4018_v5  ;;  %v3473_v48 = vrot.slane %v3471_v50, 4 }
 0x1d9   : > { %v1836_v8 = vadd.f32 %v1796_v4, %v1546_v58  ;;  %v5261_v58 = vld [vmem:[%s5790_s29 + $0x74] sm:$0x1]  ;;  %v1111_v3 = vadd.f32 %v1110_v55, %v6154_v26 }
 0x1da   : > { %v4021_v57 = vrot.slane %v5261_v58, 5 }
 0x1db   : > { %v1509_v22 = vpop.f32.mrf.mxu2  ;;  %v6637_v37 = vadd.f32 %v2450_v7, %v1836_v8  ;;  %v3456_v8 = vsel %vm5802_vm4, %v3451_v29, %v3455_v0  ;;  %v2654_v29 = vrot.slane %v5005_v54, 5 }
 0x1dc   : > { %v1547_v35 = vadd.f32 %v1509_v22, %v1109_v63  ;;  %v3467_v63 = vshll.u32 %v5198_v20, 16  ;;  %v3460_v22 = vrot.slane %v3458_v15, 4  ;;  %v3664_v58 = vunpack.c.l.b16 %v3456_v8 }
 0x1dd   : > { %5228 = vmatmul.msk.bf16.gmra.mxu3 %vm756_vm3, %v3687_v21  ;;  %v3446_v21 = vsel %vm5802_vm4, %v3441_v30, %v6614_v51  ;;  %v4022_v55 = vsel %vm5928_vm7, %v4020_v10, %v4021_v57  ;;  %v4093_v8 = vunpack.c.l.b16 %v4019_v56  ;;  %v5263_v10 = vld [vmem:[%s5790_s29 + $0x7c] sm:$0xf] }
 0x1de   : > { %v2453_v53 = vpop.f32.mrf.mxu0  ;;  %v3663_v0 = vunpack.c.l.b16 %v3446_v21  ;;  %v3464_v20 = vor.u32 %v3463_v60, %v3460_v22  ;;  %v3469_v15 = vrot.slane %v3467_v63, 5  ;;  %v2652_v21 = vsel %vm5928_vm7, %v5036_v32, %v2651_v52  ;;  %v5200_v32 = vld [vmem:[%s5790_s29 + $0x84] sm:$0xf] }
 0x1df   : > { %v4094_v57 = vunpack.c.l.b16 %v4022_v55  ;;  %v2721_v60 = vunpack.c.l.b16 %v2652_v21  ;;  %v5201_v55 = vld [vmem:[%s5790_s29 + $0x88] sm:$0xf] }
 0x1e0   : > { %v1799_v4 = vpop.f32.mrf.mxu3  ;;  %v1113_v12 = vpop.f32.mrf.mxu1  ;;  %v3465_v54 = vrot.slane %v3464_v20, 4  ;;  %v3474_v63 = vor.u32 %v3473_v48, %v3469_v15 }
 0x1e1   : > { %5309 = vmatmul.msk.bf16.gmra.mxu0 %vm756_vm3, %v4117_v14  ;;  %v1837_v7 = vadd.f32 %v1799_v4, %v1547_v35  ;;  %v5363_v35 = vld [vmem:[%s5790_s29 + $0x6c] sm:$0xff]  ;;  %v2653_v14 = vrot.slane %v2651_v52, 4  ;;  %v1114_v39 = vadd.f32 %v1113_v12, %v6173_v1 }
 0x1e2   : > { %v3470_v1 = vsel %vm5802_vm4, %v3465_v54, %v3469_v15  ;;  %v3475_v12 = vrot.slane %v3474_v63, 4  ;;  %v3491_v15 = vshll.u32 %v5201_v55, 16 }
 0x1e3   : > { %v1511_v51 = vpop.f32.mrf.mxu2  ;;  %5051 = vmatmul.msk.bf16.gmra.mxu1 %vm756_vm3, %v2744_v31  ;;  %v6650_v34 = vadd.f32 %v2453_v53, %v1837_v7  ;;  %v5199_v53 = vld [vmem:[%s5790_s29 + $0x80] sm:$0x1]  ;;  %v2655_v5 = vsel %vm5928_vm7, %v2653_v14, %v2654_v29  ;;  %v3688_v7 = vpack.c.b16 %v3664_v58, %v3663_v0  ;;  %v5007_v29 = vld [vmem:[%s5790_s29 + $0x7c] sm:$0xf] }
 0x1e4   : > { %v1548_v30 = vadd.f32 %v1511_v51, %v1111_v3  ;;  %v3477_v3 = vshll.u32 %v5199_v53, 16  ;;  %v2722_v52 = vunpack.c.l.b16 %v2655_v5  ;;  %v5262_v51 = vld [vmem:[%s5790_s29 + $0x78] sm:$0xe]  ;;  %v5264_v14 = vld [vmem:[%s5790_s29 + $0x80] sm:$0x1]  ;;  %v3482_v53 = vshrl.u32 %v5200_v32, 16 }
 0x1e5   : > { %v5295_v48 = vrot.slane %v5262_v51, 9 }
 0x1e6   : > { %v2455_v26 = vpop.f32.mrf.mxu0  ;;  %v3479_v56 = vrot.slane %v3477_v3, 5  ;;  %v2745_v20 = vpack.c.b16 %v2722_v52, %v2721_v60  ;;  %v3665_v3 = vunpack.c.l.b16 %v3470_v1  ;;  %v3484_v52 = vrot.slane %v3482_v53, 4 }
 0x1e8   : > { %v1801_v31 = vpop.f32.mrf.mxu3  ;;  %5164 = vmatmul.msk.bf16.gmra.mxu2 %vm756_vm3, %v5363_v35  ;;  %v1115_v4 = vpop.f32.mrf.mxu1  ;;  %v4025_v35 = vrot.slane %v5263_v10, 5  ;;  %v5008_v10 = vld [vmem:[%s5790_s29 + $0x80] sm:$0x1]  ;;  %v3480_v63 = vsel %vm5802_vm4, %v3475_v12, %v3479_v56  ;;  %v6689_v12 = vrot.slane %v3491_v15, 5 }
 0x1e9   : > { %v1838_v44 = vadd.f32 %v1801_v31, %v1548_v30  ;;  %v4118_v30 = vpack.c.b16 %v4094_v57, %v4093_v8  ;;  %v3485_v31 = vshll.u32 %v5200_v32, 16  ;;  %v4028_v8 = vrot.slane %v5264_v14, 5 }
 0x1ea   : > { %v2658_v57 = vrot.slane %v5007_v29, 5  ;;  %v1116_v54 = vadd.f32 %v1115_v4, %v6191_v46  ;;  %v4026_v60 = vsel %vm5928_vm7, %v5295_v48, %v4025_v35  ;;  %v2661_v46 = vrot.slane %v5008_v10, 5 }
 0x1eb   : > { %v1514_v22 = vpop.f32.mrf.mxu2  ;;  %v6670_v0 = vadd.f32 %v2455_v26, %v1838_v44  ;;  %v5006_v44 = vld [vmem:[%s5790_s29 + $0x78] sm:$0xe]  ;;  %v3487_v51 = vrot.slane %v3485_v31, 5  ;;  %v3666_v4 = vunpack.c.l.b16 %v3480_v63 }
 0x1ec   : > { %v1549_v50 = vadd.f32 %v1514_v22, %v1114_v39  ;;  %v3495_v39 = vshrl.u32 %v5201_v55, 16  ;;  %v5037_v14 = vrot.slane %v5006_v44, 9  ;;  %v2660_v29 = vrot.slane %v2658_v57, 4 }
 0x1ed   : > { %5229 = vmatmul.msk.bf16.gmra.mxu3 %vm756_vm3, %v3688_v7  ;;  %v4027_v7 = vrot.slane %v4025_v35, 4  ;;  %v5202_v35 = vld [vmem:[%s5790_s29 + $0x8c] sm:$0x1]  ;;  %v3689_v44 = vpack.c.b16 %v3666_v4, %v3665_v3  ;;  %v5010_v3 = vld [vmem:[%s5790_s29 + $0x88] sm:$0xf] }
 0x1ee   : > { %v2458_v58 = vpop.f32.mrf.mxu0  ;;  %v3497_v56 = vrot.slane %v3495_v39, 4  ;;  %v2659_v31 = vsel %vm5928_vm7, %v5037_v14, %v2658_v57  ;;  %v3501_v15 = vshll.u32 %v5202_v35, 16  ;;  %v5265_v39 = vld [vmem:[%s5790_s29 + $0x84] sm:$0xe] }
 0x1ef   : > { %v4029_v1 = vsel %vm5928_vm7, %v4027_v7, %v4028_v8  ;;  %v3488_v7 = vor.u32 %v3487_v51, %v3484_v52  ;;  %v5266_v8 = vld [vmem:[%s5790_s29 + $0x88] sm:$0xf]  ;;  %v2723_v63 = vunpack.c.l.b16 %v2659_v31 }
 0x1f0   : > { %v1804_v21 = vpop.f32.mrf.mxu3  ;;  %v2813_v5 = vpop.f32.mrf.mxu1  ;;  %v3498_v10 = vor.u32 %v3497_v56, %v6689_v12  ;;  %v3503_v51 = vrot.slane %v3501_v15, 5 }
 0x1f1   : > { %5310 = vmatmul.msk.bf16.gmra.mxu0 %vm756_vm3, %v4118_v30  ;;  %v1839_v26 = vadd.f32 %v1804_v21, %v1549_v50  ;;  %v5364_v30 = vld [vmem:[%s5790_s29 + $0x78] sm:$0xff]  ;;  %v2662_v21 = vsel %vm5928_vm7, %v2660_v29, %v2661_v46  ;;  %v3489_v14 = vrot.slane %v3488_v7, 4  ;;  %v2893_v46 = vadd.f32 %v2813_v5, %v6211_v61  ;;  %v5009_v5 = vld [vmem:[%s5790_s29 + $0x84] sm:$0xe] }
 0x1f2   : > { %v3499_v52 = vrot.slane %v3498_v10, 4  ;;  %v2665_v10 = vrot.slane %v5010_v3, 5 }
 0x1f3   : > { %v1516_v22 = vpop.f32.mrf.mxu2  ;;  %5052 = vmatmul.msk.bf16.gmra.mxu1 %vm756_vm3, %v2745_v20  ;;  %v6684_v50 = vadd.f32 %v2458_v58, %v1839_v26  ;;  %v4095_v20 = vunpack.c.l.b16 %v4026_v60  ;;  %v4096_v58 = vunpack.c.l.b16 %v4029_v1  ;;  %v5267_v60 = vld [vmem:[%s5790_s29 + $0x8c] sm:$0x1]  ;;  %v5203_v1 = vld [vmem:[%s5790_s29 + $0x90] sm:$0xf]  ;;  %v3494_v61 = vsel %vm5802_vm4, %v3489_v14, %v6689_v12 }
 0x1f4   : > { %v1550_v32 = vadd.f32 %v1516_v22, %v1116_v54  ;;  %v2724_v22 = vunpack.c.l.b16 %v2662_v21  ;;  %v4035_v56 = vrot.slane %v5267_v60, 5  ;;  %v3506_v35 = vshrl.u32 %v5203_v1, 16 }
 0x1f5   : > { %7051 = vst [vmem:[#allocation11_spill] sm:$0xff] %v6684_v50  ;;  %v4119_v57 = vpack.c.b16 %v4096_v58, %v4095_v20  ;;  %v5204_v50 = vld [vmem:[%s5790_s29 + $0x94] sm:$0xf]  ;;  %v5038_v14 = vrot.slane %v5009_v5, 9  ;;  %v3667_v3 = vunpack.c.l.b16 %v3494_v61 }
 0x1f6   : > { %v2460_v55 = vpop.f32.mrf.mxu0  ;;  %v2746_v31 = vpack.c.b16 %v2724_v22, %v2723_v63  ;;  %v3515_v58 = vshll.u32 %v5204_v50, 16  ;;  %v3519_v21 = vshrl.u32 %v5204_v50, 16  ;;  %v3508_v15 = vrot.slane %v3506_v35, 4 }
 0x1f8   : > { %v1806_v48 = vpop.f32.mrf.mxu3  ;;  %5165 = vmatmul.msk.bf16.gmra.mxu2 %vm756_vm3, %v5364_v30  ;;  %v2815_v53 = vpop.f32.mrf.mxu1  ;;  %v4032_v30 = vrot.slane %v5266_v8, 5  ;;  %v6722_v12 = vrot.slane %v3515_v58, 5  ;;  %v3521_v60 = vrot.slane %v3519_v21, 4  ;;  %v2666_v21 = vsel %vm5928_vm7, %v5038_v14, %v2665_v10 }
 0x1f9   : > { %v1840_v26 = vadd.f32 %v1806_v48, %v1550_v32  ;;  %v5296_v32 = vrot.slane %v5265_v39, 9  ;;  %v3509_v48 = vshll.u32 %v5203_v1, 16 }
 0x1fa   : > { %v4034_v20 = vrot.slane %v4032_v30, 4 }
 0x1fb   : > { %v3103_v54 = vpop.f32.mrf.mxu2  ;;  %v6705_v29 = vadd.f32 %v2460_v55, %v1840_v26  ;;  %v5011_v55 = vld [vmem:[%s5790_s29 + $0x8c] sm:$0x1]  ;;  %v3504_v26 = vsel %vm5802_vm4, %v3499_v52, %v3503_v51  ;;  %v4033_v50 = vsel %vm5928_vm7, %v5296_v32, %v4032_v30  ;;  %v3511_v39 = vrot.slane %v3509_v48, 5  ;;  %v5205_v30 = vld [vmem:[%s5790_s29 + $0x98] sm:$0x1] }
 0x1fc   : > { %v3183_v7 = vadd.f32 %v3103_v54, %v2893_v46  ;;  %v2894_v54 = vadd.f32 %v2815_v53, %v6221_v38  ;;  %v4036_v22 = vsel %vm5928_vm7, %v4034_v20, %v4035_v56  ;;  %v2667_v52 = vrot.slane %v2665_v10, 4 }
 0x1fd   : > { %5230 = vmatmul.msk.bf16.gmra.mxu3 %vm756_vm3, %v3689_v44  ;;  %v2668_v51 = vrot.slane %v5011_v55, 5  ;;  %v3668_v46 = vunpack.c.l.b16 %v3504_v26  ;;  %v4097_v53 = vunpack.c.l.b16 %v4033_v50  ;;  %v4098_v35 = vunpack.c.l.b16 %v4036_v22  ;;  %v5269_v55 = vld [vmem:[%s5790_s29 + $0x94] sm:$0xf]  ;;  %v5207_v22 = vld [vmem:[%s5790_s29 + $0xa0] sm:$0xf] }
 0x1fe   : > { %v4187_v4 = vpop.f32.mrf.mxu0  ;;  %v3512_v48 = vor.u32 %v3511_v39, %v3508_v15  ;;  %v3525_v56 = vshll.u32 %v5205_v30, 16  ;;  %v4039_v14 = vrot.slane %v5269_v55, 5 }
 0x1ff   : > { %v3690_v5 = vpack.c.b16 %v3668_v46, %v3667_v3  ;;  %v4120_v26 = vpack.c.b16 %v4098_v35, %v4097_v53  ;;  %v5268_v3 = vld [vmem:[%s5790_s29 + $0x90] sm:$0xe]  ;;  %v5013_v46 = vld [vmem:[%s5790_s29 + $0x94] sm:$0xf]  ;;  %v3539_v35 = vshll.u32 %v5207_v22, 16 }
 0x200   : > { %v3757_v8 = vpop.f32.mrf.mxu3  ;;  %v2818_v44 = vpop.f32.mrf.mxu1 }
 0x201   : > { %5311 = vmatmul.msk.bf16.gmra.mxu0 %vm756_vm3, %v4119_v57  ;;  %v3837_v1 = vadd.f32 %v3757_v8, %v3183_v7  ;;  %v5365_v57 = vld [vmem:[%s5790_s29 + $0x84] sm:$0xff]  ;;  %v2669_v7 = vsel %vm5928_vm7, %v2667_v52, %v2668_v51  ;;  %v3522_v8 = vor.u32 %v3521_v60, %v6722_v12  ;;  %v2895_v15 = vadd.f32 %v2818_v44, %v6237_v27  ;;  %v5270_v44 = vld [vmem:[%s5790_s29 + $0x98] sm:$0x1] }
 0x202   : > { %v2726_v10 = vunpack.c.l.b16 %v2669_v7  ;;  %v3527_v60 = vrot.slane %v3525_v56, 5 }
 0x203   : > { %v3105_v63 = vpop.f32.mrf.mxu2  ;;  %5053 = vmatmul.msk.bf16.gmra.mxu1 %vm756_vm3, %v2746_v31  ;;  %v4267_v31 = vadd.f32 %v4187_v4, %v3837_v1  ;;  %v3513_v4 = vrot.slane %v3512_v48, 4  ;;  %v3543_v48 = vshrl.u32 %v5207_v22, 16  ;;  %v6755_v22 = vrot.slane %v3539_v35, 5 }
 0x204   : > { %v3184_v32 = vadd.f32 %v3105_v63, %v2894_v54  ;;  %v2725_v54 = vunpack.c.l.b16 %v2666_v21  ;;  %v5206_v63 = vld [vmem:[%s5790_s29 + $0x9c] sm:$0xf] }
 0x205   : > { %v4401_v1 = vmul.f32 %v4267_v31, %v4267_v31  ;;  %v3533_v53 = vshll.u32 %v5206_v63, 16  ;;  %v3518_v7 = vsel %vm5802_vm4, %v3513_v4, %v6722_v12 }
 0x206   : > { %v4189_v38 = vpop.f32.mrf.mxu0  ;;  %v2747_v21 = vpack.c.b16 %v2726_v10, %v2725_v54  ;;  %v5014_v54 = vld [vmem:[%s5790_s29 + $0x98] sm:$0x1] }
 0x208   : > { %v3759_v20 = vpop.f32.mrf.mxu3  ;;  %5166 = vmatmul.msk.bf16.gmra.mxu2 %vm756_vm3, %v5365_v57  ;;  %v2820_v58 = vpop.f32.mrf.mxu1  ;;  %v3523_v57 = vrot.slane %v3522_v8, 4 }
 0x209   : > { %v3838_v61 = vadd.f32 %v3759_v20, %v3184_v32  ;;  %v2896_v4 = vadd.f32 %v2820_v58, %v6247_v24 }
 0x20a   : > { %v3528_v8 = vsel %vm5802_vm4, %v3523_v57, %v3527_v60  ;;  %v3669_v60 = vunpack.c.l.b16 %v3518_v7 }
 0x20b   : > { %v4268_v50 = vadd.f32 %v4189_v38, %v3838_v61  ;;  %v3108_v39 = vpop.f32.mrf.mxu2  ;;  %v3530_v38 = vshrl.u32 %v5206_v63, 16  ;;  %v5297_v61 = vrot.slane %v5268_v3, 9  ;;  %v3535_v63 = vrot.slane %v3533_v53, 5 }
 0x20c   : > { %v3185_v32 = vadd.f32 %v3108_v39, %v2895_v15  ;;  %v4042_v15 = vrot.slane %v5270_v44, 5  ;;  %v5012_v39 = vld [vmem:[%s5790_s29 + $0x90] sm:$0xe]  ;;  %v2675_v44 = vrot.slane %v5014_v54, 5  ;;  %v5209_v54 = vld [vmem:[%s5790_s29 + $0xa8] sm:$0xf] }
 0x20d   : > { %v5376_v52 = vpack.c.bf16 %v4268_v50, %v4267_v31  ;;  %v4363_v51 = vadd.f32 %v4268_v50, %v4267_v31  ;;  %v4402_v30 = vmul.f32 %v4268_v50, %v4268_v50  ;;  %5231 = vmatmul.msk.bf16.gmra.mxu3 %vm756_vm3, %v3690_v5  ;;  %v2672_v5 = vrot.slane %v5013_v46, 5 }
 0x20e   : > { %v4192_v27 = vpop.f32.mrf.mxu0  ;;  %v4041_v50 = vrot.slane %v4039_v14, 4  ;;  %v3532_v10 = vrot.slane %v3530_v38, 4  ;;  %v5039_v3 = vrot.slane %v5012_v39, 9  ;;  %v5272_v39 = vld [vmem:[%s5790_s29 + $0xa0] sm:$0xf] }
 0x20f   : > { %v4433_v20 = vadd.f32 %v4402_v30, %v4401_v1  ;;  %5377 = vst [vmem:[%s6744_s14] sm:$0xff] %v5376_v52   ;;  %v3545_v1 = vrot.slane %v3543_v48, 4  ;;  %v5208_v52 = vld [vmem:[%s5790_s29 + $0xa4] sm:$0x1]  ;;  %v5366_v30 = vld [vmem:[%s5790_s29 + $0x90] sm:$0xff]  ;;  %v2674_v46 = vrot.slane %v2672_v5, 4 }
 0x210   : > { %v3762_v56 = vpop.f32.mrf.mxu3  ;;  %v2823_v31 = vpop.f32.mrf.mxu1  ;;  %v4043_v24 = vsel %vm5928_vm7, %v4041_v50, %v4042_v15 }
 0x211   : > { %5312 = vmatmul.msk.bf16.gmra.mxu0 %vm756_vm3, %v4120_v26  ;;  %v3839_v55 = vadd.f32 %v3762_v56, %v3185_v32  ;;  %v3670_v26 = vunpack.c.l.b16 %v3528_v8  ;;  %v4040_v32 = vsel %vm5928_vm7, %v5297_v61, %v4039_v14  ;;  %v3546_v48 = vor.u32 %v3545_v1, %v6755_v22 }
 0x212   : > { %v4099_v14 = vunpack.c.l.b16 %v4040_v32  ;;  %v4100_v8 = vunpack.c.l.b16 %v4043_v24  ;;  %v2673_v61 = vsel %vm5928_vm7, %v5039_v3, %v2672_v5  ;;  %v5271_v5 = vld [vmem:[%s5790_s29 + $0x9c] sm:$0xe]  ;;  %v4046_v3 = vrot.slane %v5272_v39, 5 }
 0x213   : > { %v4269_v12 = vadd.f32 %v4192_v27, %v3839_v55  ;;  %v3110_v57 = vpop.f32.mrf.mxu2  ;;  %5054 = vmatmul.msk.bf16.gmra.mxu1 %vm756_vm3, %v2747_v21  ;;  %v3536_v27 = vor.u32 %v3535_v63, %v3532_v10  ;;  %v3549_v21 = vshll.u32 %v5208_v52, 16  ;;  %v2676_v55 = vsel %vm5928_vm7, %v2674_v46, %v2675_v44  ;;  %v5016_v46 = vld [vmem:[%s5790_s29 + $0xa0] sm:$0xf] }
 0x214   : > { %v3186_v35 = vadd.f32 %v3110_v57, %v2896_v4  ;;  %v3691_v15 = vpack.c.b16 %v3670_v26, %v3669_v60  ;;  %v2897_v4 = vadd.f32 %v2823_v31, %v6261_v16  ;;  %v2727_v52 = vunpack.c.l.b16 %v2673_v61  ;;  %v5210_v16 = vld [vmem:[%s5790_s29 + $0xac] sm:$0xf] }
 0x215   : > { %v4364_v38 = vadd.f32 %v4363_v51, %v4269_v12  ;;  %v4403_v53 = vmul.f32 %v4269_v12, %v4269_v12  ;;  %v3537_v10 = vrot.slane %v3536_v27, 4  ;;  %v3551_v63 = vrot.slane %v3549_v21, 5  ;;  %v5273_v27 = vld [vmem:[%s5790_s29 + $0xa4] sm:$0x1] }
 0x216   : > { %v4194_v58 = vpop.f32.mrf.mxu0  ;;  %v4121_v32 = vpack.c.b16 %v4100_v8, %v4099_v14  ;;  %v3554_v44 = vshrl.u32 %v5209_v54, 16  ;;  %v3557_v60 = vshll.u32 %v5209_v54, 16  ;;  %v3563_v39 = vshll.u32 %v5210_v16, 16 }
 0x217   : > { %v4434_v56 = vadd.f32 %v4433_v20, %v4403_v53  ;;  %v3547_v20 = vrot.slane %v3546_v48, 4  ;;  %v5298_v48 = vrot.slane %v5271_v5, 9  ;;  %v3567_v54 = vshrl.u32 %v5210_v16, 16 }
 0x218   : > { %v3764_v7 = vpop.f32.mrf.mxu3  ;;  %5167 = vmatmul.msk.bf16.gmra.mxu2 %vm756_vm3, %v5366_v30  ;;  %v2825_v51 = vpop.f32.mrf.mxu1  ;;  %v2728_v30 = vunpack.c.l.b16 %v2676_v55  ;;  %v5017_v55 = vld [vmem:[%s5790_s29 + $0xa4] sm:$0x1] }
 0x219   : > { %v3840_v50 = vadd.f32 %v3764_v7, %v3186_v35  ;;  %v3552_v14 = vsel %vm5802_vm4, %v3547_v20, %v3551_v63  ;;  %v2898_v63 = vadd.f32 %v2825_v51, %v6277_v11  ;;  %v2682_v5 = vrot.slane %v5017_v55, 5  ;;  %v5211_v11 = vld [vmem:[%s5790_s29 + $0xb0] sm:$0x1] }
 0x21a   : > { %v2748_v7 = vpack.c.b16 %v2728_v30, %v2727_v52  ;;  %v3573_v55 = vshll.u32 %v5211_v11, 16 }
 0x21b   : > { %v4270_v1 = vadd.f32 %v4194_v58, %v3840_v50  ;;  %v3113_v57 = vpop.f32.mrf.mxu2  ;;  %v3542_v58 = vsel %vm5802_vm4, %v3537_v10, %v6755_v22  ;;  %v3556_v50 = vrot.slane %v3554_v44, 4  ;;  %v4048_v10 = vrot.slane %v4046_v3, 4 }
 0x21c   : > { %v3187_v24 = vadd.f32 %v3113_v57, %v2897_v4  ;;  %v3672_v4 = vunpack.c.l.b16 %v3552_v14  ;;  %v4047_v44 = vsel %vm5928_vm7, %v5298_v48, %v4046_v3 }
 0x21d   : > { %v5381_v26 = vpack.c.bf16 %v4270_v1, %v4269_v12  ;;  %v4365_v53 = vadd.f32 %v4364_v38, %v4270_v1  ;;  %v4404_v35 = vmul.f32 %v4270_v1, %v4270_v1  ;;  %5232 = vmatmul.msk.bf16.gmra.mxu3 %vm756_vm3, %v3691_v15  ;;  %v5015_v12 = vld [vmem:[%s5790_s29 + $0x9c] sm:$0xe]  ;;  %v2679_v38 = vrot.slane %v5016_v46, 5 }
 0x21e   : > { %v4197_v31 = vpop.f32.mrf.mxu0  ;;  %v3559_v15 = vrot.slane %v3557_v60, 5  ;;  %v3671_v1 = vunpack.c.l.b16 %v3542_v58  ;;  %v5040_v57 = vrot.slane %v5015_v12, 9  ;;  %v5367_v46 = vld [vmem:[%s5790_s29 + $0x9c] sm:$0xff]  ;;  %v3565_v60 = vrot.slane %v3563_v39, 5 }
 0x21f   : > { %v4435_v21 = vadd.f32 %v4434_v56, %v4404_v35  ;;  %5453 = vst [vmem:[%s6744_s14 + $0x8] sm:$0xff] %v5381_v26   ;;  %v4049_v56 = vrot.slane %v5273_v27, 5  ;;  %v2681_v30 = vrot.slane %v2679_v38, 4  ;;  %v3569_v26 = vrot.slane %v3567_v54, 4 }
 0x220   : > { %v3767_v8 = vpop.f32.mrf.mxu3  ;;  %v2828_v61 = vpop.f32.mrf.mxu1  ;;  %v4101_v27 = vunpack.c.l.b16 %v4047_v44  ;;  %v5276_v44 = vld [vmem:[%s5790_s29 + $0xb0] sm:$0x1] }
 0x221   : > { %5313 = vmatmul.msk.bf16.gmra.mxu0 %vm756_vm3, %v4121_v32  ;;  %v3841_v22 = vadd.f32 %v3767_v8, %v3187_v24  ;;  %v3560_v32 = vor.u32 %v3559_v15, %v3556_v50  ;;  %v2683_v3 = vsel %vm5928_vm7, %v2681_v30, %v2682_v5  ;;  %v3570_v8 = vor.u32 %v3569_v26, %v3565_v60  ;;  %v5275_v50 = vld [vmem:[%s5790_s29 + $0xac] sm:$0xf] }
 0x222   : > { %v3692_v15 = vpack.c.b16 %v3672_v4, %v3671_v1 }
 0x223   : > { %v4271_v20 = vadd.f32 %v4197_v31, %v3841_v22  ;;  %v3115_v52 = vpop.f32.mrf.mxu2  ;;  %5055 = vmatmul.msk.bf16.gmra.mxu1 %vm756_vm3, %v2748_v7  ;;  %v4050_v31 = vsel %vm5928_vm7, %v4048_v10, %v4049_v56  ;;  %v2680_v7 = vsel %vm5928_vm7, %v5040_v57, %v2679_v38  ;;  %v3561_v12 = vrot.slane %v3560_v32, 4  ;;  %v5274_v56 = vld [vmem:[%s5790_s29 + $0xa8] sm:$0xe]  ;;  %v5213_v32 = vld [vmem:[%s5790_s29 + $0xb8] sm:$0xf] }
 0x224   : > { %v3188_v16 = vadd.f32 %v3115_v52, %v2898_v63  ;;  %v2729_v39 = vunpack.c.l.b16 %v2680_v7  ;;  %v2730_v38 = vunpack.c.l.b16 %v2683_v3  ;;  %v2899_v22 = vadd.f32 %v2828_v61, %v6290_v45  ;;  %v5212_v63 = vld [vmem:[%s5790_s29 + $0xb4] sm:$0xf]  ;;  %v5019_v61 = vld [vmem:[%s5790_s29 + $0xac] sm:$0xf] }
 0x225   : > { %v4366_v35 = vadd.f32 %v4365_v53, %v4271_v20  ;;  %v4405_v24 = vmul.f32 %v4271_v20, %v4271_v20  ;;  %v4102_v53 = vunpack.c.l.b16 %v4050_v31  ;;  %v4053_v57 = vrot.slane %v5275_v50, 5  ;;  %v5020_v50 = vld [vmem:[%s5790_s29 + $0xb0] sm:$0x1] }
 0x226   : > { %v4199_v51 = vpop.f32.mrf.mxu0  ;;  %v3566_v30 = vsel %vm5802_vm4, %v3561_v12, %v3565_v60  ;;  %v3571_v5 = vrot.slane %v3570_v8, 4  ;;  %v5299_v31 = vrot.slane %v5274_v56, 9  ;;  %v3578_v11 = vshrl.u32 %v5212_v63, 16 }
 0x227   : > { %v4436_v58 = vadd.f32 %v4435_v21, %v4405_v24  ;;  %v4122_v52 = vpack.c.b16 %v4102_v53, %v4101_v27  ;;  %v4055_v27 = vrot.slane %v4053_v57, 4  ;;  %v4056_v7 = vrot.slane %v5276_v44, 5 }
 0x228   : > { %v3769_v48 = vpop.f32.mrf.mxu3  ;;  %5168 = vmatmul.msk.bf16.gmra.mxu2 %vm756_vm3, %v5367_v46  ;;  %v2830_v14 = vpop.f32.mrf.mxu1  ;;  %v3575_v46 = vrot.slane %v3573_v55, 5  ;;  %v3587_v3 = vshll.u32 %v5213_v32, 16  ;;  %v3591_v53 = vshrl.u32 %v5213_v32, 16  ;;  %v5018_v55 = vld [vmem:[%s5790_s29 + $0xa8] sm:$0xe] }
 0x229   : > { %v3842_v21 = vadd.f32 %v3769_v48, %v3188_v16  ;;  %v2749_v16 = vpack.c.b16 %v2730_v38, %v2729_v39 }
 0x22a   : > { %v3576_v8 = vsel %vm5802_vm4, %v3571_v5, %v3575_v46  ;;  %v6823_v56 = vrot.slane %v3587_v3, 5  ;;  %v2689_v5 = vrot.slane %v5020_v50, 5 }
 0x22b   : > { %v4272_v54 = vadd.f32 %v4199_v51, %v3842_v21  ;;  %v3118_v10 = vpop.f32.mrf.mxu2  ;;  %v3581_v51 = vshll.u32 %v5212_v63, 16  ;;  %v3673_v21 = vunpack.c.l.b16 %v3566_v30  ;;  %v5368_v63 = vld [vmem:[%s5790_s29 + $0xa8] sm:$0xff] }
 0x22c   : > { %v3189_v45 = vadd.f32 %v3118_v10, %v2899_v22  ;;  %v4057_v10 = vsel %vm5928_vm7, %v4055_v27, %v4056_v7 }
 0x22d   : > { %v5386_v1 = vpack.c.bf16 %v4272_v54, %v4271_v20  ;;  %v4367_v4 = vadd.f32 %v4366_v35, %v4272_v54  ;;  %v4406_v26 = vmul.f32 %v4272_v54, %v4272_v54  ;;  %5233 = vmatmul.msk.bf16.gmra.mxu3 %vm756_vm3, %v3692_v15  ;;  %v2686_v35 = vrot.slane %v5019_v61, 5 }
 0x22e   : > { %v4202_v24 = vpop.f32.mrf.mxu0  ;;  %v3580_v15 = vrot.slane %v3578_v11, 4  ;;  %v3583_v39 = vrot.slane %v3581_v51, 5  ;;  %v2900_v54 = vadd.f32 %v2830_v14, %v6298_v49 }
 0x22f   : > { %v4437_v60 = vadd.f32 %v4436_v58, %v4406_v26  ;;  %5454 = vst [vmem:[%s6744_s14 + $0x10] sm:$0xff] %v5386_v1   ;;  %v4054_v58 = vsel %vm5928_vm7, %v5299_v31, %v4053_v57  ;;  %v2688_v30 = vrot.slane %v2686_v35, 4  ;;  %v3593_v57 = vrot.slane %v3591_v53, 4  ;;  %v5214_v26 = vld [vmem:[%s5790_s29 + $0xbc] sm:$0x1] }
 0x230   : > { %v3772_v48 = vpop.f32.mrf.mxu3  ;;  %v2833_v20 = vpop.f32.mrf.mxu1  ;;  %v3674_v1 = vunpack.c.l.b16 %v3576_v8  ;;  %v4103_v14 = vunpack.c.l.b16 %v4054_v58  ;;  %v3584_v61 = vor.u32 %v3583_v39, %v3580_v15  ;;  %v3597_v7 = vshll.u32 %v5214_v26, 16  ;;  %v5277_v39 = vld [vmem:[%s5790_s29 + $0xb4] sm:$0xe] }
 0x231   : > { %5314 = vmatmul.msk.bf16.gmra.mxu0 %vm756_vm3, %v4122_v52  ;;  %v3843_v12 = vadd.f32 %v3772_v48, %v3189_v45  ;;  %v5041_v52 = vrot.slane %v5018_v55, 9  ;;  %v4104_v45 = vunpack.c.l.b16 %v4057_v10  ;;  %v3594_v27 = vor.u32 %v3593_v57, %v6823_v56 }
 0x232   : > { %v3693_v48 = vpack.c.b16 %v3674_v1, %v3673_v21  ;;  %v2901_v50 = vadd.f32 %v2833_v20, %v6312_v25  ;;  %v3599_v10 = vrot.slane %v3597_v7, 5  ;;  %v5300_v1 = vrot.slane %v5277_v39, 9  ;;  %v5023_v7 = vld [vmem:[%s5790_s29 + $0xbc] sm:$0x1] }
 0x233   : > { %v4273_v38 = vadd.f32 %v4202_v24, %v3843_v12  ;;  %v3120_v22 = vpop.f32.mrf.mxu2  ;;  %5056 = vmatmul.msk.bf16.gmra.mxu1 %vm756_vm3, %v2749_v16  ;;  %v5278_v16 = vld [vmem:[%s5790_s29 + $0xb8] sm:$0xf]  ;;  %v2687_v51 = vsel %vm5928_vm7, %v5041_v52, %v2686_v35  ;;  %v4123_v53 = vpack.c.b16 %v4104_v45, %v4103_v14  ;;  %v3585_v12 = vrot.slane %v3584_v61, 4 }
 0x234   : > { %v3190_v32 = vadd.f32 %v3120_v22, %v2900_v54  ;;  %v4060_v8 = vrot.slane %v5278_v16, 5  ;;  %v2731_v35 = vunpack.c.l.b16 %v2687_v51  ;;  %v5279_v54 = vld [vmem:[%s5790_s29 + $0xbc] sm:$0x1]  ;;  %v3595_v22 = vrot.slane %v3594_v27, 4 }
 0x235   : > { %v4368_v46 = vadd.f32 %v4367_v4, %v4273_v38  ;;  %v4407_v44 = vmul.f32 %v4273_v38, %v4273_v38  ;;  %v2690_v4 = vsel %vm5928_vm7, %v2688_v30, %v2689_v5  ;;  %v3590_v20 = vsel %vm5802_vm4, %v3585_v12, %v6823_v56  ;;  %v5021_v56 = vld [vmem:[%s5790_s29 + $0xb4] sm:$0xe] }
 0x236   : > { %v4204_v49 = vpop.f32.mrf.mxu0  ;;  %v2732_v15 = vunpack.c.l.b16 %v2690_v4  ;;  %v4062_v26 = vrot.slane %v4060_v8, 4 }
 0x237   : > { %v4438_v24 = vadd.f32 %v4437_v60, %v4407_v44  ;;  %v5215_v60 = vld [vmem:[%s5790_s29 + $0xc0] sm:$0xf] }
 0x238   : > { %v3774_v31 = vpop.f32.mrf.mxu3  ;;  %5169 = vmatmul.msk.bf16.gmra.mxu2 %vm756_vm3, %v5368_v63  ;;  %v2835_v11 = vpop.f32.mrf.mxu1  ;;  %v5216_v63 = vld [vmem:[%s5790_s29 + $0xc4] sm:$0xf]  ;;  %v3602_v52 = vshrl.u32 %v5215_v60, 16  ;;  %v3605_v30 = vshll.u32 %v5215_v60, 16  ;;  %v2750_v45 = vpack.c.b16 %v2732_v15, %v2731_v35  ;;  %v5369_v35 = vld [vmem:[%s5790_s29 + $0xb4] sm:$0xff]  ;;  %v5042_v15 = vrot.slane %v5021_v56, 9 }
 0x239   : > { %v3844_v3 = vadd.f32 %v3774_v31, %v3190_v32  ;;  %v5022_v32 = vld [vmem:[%s5790_s29 + $0xb8] sm:$0xf]  ;;  %v3611_v61 = vshll.u32 %v5216_v63, 16  ;;  %v5280_v56 = vld [vmem:[%s5790_s29 + $0xc0] sm:$0xe] }
 0x23a   : > { %v2693_v31 = vrot.slane %v5022_v32, 5  ;;  %v3604_v51 = vrot.slane %v3602_v52, 4  ;;  %v3607_v4 = vrot.slane %v3605_v30, 5  ;;  %v5281_v32 = vld [vmem:[%s5790_s29 + $0xc4] sm:$0xf] }
 0x23b   : > { %v4274_v55 = vadd.f32 %v4204_v49, %v3844_v3  ;;  %v3123_v58 = vpop.f32.mrf.mxu2  ;;  %v4063_v49 = vrot.slane %v5279_v54, 5  ;;  %v3600_v3 = vsel %vm5802_vm4, %v3595_v22, %v3599_v10  ;;  %v2696_v54 = vrot.slane %v5023_v7, 5  ;;  %v5217_v22 = vld [vmem:[%s5790_s29 + $0xc8] sm:$0x1] }
 0x23c   : > { %v3191_v44 = vadd.f32 %v3123_v58, %v2901_v50  ;;  %v2695_v39 = vrot.slane %v2693_v31, 4  ;;  %v3608_v10 = vor.u32 %v3607_v4, %v3604_v51  ;;  %v3676_v30 = vunpack.c.l.b16 %v3600_v3  ;;  %v5282_v7 = vld [vmem:[%s5790_s29 + $0xc8] sm:$0x1] }
 0x23d   : > { %v5391_v21 = vpack.c.bf16 %v4274_v55, %v4273_v38  ;;  %v4369_v5 = vadd.f32 %v4368_v46, %v4274_v55  ;;  %v4408_v57 = vmul.f32 %v4274_v55, %v4274_v55  ;;  %5234 = vmatmul.msk.bf16.gmra.mxu3 %vm756_vm3, %v3693_v48  ;;  %v3615_v38 = vshrl.u32 %v5216_v63, 16 }
 0x23e   : > { %v4207_v25 = vpop.f32.mrf.mxu0  ;;  %v4061_v48 = vsel %vm5928_vm7, %v5300_v1, %v4060_v8  ;;  %v4064_v60 = vsel %vm5928_vm7, %v4062_v26, %v4063_v49  ;;  %v2902_v55 = vadd.f32 %v2835_v11, %v6324_v13  ;;  %v2694_v1 = vsel %vm5928_vm7, %v5042_v15, %v2693_v31  ;;  %v5218_v31 = vld [vmem:[%s5790_s29 + $0xcc] sm:$0xf] }
 0x23f   : > { %v4439_v14 = vadd.f32 %v4438_v24, %v4408_v57  ;;  %5455 = vst [vmem:[%s6744_s14 + $0x18] sm:$0xff] %v5391_v21   ;;  %v3675_v24 = vunpack.c.l.b16 %v3590_v20  ;;  %v3617_v58 = vrot.slane %v3615_v38, 4  ;;  %v4105_v13 = vunpack.c.l.b16 %v4061_v48 }
 0x240   : > { %v3777_v46 = vpop.f32.mrf.mxu3  ;;  %v2838_v16 = vpop.f32.mrf.mxu1  ;;  %v4106_v11 = vunpack.c.l.b16 %v4064_v60  ;;  %v3609_v26 = vrot.slane %v3608_v10, 4  ;;  %v2733_v4 = vunpack.c.l.b16 %v2694_v1  ;;  %v3626_v10 = vshrl.u32 %v5218_v31, 16 }
 0x241   : > { %5315 = vmatmul.msk.bf16.gmra.mxu0 %vm756_vm3, %v4123_v53  ;;  %v3845_v27 = vadd.f32 %v3777_v46, %v3191_v44  ;;  %v6856_v53 = vrot.slane %v3611_v61, 5  ;;  %v3621_v44 = vshll.u32 %v5217_v22, 16  ;;  %v4067_v61 = vrot.slane %v5281_v32, 5  ;;  %v5024_v32 = vld [vmem:[%s5790_s29 + $0xc0] sm:$0xe] }
 0x242   : > { %v2903_v46 = vadd.f32 %v2838_v16, %v6338_v19  ;;  %v4124_v3 = vpack.c.b16 %v4106_v11, %v4105_v13  ;;  %v5025_v16 = vld [vmem:[%s5790_s29 + $0xc4] sm:$0xf]  ;;  %v4070_v22 = vrot.slane %v5282_v7, 5 }
 0x243   : > { %v4275_v12 = vadd.f32 %v4207_v25, %v3845_v27  ;;  %v3125_v50 = vpop.f32.mrf.mxu2  ;;  %5057 = vmatmul.msk.bf16.gmra.mxu1 %vm756_vm3, %v2750_v45  ;;  %v3618_v49 = vor.u32 %v3617_v58, %v6856_v53  ;;  %v3694_v45 = vpack.c.b16 %v3676_v30, %v3675_v24  ;;  %v3614_v48 = vsel %vm5802_vm4, %v3609_v26, %v6856_v53 }
 0x244   : > { %v3192_v52 = vadd.f32 %v3125_v50, %v2902_v55  ;;  %v3623_v55 = vrot.slane %v3621_v44, 5  ;;  %v5219_v50 = vld [vmem:[%s5790_s29 + $0xd0] sm:$0xf]  ;;  %v3677_v1 = vunpack.c.l.b16 %v3614_v48  ;;  %v3628_v26 = vrot.slane %v3626_v10, 4 }
 0x245   : > { %v4370_v8 = vadd.f32 %v4369_v5, %v4275_v12  ;;  %v4409_v63 = vmul.f32 %v4275_v12, %v4275_v12  ;;  %v2697_v5 = vsel %vm5928_vm7, %v2695_v39, %v2696_v54  ;;  %v3619_v60 = vrot.slane %v3618_v49, 4  ;;  %v5284_v10 = vld [vmem:[%s5790_s29 + $0xd0] sm:$0xf] }
 0x246   : > { %v4209_v21 = vpop.f32.mrf.mxu0  ;;  %v2734_v27 = vunpack.c.l.b16 %v2697_v5  ;;  %v5301_v39 = vrot.slane %v5280_v56, 9  ;;  %v4069_v54 = vrot.slane %v4067_v61, 4  ;;  %v3635_v30 = vshll.u32 %v5219_v50, 16 }
 0x247   : > { %v4440_v57 = vadd.f32 %v4439_v14, %v4409_v63  ;;  %v3639_v13 = vshrl.u32 %v5219_v50, 16  ;;  %v3624_v44 = vsel %vm5802_vm4, %v3619_v60, %v3623_v55  ;;  %v5220_v60 = vld [vmem:[%s5790_s29 + $0xd4] sm:$0x1] }
 0x248   : > { %v3779_v25 = vpop.f32.mrf.mxu3  ;;  %5170 = vmatmul.msk.bf16.gmra.mxu2 %vm756_vm3, %v5369_v35  ;;  %v2840_v20 = vpop.f32.mrf.mxu1  ;;  %v2751_v53 = vpack.c.b16 %v2734_v27, %v2733_v4  ;;  %v4071_v5 = vsel %vm5928_vm7, %v4069_v54, %v4070_v22  ;;  %v5043_v4 = vrot.slane %v5024_v32, 9  ;;  %v3678_v48 = vunpack.c.l.b16 %v3624_v44 }
 0x249   : > { %v3846_v14 = vadd.f32 %v3779_v25, %v3192_v52  ;;  %v3629_v52 = vshll.u32 %v5218_v31, 16  ;;  %v5026_v25 = vld [vmem:[%s5790_s29 + $0xc8] sm:$0x1]  ;;  %v3641_v7 = vrot.slane %v3639_v13, 4 }
 0x24a   : > { %v2703_v56 = vrot.slane %v5026_v25, 5  ;;  %v3695_v22 = vpack.c.b16 %v3678_v48, %v3677_v1  ;;  %v4074_v25 = vrot.slane %v5284_v10, 5 }
 0x24b   : > { %v4276_v38 = vadd.f32 %v4209_v21, %v3846_v14  ;;  %v3128_v51 = vpop.f32.mrf.mxu2  ;;  %v2904_v14 = vadd.f32 %v2840_v20, %v6360_v43 }
 0x24c   : > { %v3193_v19 = vadd.f32 %v3128_v51, %v2903_v46  ;;  %v3637_v46 = vrot.slane %v3635_v30, 5  ;;  %v5370_v51 = vld [vmem:[%s5790_s29 + $0xc0] sm:$0xff] }
 0x24d   : > { %v5396_v24 = vpack.c.bf16 %v4276_v38, %v4275_v12  ;;  %v4371_v58 = vadd.f32 %v4370_v8, %v4276_v38  ;;  %v4410_v35 = vmul.f32 %v4276_v38, %v4276_v38  ;;  %5235 = vmatmul.msk.bf16.gmra.mxu3 %vm756_vm3, %v3694_v45  ;;  %v2700_v8 = vrot.slane %v5025_v16, 5 }
 0x24e   : > { %v4212_v15 = vpop.f32.mrf.mxu0  ;;  %v3631_v38 = vrot.slane %v3629_v52, 5 }
 0x24f   : > { %v4441_v63 = vadd.f32 %v4440_v57, %v4410_v35  ;;  %5456 = vst [vmem:[%s6744_s14 + $0x20] sm:$0xff] %v5396_v24   ;;  %v4068_v57 = vsel %vm5928_vm7, %v5301_v39, %v4067_v61  ;;  %v2702_v27 = vrot.slane %v2700_v8, 4  ;;  %v4108_v24 = vunpack.c.l.b16 %v4071_v5 }
 0x250   : > { %v3782_v21 = vpop.f32.mrf.mxu3  ;;  %v2843_v12 = vpop.f32.mrf.mxu1  ;;  %v4107_v50 = vunpack.c.l.b16 %v4068_v57  ;;  %v3632_v20 = vor.u32 %v3631_v38, %v3628_v26  ;;  %v2701_v16 = vsel %vm5928_vm7, %v5043_v4, %v2700_v8  ;;  %v3645_v39 = vshll.u32 %v5220_v60, 16  ;;  %v5285_v38 = vld [vmem:[%s5790_s29 + $0xd4] sm:$0x1]  ;;  %v7053_v60 = vld [vmem:[#allocation10_spill] sm:$0xff] }
 0x251   : > { %5316 = vmatmul.msk.bf16.gmra.mxu0 %vm756_vm3, %v4124_v3  ;;  %v3847_v11 = vadd.f32 %v3782_v21, %v3193_v19  ;;  %v2735_v13 = vunpack.c.l.b16 %v2701_v16 }
 0x252   : > { %v3633_v44 = vrot.slane %v3632_v20, 4  ;;  %v3647_v32 = vrot.slane %v3645_v39, 5 }
 0x253   : > { %v4277_v49 = vadd.f32 %v4212_v15, %v3847_v11  ;;  %v3130_v45 = vpop.f32.mrf.mxu2  ;;  %5058 = vmatmul.msk.bf16.gmra.mxu1 %vm756_vm3, %v2751_v53  ;;  %v3642_v15 = vor.u32 %v3641_v7, %v3637_v46  ;;  %v4125_v53 = vpack.c.b16 %v4108_v24, %v4107_v50  ;;  %v5371_v24 = vld [vmem:[%s5790_s29 + $0xcc] sm:$0xff] }
 0x254   : > { %v3194_v3 = vadd.f32 %v3130_v45, %v2904_v14  ;;  %v5283_v14 = vld [vmem:[%s5790_s29 + $0xcc] sm:$0xe] }
 0x255   : > { %v4372_v31 = vadd.f32 %v4371_v58, %v4277_v49  ;;  %v4411_v61 = vmul.f32 %v4277_v49, %v4277_v49  ;;  %v2704_v58 = vsel %vm5928_vm7, %v2702_v27, %v2703_v56  ;;  %v3643_v8 = vrot.slane %v3642_v15, 4 }
 0x256   : > { %v4214_v55 = vpop.f32.mrf.mxu0  ;;  %v2736_v11 = vunpack.c.l.b16 %v2704_v58  ;;  %v3638_v56 = vsel %vm5802_vm4, %v3633_v44, %v3637_v46  ;;  %v5302_v7 = vrot.slane %v5283_v14, 9 }
 0x257   : > { %v4442_v43 = vadd.f32 %v4441_v63, %v4411_v61  ;;  %v7052_v63 = vld [vmem:[#allocation9_spill] sm:$0xff]  ;;  %v4076_v61 = vrot.slane %v4074_v25, 4 }
 0x258   : > { %v3784_v35 = vpop.f32.mrf.mxu3  ;;  %5171 = vmatmul.msk.bf16.gmra.mxu2 %vm756_vm3, %v5370_v51  ;;  %v2845_v19 = vpop.f32.mrf.mxu1  ;;  %v2905_v30 = vadd.f32 %v2843_v12, %v7052_v63  ;;  %v2752_v12 = vpack.c.b16 %v2736_v11, %v2735_v13  ;;  %v4075_v46 = vsel %vm5928_vm7, %v5302_v7, %v4074_v25 }
 0x259   : > { %v3848_v54 = vadd.f32 %v3784_v35, %v3194_v3  ;;  %v4077_v3 = vrot.slane %v5285_v38, 5 }
 0x25b   : > { %v4278_v52 = vadd.f32 %v4214_v55, %v3848_v54  ;;  %v3133_v21 = vpop.f32.mrf.mxu2  ;;  %v2906_v55 = vadd.f32 %v2845_v19, %v7053_v60  ;;  %v4078_v36 = vsel %vm5928_vm7, %v4076_v61, %v4077_v3  ;;  %v4109_v19 = vunpack.c.l.b16 %v4075_v46 }
 0x25c   : > { %v3195_v1 = vadd.f32 %v3133_v21, %v2905_v30 }
 0x25d   : > { %v5401_v57 = vpack.c.bf16 %v4278_v52, %v4277_v49  ;;  %v4373_v5 = vadd.f32 %v4372_v31, %v4278_v52  ;;  %v4412_v26 = vmul.f32 %v4278_v52, %v4278_v52  ;;  %5236 = vmatmul.msk.bf16.gmra.mxu3 %vm756_vm3, %v3695_v22  ;;  %v3648_v31 = vsel %vm5802_vm4, %v3643_v8, %v3647_v32 }
 0x25e   : > { %v4217_v45 = vpop.f32.mrf.mxu0  ;;  %v3680_v20 = vunpack.c.l.b16 %v3648_v31  ;;  %v4110_v22 = vunpack.c.l.b16 %v4078_v36 }
 0x25f   : > { %v4443_v51 = vadd.f32 %v4442_v43, %v4412_v26  ;;  %5457 = vst [vmem:[%s6744_s14 + $0x28] sm:$0xff] %v5401_v57   ;;  %v3679_v43 = vunpack.c.l.b16 %v3638_v56 }
 0x260   : > { %v3787_v4 = vpop.f32.mrf.mxu3  ;;  %v2848_v27 = vpop.f32.mrf.mxu1  ;;  %v4126_v13 = vpack.c.b16 %v4110_v22, %v4109_v19 }
 0x261   : > { %5317 = vmatmul.msk.bf16.gmra.mxu0 %vm756_vm3, %v4125_v53  ;;  %v3849_v49 = vadd.f32 %v3787_v4, %v3195_v1  ;;  %v3696_v52 = vpack.c.b16 %v3680_v20, %v3679_v43  ;;  %v2907_v30 = vadd.f32 %v2848_v27, %v6406_v62 }
 0x263   : > { %v4279_v48 = vadd.f32 %v4217_v45, %v3849_v49  ;;  %v3135_v50 = vpop.f32.mrf.mxu2  ;;  %5059 = vmatmul.msk.bf16.gmra.mxu1 %vm756_vm3, %v2752_v12 }
 0x264   : > { %v3196_v58 = vadd.f32 %v3135_v50, %v2906_v55 }
 0x265   : > { %v4374_v35 = vadd.f32 %v4373_v5, %v4279_v48  ;;  %v4413_v16 = vmul.f32 %v4279_v48, %v4279_v48 }
 0x266   : > { %v4219_v15 = vpop.f32.mrf.mxu0 }
 0x267   : > { %v4444_v39 = vadd.f32 %v4443_v51, %v4413_v16 }
 0x268   : > { %v3789_v54 = vpop.f32.mrf.mxu3  ;;  %5172 = vmatmul.msk.bf16.gmra.mxu2 %vm756_vm3, %v5371_v24  ;;  %v2850_v10 = vpop.f32.mrf.mxu1 }
 0x269   : > { %v3850_v53 = vadd.f32 %v3789_v54, %v3196_v58  ;;  %v2908_v14 = vadd.f32 %v2850_v10, %v6425_v9 }
 0x26b   : > { %v4280_v63 = vadd.f32 %v4219_v15, %v3850_v53  ;;  %v3138_v21 = vpop.f32.mrf.mxu2 }
 0x26c   : > { %v3197_v8 = vadd.f32 %v3138_v21, %v2907_v30 }
 0x26d   : > { %v5406_v11 = vpack.c.bf16 %v4280_v63, %v4279_v48  ;;  %v4375_v44 = vadd.f32 %v4374_v35, %v4280_v63  ;;  %v4414_v47 = vmul.f32 %v4280_v63, %v4280_v63  ;;  %5237 = vmatmul.msk.bf16.gmra.mxu3 %vm756_vm3, %v3696_v52 }
 0x26e   : > { %v4222_v32 = vpop.f32.mrf.mxu0 }
 0x26f   : > { %v4445_v25 = vadd.f32 %v4444_v39, %v4414_v47  ;;  %5458 = vst [vmem:[%s6744_s14 + $0x30] sm:$0xff] %v5406_v11  }
 0x270   : > { %v3792_v57 = vpop.f32.mrf.mxu3  ;;  %v2853_v5 = vpop.f32.mrf.mxu1 }
 0x271   : > { %5318 = vmatmul.msk.bf16.gmra.mxu0 %vm756_vm3, %v4126_v13  ;;  %v3851_v26 = vadd.f32 %v3792_v57, %v3197_v8  ;;  %v2909_v31 = vadd.f32 %v2853_v5, %v6438_v17 }
 0x273   : > { %v4281_v1 = vadd.f32 %v4222_v32, %v3851_v26  ;;  %v3140_v62 = vpop.f32.mrf.mxu2 }
 0x274   : > { %v3198_v51 = vadd.f32 %v3140_v62, %v2908_v14 }
 0x275   : > { %v4376_v45 = vadd.f32 %v4375_v44, %v4281_v1  ;;  %v4415_v38 = vmul.f32 %v4281_v1, %v4281_v1 }
 0x276   : > { %v4224_v12 = vpop.f32.mrf.mxu0 }
 0x277   : > { %v4446_v4 = vadd.f32 %v4445_v25, %v4415_v38 }
 0x278   : > { %v3794_v27 = vpop.f32.mrf.mxu3  ;;  %v2855_v56 = vpop.f32.mrf.mxu1 }
 0x279   : > { %v3852_v7 = vadd.f32 %v3794_v27, %v3198_v51  ;;  %v2910_v35 = vadd.f32 %v2855_v56, %v6461_v28 }
 0x27b   : > { %v4282_v49 = vadd.f32 %v4224_v12, %v3852_v7  ;;  %v3143_v61 = vpop.f32.mrf.mxu2 }
 0x27c   : > { %v3199_v55 = vadd.f32 %v3143_v61, %v2909_v31 }
 0x27d   : > { %v5411_v3 = vpack.c.bf16 %v4282_v49, %v4281_v1  ;;  %v4377_v48 = vadd.f32 %v4376_v45, %v4282_v49  ;;  %v4416_v60 = vmul.f32 %v4282_v49, %v4282_v49 }
 0x27e   : > { %v4227_v50 = vpop.f32.mrf.mxu0 }
 0x27f   : > { %v4447_v9 = vadd.f32 %v4446_v4, %v4416_v60  ;;  %5459 = vst [vmem:[%s6744_s14 + $0x38] sm:$0xff] %v5411_v3  }
 0x280   : > { %v3797_v24 = vpop.f32.mrf.mxu3  ;;  %v2858_v43 = vpop.f32.mrf.mxu1 }
 0x281   : > { %v3853_v20 = vadd.f32 %v3797_v24, %v3199_v55  ;;  %v2911_v53 = vadd.f32 %v2858_v43, %v6476_v18 }
 0x283   : > { %v4283_v46 = vadd.f32 %v4227_v50, %v3853_v20  ;;  %v3145_v16 = vpop.f32.mrf.mxu2 }
 0x284   : > { %v3200_v15 = vadd.f32 %v3145_v16, %v2910_v35 }
 0x285   : > { %v4378_v58 = vadd.f32 %v4377_v48, %v4283_v46  ;;  %v4417_v36 = vmul.f32 %v4283_v46, %v4283_v46 }
 0x286   : > { %v4229_v17 = vpop.f32.mrf.mxu0 }
 0x287   : > { %v4448_v39 = vadd.f32 %v4447_v9, %v4417_v36 }
 0x288   : > { %v3799_v54 = vpop.f32.mrf.mxu3  ;;  %v2860_v19 = vpop.f32.mrf.mxu1 }
 0x289   : > { %v3854_v22 = vadd.f32 %v3799_v54, %v3200_v15  ;;  %v2912_v25 = vadd.f32 %v2860_v19, %v6497_v2 }
 0x28b   : > { %v4284_v10 = vadd.f32 %v4229_v17, %v3854_v22  ;;  %v3148_v52 = vpop.f32.mrf.mxu2 }
 0x28c   : > { %v3201_v13 = vadd.f32 %v3148_v52, %v2911_v53 }
 0x28d   : > { %v5416_v63 = vpack.c.bf16 %v4284_v10, %v4283_v46  ;;  %v4379_v30 = vadd.f32 %v4378_v58, %v4284_v10  ;;  %v4418_v21 = vmul.f32 %v4284_v10, %v4284_v10 }
 0x28e   : > { %v4232_v11 = vpop.f32.mrf.mxu0 }
 0x28f   : > { %v4449_v28 = vadd.f32 %v4448_v39, %v4418_v21  ;;  %5460 = vst [vmem:[%s6744_s14 + $0x40] sm:$0xff] %v5416_v63  }
 0x290   : > { %v3802_v44 = vpop.f32.mrf.mxu3  ;;  %v2863_v47 = vpop.f32.mrf.mxu1 }
 0x291   : > { %v3855_v8 = vadd.f32 %v3802_v44, %v3201_v13  ;;  %v2913_v12 = vadd.f32 %v2863_v47, %v6514_v41 }
 0x293   : > { %v4285_v32 = vadd.f32 %v4232_v11, %v3855_v8  ;;  %v3150_v57 = vpop.f32.mrf.mxu2 }
 0x294   : > { %v3202_v1 = vadd.f32 %v3150_v57, %v2912_v25 }
 0x295   : > { %v4380_v5 = vadd.f32 %v4379_v30, %v4285_v32  ;;  %v4419_v26 = vmul.f32 %v4285_v32, %v4285_v32 }
 0x296   : > { %v4234_v18 = vpop.f32.mrf.mxu0 }
 0x297   : > { %v4450_v14 = vadd.f32 %v4449_v28, %v4419_v26 }
 0x298   : > { %v3804_v62 = vpop.f32.mrf.mxu3  ;;  %v2865_v45 = vpop.f32.mrf.mxu1 }
 0x299   : > { %v3856_v38 = vadd.f32 %v3804_v62, %v3202_v1  ;;  %v2914_v55 = vadd.f32 %v2865_v45, %v6532_v40 }
 0x29b   : > { %v4286_v51 = vadd.f32 %v4234_v18, %v3856_v38  ;;  %v3153_v4 = vpop.f32.mrf.mxu2 }
 0x29c   : > { %v3203_v49 = vadd.f32 %v3153_v4, %v2913_v12 }
 0x29d   : > { %v5421_v27 = vpack.c.bf16 %v4286_v51, %v4285_v32  ;;  %v4381_v56 = vadd.f32 %v4380_v5, %v4286_v51  ;;  %v4420_v7 = vmul.f32 %v4286_v51, %v4286_v51 }
 0x29e   : > { %v4237_v31 = vpop.f32.mrf.mxu0 }
 0x29f   : > { %v4451_v2 = vadd.f32 %v4450_v14, %v4420_v7  ;;  %5461 = vst [vmem:[%s6744_s14 + $0x48] sm:$0xff] %v5421_v27  }
 0x2a0   : > { %v3807_v61 = vpop.f32.mrf.mxu3  ;;  %v2868_v3 = vpop.f32.mrf.mxu1 }
 0x2a1   : > { %v3857_v48 = vadd.f32 %v3807_v61, %v3203_v49  ;;  %v2915_v36 = vadd.f32 %v2868_v3, %v6548_v33 }
 0x2a3   : > { %v4287_v60 = vadd.f32 %v4237_v31, %v3857_v48  ;;  %v3155_v50 = vpop.f32.mrf.mxu2 }
 0x2a4   : > { %v3204_v43 = vadd.f32 %v3155_v50, %v2914_v55 }
 0x2a5   : > { %v4382_v9 = vadd.f32 %v4381_v56, %v4287_v60  ;;  %v4421_v24 = vmul.f32 %v4287_v60, %v4287_v60 }
 0x2a6   : > { %v4239_v41 = vpop.f32.mrf.mxu0 }
 0x2a7   : > { %v4452_v20 = vadd.f32 %v4451_v2, %v4421_v24 }
 0x2a8   : > { %v3809_v46 = vpop.f32.mrf.mxu3  ;;  %v2870_v35 = vpop.f32.mrf.mxu1 }
 0x2a9   : > { %v3858_v16 = vadd.f32 %v3809_v46, %v3204_v43  ;;  %v2916_v30 = vadd.f32 %v2870_v35, %v6570_v59 }
 0x2ab   : > { %v4288_v58 = vadd.f32 %v4239_v41, %v3858_v16  ;;  %v3158_v15 = vpop.f32.mrf.mxu2 }
 0x2ac   : > { %v3205_v19 = vadd.f32 %v3158_v15, %v2915_v36 }
 0x2ad   : > { %v5426_v17 = vpack.c.bf16 %v4288_v58, %v4287_v60  ;;  %v4383_v39 = vadd.f32 %v4382_v9, %v4288_v58  ;;  %v4422_v54 = vmul.f32 %v4288_v58, %v4288_v58 }
 0x2ae   : > { %v4242_v22 = vpop.f32.mrf.mxu0 }
 0x2af   : > { %v4453_v40 = vadd.f32 %v4452_v20, %v4422_v54  ;;  %5462 = vst [vmem:[%s6744_s14 + $0x50] sm:$0xff] %v5426_v17  }
 0x2b0   : > { %v3812_v10 = vpop.f32.mrf.mxu3  ;;  %v2873_v53 = vpop.f32.mrf.mxu1 }
 0x2b1   : > { %v3859_v52 = vadd.f32 %v3812_v10, %v3205_v19  ;;  %v2917_v57 = vadd.f32 %v2873_v53, %v6583_v42 }
 0x2b3   : > { %v4289_v63 = vadd.f32 %v4242_v22, %v3859_v52  ;;  %v3160_v21 = vpop.f32.mrf.mxu2 }
 0x2b4   : > { %v3206_v28 = vadd.f32 %v3160_v21, %v2916_v30 }
 0x2b5   : > { %v4384_v13 = vadd.f32 %v4383_v39, %v4289_v63  ;;  %v4423_v11 = vmul.f32 %v4289_v63, %v4289_v63 }
 0x2b6   : > { %v4244_v33 = vpop.f32.mrf.mxu0 }
 0x2b7   : > { %v4454_v44 = vadd.f32 %v4453_v40, %v4423_v11 }
 0x2b8   : > { %v3814_v47 = vpop.f32.mrf.mxu3  ;;  %v2875_v8 = vpop.f32.mrf.mxu1 }
 0x2b9   : > { %v3860_v32 = vadd.f32 %v3814_v47, %v3206_v28  ;;  %v2918_v4 = vadd.f32 %v2875_v8, %v6601_v23 }
 0x2bb   : > { %v4290_v25 = vadd.f32 %v4244_v33, %v3860_v32  ;;  %v3163_v5 = vpop.f32.mrf.mxu2 }
 0x2bc   : > { %v3207_v14 = vadd.f32 %v3163_v5, %v2917_v57 }
 0x2bd   : > { %v5431_v26 = vpack.c.bf16 %v4290_v25, %v4289_v63  ;;  %v4385_v1 = vadd.f32 %v4384_v13, %v4290_v25  ;;  %v4424_v18 = vmul.f32 %v4290_v25, %v4290_v25 }
 0x2be   : > { %v4247_v62 = vpop.f32.mrf.mxu0 }
 0x2bf   : > { %v4455_v59 = vadd.f32 %v4454_v44, %v4424_v18  ;;  %5463 = vst [vmem:[%s6744_s14 + $0x58] sm:$0xff] %v5431_v26  }
 0x2c0   : > { %v3817_v45 = vpop.f32.mrf.mxu3  ;;  %v2878_v38 = vpop.f32.mrf.mxu1 }
 0x2c1   : > { %v3861_v51 = vadd.f32 %v3817_v45, %v3207_v14  ;;  %v2919_v60 = vadd.f32 %v2878_v38, %v6616_v6 }
 0x2c3   : > { %v4291_v12 = vadd.f32 %v4247_v62, %v3861_v51  ;;  %v3165_v27 = vpop.f32.mrf.mxu2  ;;  %v7054_v62 = vld [vmem:[#allocation11_spill] sm:$0xff] }
 0x2c4   : > { %v3208_v49 = vadd.f32 %v3165_v27, %v2918_v4 }
 0x2c5   : > { %v4386_v56 = vadd.f32 %v4385_v1, %v4291_v12  ;;  %v4425_v7 = vmul.f32 %v4291_v12, %v4291_v12 }
 0x2c6   : > { %v4249_v42 = vpop.f32.mrf.mxu0 }
 0x2c7   : > { %v4456_v31 = vadd.f32 %v4455_v59, %v4425_v7 }
 0x2c8   : > { %v3819_v2 = vpop.f32.mrf.mxu3  ;;  %v2880_v61 = vpop.f32.mrf.mxu1 }
 0x2c9   : > { %v3862_v3 = vadd.f32 %v3819_v2, %v3208_v49  ;;  %v2920_v58 = vadd.f32 %v2880_v61, %v6637_v37 }
 0x2cb   : > { %v4292_v48 = vadd.f32 %v4249_v42, %v3862_v3  ;;  %v3168_v55 = vpop.f32.mrf.mxu2 }
 0x2cc   : > { %v3209_v43 = vadd.f32 %v3168_v55, %v2919_v60 }
 0x2cd   : > { %v5436_v50 = vpack.c.bf16 %v4292_v48, %v4291_v12  ;;  %v4387_v9 = vadd.f32 %v4386_v56, %v4292_v48  ;;  %v4426_v24 = vmul.f32 %v4292_v48, %v4292_v48 }
 0x2ce   : > { %v4252_v41 = vpop.f32.mrf.mxu0 }
 0x2cf   : > { %v4457_v23 = vadd.f32 %v4456_v31, %v4426_v24  ;;  %5464 = vst [vmem:[%s6744_s14 + $0x60] sm:$0xff] %v5436_v50  }
 0x2d0   : > { %v3822_v20 = vpop.f32.mrf.mxu3  ;;  %v2883_v35 = vpop.f32.mrf.mxu1 }
 0x2d1   : > { %v3863_v46 = vadd.f32 %v3822_v20, %v3209_v43  ;;  %v2921_v10 = vadd.f32 %v2883_v35, %v6650_v34 }
 0x2d3   : > { %v4293_v16 = vadd.f32 %v4252_v41, %v3863_v46  ;;  %v3170_v36 = vpop.f32.mrf.mxu2 }
 0x2d4   : > { %v3210_v39 = vadd.f32 %v3170_v36, %v2920_v58 }
 0x2d5   : > { %v4388_v15 = vadd.f32 %v4387_v9, %v4293_v16  ;;  %v4427_v17 = vmul.f32 %v4293_v16, %v4293_v16 }
 0x2d6   : > { %v4254_v6 = vpop.f32.mrf.mxu0 }
 0x2d7   : > { %v4458_v54 = vadd.f32 %v4457_v23, %v4427_v17 }
 0x2d8   : > { %v3824_v19 = vpop.f32.mrf.mxu3  ;;  %v2885_v52 = vpop.f32.mrf.mxu1 }
 0x2d9   : > { %v3864_v22 = vadd.f32 %v3824_v19, %v3210_v39  ;;  %v2922_v47 = vadd.f32 %v2885_v52, %v6670_v0 }
 0x2db   : > { %v4294_v40 = vadd.f32 %v4254_v6, %v3864_v22  ;;  %v3173_v53 = vpop.f32.mrf.mxu2 }
 0x2dc   : > { %v3211_v13 = vadd.f32 %v3173_v53, %v2921_v10 }
 0x2dd   : > { %v5441_v63 = vpack.c.bf16 %v4294_v40, %v4293_v16  ;;  %v4389_v30 = vadd.f32 %v4388_v15, %v4294_v40  ;;  %v4428_v21 = vmul.f32 %v4294_v40, %v4294_v40 }
 0x2de   : > { %v4257_v11 = vpop.f32.mrf.mxu0 }
 0x2df   : > { %v4459_v37 = vadd.f32 %v4458_v54, %v4428_v21  ;;  %5465 = vst [vmem:[%s6744_s14 + $0x68] sm:$0xff] %v5441_v63  }
 0x2e0   : > { %v3827_v28 = vpop.f32.mrf.mxu3  ;;  %v2888_v34 = vpop.f32.mrf.mxu1 }
 0x2e1   : > { %v3865_v33 = vadd.f32 %v3827_v28, %v3211_v13  ;;  %v2923_v59 = vadd.f32 %v2888_v34, %v7054_v62 }
 0x2e3   : > { %v4295_v44 = vadd.f32 %v4257_v11, %v3865_v33  ;;  %v3175_v8 = vpop.f32.mrf.mxu2 }
 0x2e4   : > { %v3212_v57 = vadd.f32 %v3175_v8, %v2922_v47 }
 0x2e5   : > { %v4390_v32 = vadd.f32 %v4389_v30, %v4295_v44  ;;  %v4429_v25 = vmul.f32 %v4295_v44, %v4295_v44 }
 0x2e6   : > { %v4259_v5 = vpop.f32.mrf.mxu0 }
 0x2e7   : > { %v4460_v26 = vadd.f32 %v4459_v37, %v4429_v25 }
 0x2e8   : > { %v3829_v1 = vpop.f32.mrf.mxu3  ;;  %v2890_v27 = vpop.f32.mrf.mxu1 }
 0x2e9   : > { %v3866_v18 = vadd.f32 %v3829_v1, %v3212_v57  ;;  %v2924_v31 = vadd.f32 %v2890_v27, %v6705_v29 }
 0x2eb   : > { %v4296_v14 = vadd.f32 %v4259_v5, %v3866_v18  ;;  %v3178_v45 = vpop.f32.mrf.mxu2 }
 0x2ec   : > { %v3213_v4 = vadd.f32 %v3178_v45, %v2923_v59 }
 0x2ed   : > { %v5446_v38 = vpack.c.bf16 %v4296_v14, %v4295_v44  ;;  %v4391_v51 = vadd.f32 %v4390_v32, %v4296_v14  ;;  %v4430_v12 = vmul.f32 %v4296_v14, %v4296_v14 }
 0x2ee   : > { %v4262_v56 = vpop.f32.mrf.mxu0 }
 0x2ef   : > { %v4461_v0 = vadd.f32 %v4460_v26, %v4430_v12  ;;  %5466 = vst [vmem:[%s6744_s14 + $0x70] sm:$0xff] %v5446_v38  }
 0x2f0   : > { %v3832_v7 = vpop.f32.mrf.mxu3 }
 0x2f1   : > { %v3867_v49 = vadd.f32 %v3832_v7, %v3213_v4 }
 0x2f3   : > { %v4297_v42 = vadd.f32 %v4262_v56, %v3867_v49  ;;  %v3180_v2 = vpop.f32.mrf.mxu2 }
 0x2f4   : > { %v3214_v48 = vadd.f32 %v3180_v2, %v2924_v31 }
 0x2f5   : > { %v4392_v61 = vadd.f32 %v4391_v51, %v4297_v42  ;;  %v4431_v3 = vmul.f32 %v4297_v42, %v4297_v42 }
 0x2f6   : > { %v4264_v9 = vpop.f32.mrf.mxu0 }
 0x2f7   : > { %v4462_v60 = vadd.f32 %v4461_v0, %v4431_v3 }
 0x2f8   : > { %v3834_v55 = vpop.f32.mrf.mxu3 }
 0x2f9   : > { %v3868_v50 = vadd.f32 %v3834_v55, %v3214_v48 }
 0x2fb   : > { %v4298_v24 = vadd.f32 %v4264_v9, %v3868_v50 }
 0x2fd   : > { %v5451_v29 = vpack.c.bf16 %v4298_v24, %v4297_v42  ;;  %v4393_v43 = vadd.f32 %v4392_v61, %v4298_v24  ;;  %v4432_v41 = vmul.f32 %v4298_v24, %v4298_v24 }
 0x2ff   : > { %v4394_v23 = vrot.slane %v4393_v43, 4  ;;  %v4463_v20 = vadd.f32 %v4462_v60, %v4432_v41  ;;  %5467 = vst [vmem:[%s6744_s14 + $0x78] sm:$0xff] %v5451_v29  }
 0x300   : > { %5566 = shalt.err (!%p5563_p5)
}
 0x301   : > { %s5679_s14 = smov 64   ;;  %s5680_s29 = smov 4   ;;  %v4395_v46 = vadd.f32 %v4394_v23, %v4393_v43  ;;  %v4464_v35 = vrot.slane %v4463_v20, 4 }
 0x302   : > { %5472 = dma.vmem_to_hbm [thread:$0]  (%p5748_p4), %s4496_s5, 2048, %s4498_s6, %s4472_s7, %s5679_s14, %s5679_s14, %s5680_s29  }
 0x303   : > { %v4465_v16 = vadd.f32 %v4464_v35, %v4463_v20  ;;  %v4396_v58 = vrot.slane %v4395_v46, 2  ;;  %s4510_s9 = scalar_lea.hbm %s7041_s3, %s5669_s18  ;;  %s6967_s10 = sand.u32 1, %s4664_s21  }
 0x304   : > { %s4524_s24 = scalar_lea.hbm %s7042_s4, %s5669_s18  ;;  %s218_s26 = scalar_lea.vmem [#allocation4], %s6727_s12 }
 0x305   : > { %v4397_v36 = vadd.f32 %v4396_v58, %v4395_v46  ;;  %v4466_v15 = vrot.slane %v4465_v16, 2  ;;  %s6974_s5 = sshll.u32 %s218_s26, 4  ;;  %s6976_s6 = sshll.u32 %s4510_s9, 4  ;;  %s4513_s5 = int_to_ptr.vmem [resolvable:$true] %s6974_s5  ;;  %s4515_s6 = int_to_ptr.hbm [resolvable:$true] %s6976_s6 }
 0x306   : > { %s224_s7 = scalar_lea.vmem [#allocation6], %s6727_s12  ;;  %s6981_s14 = sshll.u32 %s4524_s24, 4  ;;  %s4529_s14 = int_to_ptr.hbm [resolvable:$true] %s6981_s14 }
 0x307   : > { %v4398_v17 = vrot.slane %v4397_v36, 1  ;;  %v4467_v39 = vadd.f32 %v4466_v15, %v4465_v16  ;;  %s6979_s21 = sshll.u32 %s224_s7, 4  ;;  %s4477_s18 = scalar_lea.sflag [#allocation5], %s6967_s10  ;;  %s4527_s21 = int_to_ptr.vmem [resolvable:$true] %s6979_s21 }
 0x308   : > { %s5581_s29 = sshra.s32 %s4515_s6, 4  ;;  %s5587_s9 = scalar_lea.hbm %s7041_s3, 2  ;;  %s5582_s29 = int_to_ptr.hbm [resolvable:$true] %s5581_s29 }
 0x309   : > { %v4399_v6 = vadd.f32 %v4398_v17, %v4397_v36  ;;  %v4468_v54 = vrot.slane %v4467_v39, 1  ;;  %s5583_s30 = scalar_lea.hbm %s5582_s29, 1  ;;  %p5588_p10 = scmp.lt.s32.totalorder %s5582_s29, %s7041_s3 }
 0x30a   : > { %p5584_p6 = scmp.ne.s32.totalorder %s5582_s29, %s5583_s30  ;;  %p5589_p11 = scmp.lt.s32.totalorder %s5587_s9, %s5583_s30 }
 0x30b   : > { %4400 = vst [vmem:[%s218_s26] sm:$0x1] %v4399_v6  ;;  %v4469_v19 = vadd.f32 %v4468_v54, %v4467_v39 }
 0x30c   : > { %p5585_p7 = pnand %p5584_p6, %p5748_p4  ;;  %p5590_p12 = por %p5589_p11, %p5588_p10 }
 0x30e   : > { %p5586_p9 = pneg %p5585_p7 }
 0x310   : > { %p5591_p13 = pnand %p5590_p12, %p5586_p9 }
 0x312   : > { %5594 = shalt.err (!%p5591_p13)
}
 0x313   : > { %5473 = dma.vmem_to_hbm [thread:$0]  (%p5748_p4), %s4513_s5, 16, %s4515_s6, %s4477_s18   ;;  %4470 = vst [vmem:[%s224_s7] sm:$0x1] %v4469_v19 }
 0x314   : > { %s5609_s10 = sshra.s32 %s4529_s14, 4  ;;  %s5615_s30 = scalar_lea.hbm %s7042_s4, 2  ;;  %s5610_s10 = int_to_ptr.hbm [resolvable:$true] %s5609_s10 }
 0x315   : > { %s5611_s24 = scalar_lea.hbm %s5610_s10, 1  ;;  %p5616_p3 = scmp.lt.s32.totalorder %s5610_s10, %s7042_s4 }
 0x316   : > { %p5612_p0 = scmp.ne.s32.totalorder %s5610_s10, %s5611_s24  ;;  %p5617_p5 = scmp.lt.s32.totalorder %s5615_s30, %s5611_s24 }
 0x318   : > { %p5613_p1 = pnand %p5612_p0, %p5748_p4  ;;  %p5618_p6 = por %p5617_p5, %p5616_p3 }
 0x31a   : > { %p5614_p2 = pneg %p5613_p1 }
 0x31c   : > { %p5619_p7 = pnand %p5618_p6, %p5614_p2 }
 0x31e   : > { %5622 = shalt.err (!%p5619_p7)
}
 0x31f   : > { %5474 = dma.vmem_to_hbm [thread:$0]  (%p5748_p4), %s4527_s21, 16, %s4529_s14, %s4477_s18  }
 0x320 PF: > { %p5488_p9 = scmp.ge.s32.totalorder %s5677_s20, 2  ;;  %s4540_s5 = sand.u32 1, %s5657_s15  }
 0x321   : > { %s4541_s6 = scalar_lea.sflag [#allocation3], %s4540_s5 }
 0x322   : > { %p5479_p10 = pnand %p5488_p9, %p5757_p8 }
 0x324   : > { %p5480_p11 = pneg %p5479_p10 }
 0x326   : > { %5648 = dma.done.wait (%p5480_p11), %s4541_s6, 2048  }
 0x327   : > { %5650 = vsyncadd (%p5480_p11), %s4541_s6, 4294965248  ;;  %s4550_s25 = sand.u32 1, %s4665_s22  }
 0x328   : > { %s4551_s7 = scalar_lea.sflag [#allocation5], %s4550_s25 }
 0x329   : > { %5652 = dma.done.wait (%p5480_p11), %s4551_s7, 32  }
 0x32a   : > { %5654 = vsyncadd (%p5480_p11), %s4551_s7, 4294967264  ;;  %s21_s20 = sadd.s32 1, %s5677_s20   ;;  %s7055_s15 = smov %s5661_s16 }
 0x32b   : > { %p18_p4 = scmp.ge.s32.totalorder %s21_s20, 4   ;;  %s7056_s16 = smov %s5665_s17 }
 0x32c   : > { %s7057_s17 = smov %s5763_s28  ;;  %s7058_s18 = smov %s5673_s19 }
 0x32d   : > { %s7059_s19 = smov %s7061_s23  ;;  %20 = sbr.rel (!%p18_p4) target bundleno = 6 (0x6), region = 106 }
 0x332   :  { %4565 = vsyncpa [#allocation3], 1 }
 0x333   :  { %4567 = vsyncpa [#allocation3 + $0x1], 1 }
 0x334   :  { %4568 = vsyncpa [#allocation5], 1 }
 0x335   :  { %4570 = vsyncpa [#allocation5 + $0x1], 1 }

</bundles_post_ra>
